<compile_context>
chip_gen: v7x
topology: tpu7x:2x2x1
jax: 0.10.0
libtpu: 0.0.40
codegen_flags: <defaults>
</compile_context>

<pallas_src>
import jax
import jax.numpy as jnp
from jax.experimental import pallas as pl
from jax.experimental.pallas import tpu as pltpu


def _round_up(x, m):
    return (x + m - 1) // m * m


# ----------------------------------------------------------------------------
# Pallas kernels
# ----------------------------------------------------------------------------
def _matmul_bias_relu_kernel(x_ref, w_ref, b_ref, o_ref):
    # x: (TM, K) bf16, w: (K, TN) bf16, b: (1, TN) f32 -> o: (TM, TN)
    acc = jnp.dot(x_ref[...], w_ref[...], preferred_element_type=jnp.float32)
    acc = acc + b_ref[...]
    o_ref[...] = jnp.maximum(acc, 0.0).astype(o_ref.dtype)


def matmul_bias_relu(x, w, b, out_dtype=jnp.bfloat16):
    """Fused (x @ w + b) -> ReLU, tiled over M and N, bf16 in / f32 accumulate."""
    M, K = x.shape
    K2, N = w.shape
    assert K == K2 and b.shape == (N,)
    tm = min(256, _round_up(M, 8))
    tn = 128 if (N > 128 and N % 128 == 0) else N
    grid = (pl.cdiv(M, tm), N // tn)
    return pl.pallas_call(
        _matmul_bias_relu_kernel,
        out_shape=jax.ShapeDtypeStruct((M, N), out_dtype),
        grid=grid,
        in_specs=[
            pl.BlockSpec((tm, K), lambda i, j: (i, 0)),
            pl.BlockSpec((K, tn), lambda i, j: (0, j)),
            pl.BlockSpec((1, tn), lambda i, j: (0, j)),
        ],
        out_specs=pl.BlockSpec((tm, tn), lambda i, j: (i, j)),
        compiler_params=pltpu.CompilerParams(
            dimension_semantics=("parallel", "parallel"),
            vmem_limit_bytes=32 * 1024 * 1024,
        ),
    )(x.astype(jnp.bfloat16), w.astype(jnp.bfloat16),
      b.reshape(1, N).astype(jnp.float32))


def _gap_classifier_kernel(x_ref, w_ref, b_ref, o_ref):
    # x: (N, HW, C) bf16 -> global average pool -> (x_bar @ w + b) -> ReLU.
    pooled = jnp.mean(x_ref[...].astype(jnp.float32), axis=1)            # (N, C)
    acc = jnp.dot(pooled, w_ref[...], preferred_element_type=jnp.float32)
    o_ref[...] = jnp.maximum(acc + b_ref[...], 0.0)


def gap_classifier(x_nhwc, w, b):
    """AdaptiveAvgPool2d((1,1)) + Conv1x1 + ReLU fused into a single kernel.

    `w` columns are zero-padded to a multiple of 128 so the output store is
    lane-dense; the caller slices the real classes back out."""
    N, H, W, C = x_nhwc.shape
    NP = w.shape[1]
    x = x_nhwc.reshape(N, H * W, C)
    return pl.pallas_call(
        _gap_classifier_kernel,
        out_shape=jax.ShapeDtypeStruct((N, NP), jnp.float32),
        grid=(1,),
        in_specs=[
            pl.BlockSpec((N, H * W, C), lambda i: (0, 0, 0)),
            pl.BlockSpec((C, NP), lambda i: (0, 0)),
            pl.BlockSpec((1, NP), lambda i: (0, 0)),
        ],
        out_specs=pl.BlockSpec((N, NP), lambda i: (0, 0)),
        compiler_params=pltpu.CompilerParams(vmem_limit_bytes=32 * 1024 * 1024),
    )(x, w.astype(jnp.float32), b.reshape(1, NP).astype(jnp.float32))


# ----------------------------------------------------------------------------
# Layer helpers (im2col glue in plain JAX, all matmul compute inside Pallas)
# ----------------------------------------------------------------------------
def conv2d_mat_relu(x, w_mat, b, kh, kw, stride=1, padding=0,
                    out_dtype=jnp.bfloat16):
    """x: (N,H,W,Cin) NHWC; w_mat: (kh*kw*Cin, Cout), row order
    ((ki*kw + kj)*Cin + c); b: (Cout,)."""
    N, H, W, Cin = x.shape
    Cout = w_mat.shape[1]
    if padding:
        x = jnp.pad(x, ((0, 0), (padding, padding), (padding, padding), (0, 0)))
    Hp, Wp = x.shape[1], x.shape[2]
    Ho = (Hp - kh) // stride + 1
    Wo = (Wp - kw) // stride + 1
    if kh == 1 and kw == 1 and stride == 1:
        patches = x.reshape(N * Ho * Wo, Cin)          # 1x1 conv: pure reshape
    else:
        # TODO(synk): for large resolutions fold the tap loop into the kernel
        # (extra "arbitrary" grid axis over kh*kw with an f32 VMEM accumulator)
        # instead of materializing im2col patches in HBM.
        slabs = []
        for ki in range(kh):
            for kj in range(kw):
                slabs.append(
                    x[:,
                      ki:ki + stride * (Ho - 1) + 1:stride,
                      kj:kj + stride * (Wo - 1) + 1:stride,
                      :]
                )
        patches = jnp.stack(slabs, axis=3).reshape(N * Ho * Wo, kh * kw * Cin)
    out = matmul_bias_relu(patches, w_mat, b, out_dtype=out_dtype)
    return out.reshape(N, Ho, Wo, Cout)


def maxpool_3x3_s2(x):
    """MaxPool2d(kernel_size=3, stride=2), floor mode (PyTorch default).

    Pairwise max tree over the 9 shifted strided views; XLA fuses this into a
    single memory pass -- no 9x HBM materialization (perf-review option 1)."""
    N, H, W, C = x.shape
    Ho = (H - 3) // 2 + 1
    Wo = (W - 3) // 2 + 1
    out = None
    for di in range(3):
        for dj in range(3):
            win = jax.lax.slice(
                x,
                (0, di, dj, 0),
                (N, di + 2 * (Ho - 1) + 1, dj + 2 * (Wo - 1) + 1, C),
                (1, 2, 2, 1),
            )
            out = win if out is None else jnp.maximum(out, win)
    return out


def fire_module(x, p):
    # squeeze 1x1 + ReLU (Pallas matmul, pure-reshape "im2col")
    s = conv2d_mat_relu(x, p["sq_w"], p["sq_b"], 1, 1)
    # expand1x1 + expand3x3 + ReLU fused into ONE lane-dense Pallas matmul:
    # the 1x1 weights sit at the centre tap (rows [4*sq, 5*sq)) of the 3x3
    # im2col weight matrix; output columns [e1 | e3] == torch.cat(..., dim=1).
    return conv2d_mat_relu(s, p["exp_w"], p["exp_b"], 3, 3, padding=1)


# ----------------------------------------------------------------------------
# Parameter construction (deterministic, synthetic)
# ----------------------------------------------------------------------------
def _conv_mat_init(key, kh, kw, cin, cout, scale=0.05):
    kw_, kb_ = jax.random.split(key)
    w = jax.random.normal(kw_, (kh, kw, cin, cout), jnp.float32) * scale
    b = jax.random.normal(kb_, (cout,), jnp.float32) * scale
    return w.reshape(kh * kw * cin, cout), b


def _fire_init(key, cin, sq, e1, e3, cin_pad=None):
    k1, k2, k3 = jax.random.split(key, 3)
    sq_w, sq_b = _conv_mat_init(k1, 1, 1, cin, sq)
    if cin_pad is not None and cin_pad > cin:
        # extra zero input rows matching the zero-padded channels of conv1
        sq_w = jnp.concatenate(
            [sq_w, jnp.zeros((cin_pad - cin, sq), jnp.float32)], axis=0)
    e1_w, e1_b = _conv_mat_init(k2, 1, 1, sq, e1)        # (sq, e1)
    e3_w, e3_b = _conv_mat_init(k3, 3, 3, sq, e3)        # (9*sq, e3)
    # Fused expand weight: (9*sq, e1+e3); 1x1 conv == centre tap of the im2col.
    exp_w = jnp.zeros((9 * sq, e1 + e3), jnp.float32)
    exp_w = exp_w.at[:, e1:].set(e3_w)
    exp_w = exp_w.at[4 * sq:5 * sq, :e1].set(e1_w)
    exp_b = jnp.concatenate([e1_b, e3_b])
    return {
        "sq_w": sq_w.astype(jnp.bfloat16), "sq_b": sq_b,
        "exp_w": exp_w.astype(jnp.bfloat16), "exp_b": exp_b,
    }


FIRE_CFG = [
    (96, 16, 64, 64),
    (128, 16, 64, 64),
    (128, 32, 128, 128),
    (256, 32, 128, 128),
    (256, 48, 192, 192),
    (384, 48, 192, 192),
    (384, 64, 256, 256),
    (512, 64, 256, 256),
]


def init_squeezenet_params(key, num_classes=10):
    keys = jax.random.split(key, 2 + len(FIRE_CFG))
    params = {}

    # conv1 7x7/2: output channels zero-padded 96 -> 128 (lane-dense stores);
    # fire1's squeeze weight gets matching zero input rows, so numerics match.
    w1, b1 = _conv_mat_init(keys[0], 7, 7, 3, 96)
    w1 = jnp.concatenate([w1, jnp.zeros((w1.shape[0], 32), jnp.float32)], axis=1)
    b1 = jnp.concatenate([b1, jnp.zeros((32,), jnp.float32)])
    params["conv1_w"] = w1.astype(jnp.bfloat16)
    params["conv1_b"] = b1

    params["fires"] = [
        _fire_init(keys[1 + i], *cfg, cin_pad=(128 if i == 0 else None))
        for i, cfg in enumerate(FIRE_CFG)
    ]

    # classifier conv1x1: columns zero-padded num_classes -> 128 (lane-dense);
    # the real logits are sliced back out in the forward pass.
    cw, cb = _conv_mat_init(keys[-1], 1, 1, 512, num_classes)
    ncp = _round_up(num_classes, 128)
    cw = jnp.concatenate(
        [cw, jnp.zeros((512, ncp - num_classes), jnp.float32)], axis=1)
    cb = jnp.concatenate([cb, jnp.zeros((ncp - num_classes,), jnp.float32)])
    params["cls_w"] = cw
    params["cls_b"] = cb
    return params


# ----------------------------------------------------------------------------
# Full forward pass
# ----------------------------------------------------------------------------
def squeezenet_forward(x_nchw, params, num_classes=10):
    x = jnp.transpose(x_nchw, (0, 2, 3, 1)).astype(jnp.bfloat16)  # NCHW -> NHWC

    # features
    x = conv2d_mat_relu(x, params["conv1_w"], params["conv1_b"], 7, 7, stride=2)
    x = maxpool_3x3_s2(x)
    x = fire_module(x, params["fires"][0])
    x = fire_module(x, params["fires"][1])
    x = fire_module(x, params["fires"][2])
    x = maxpool_3x3_s2(x)
    x = fire_module(x, params["fires"][3])
    x = fire_module(x, params["fires"][4])
    x = fire_module(x, params["fires"][5])
    x = fire_module(x, params["fires"][6])
    x = maxpool_3x3_s2(x)
    x = fire_module(x, params["fires"][7])

    # AdaptiveAvgPool2d((1,1)) + classifier: Dropout -> Conv1x1 -> ReLU -> Flatten
    # TODO(synk): nn.Dropout(p=0.5) treated as identity (eval-mode semantics).
    logits_padded = gap_classifier(x, params["cls_w"], params["cls_b"])
    return logits_padded[:, :num_classes]


# ----------------------------------------------------------------------------
if __name__ == "__main__":
    key = jax.random.PRNGKey(0)
    k_param, k_input = jax.random.split(key)

    num_classes = 10
    params = init_squeezenet_params(k_param, num_classes=num_classes)

    # Smallest spatial size that survives conv7/2 + three 3x3/2 maxpools: 35x35.
    x = jax.random.normal(k_input, (2, 3, 35, 35), jnp.float32)  # NCHW

    fwd = jax.jit(squeezenet_forward, static_argnames=("num_classes",))
    out = fwd(x, params, num_classes=num_classes)
    out = jax.block_until_ready(out)

    assert out.shape == (2, num_classes), out.shape
    assert out.dtype == jnp.float32
    print("KERNEL_OK")
</pallas_src>

<mosaic_0001>
module attributes {stable_mosaic.version = 11 : i64} {
  func.func @_matmul_bias_relu_kernel(%arg0: i32, %arg1: i32, %arg2: memref<256x147xbf16, #tpu.memory_space<vmem>>, %arg3: memref<147x128xbf16, #tpu.memory_space<vmem>>, %arg4: memref<1x128xf32, #tpu.memory_space<vmem>>, %arg5: memref<256x128xbf16, #tpu.memory_space<vmem>>) attributes {dimension_semantics = [#tpu.dimension_semantics<parallel>, #tpu.dimension_semantics<parallel>], iteration_bounds = array<i64: 2, 1>, scalar_prefetch = 0 : i64, scratch_operands = 0 : i64, tpu.core_type = #tpu.core_type<tc>, window_params = [{transform_indices = @transform_0, window_bounds = array<i64: 256, 147>}, {transform_indices = @transform_1, window_bounds = array<i64: 147, 128>}, {transform_indices = @transform_2, window_bounds = array<i64: 1, 128>}, {transform_indices = @transform_3, window_bounds = array<i64: 256, 128>}]} {
    %c0 = arith.constant 0 : index
    %c0_0 = arith.constant 0 : index
    %0 = vector.load %arg2[%c0, %c0_0] : memref<256x147xbf16, #tpu.memory_space<vmem>>, vector<256x147xbf16>
    %c0_1 = arith.constant 0 : index
    %c0_2 = arith.constant 0 : index
    %1 = vector.load %arg3[%c0_1, %c0_2] : memref<147x128xbf16, #tpu.memory_space<vmem>>, vector<147x128xbf16>
    %cst = arith.constant dense<0.000000e+00> : vector<256x128xf32>
    %2 = tpu.matmul %0, %1, %cst {dimension_numbers = #tpu.dot_dimension_numbers<[1], [0], [0], [1], [0, 0, 1, 1], [], []>} : vector<256x147xbf16>, vector<147x128xbf16>, vector<256x128xf32> -> vector<256x128xf32>
    %c0_3 = arith.constant 0 : index
    %c0_4 = arith.constant 0 : index
    %3 = vector.load %arg4[%c0_3, %c0_4] : memref<1x128xf32, #tpu.memory_space<vmem>>, vector<1x128xf32>
    %4 = vector.broadcast %3 : vector<1x128xf32> to vector<256x128xf32>
    %5 = arith.addf %2, %4 : vector<256x128xf32>
    %cst_5 = arith.constant 0.000000e+00 : f32
    %6 = vector.broadcast %cst_5 : f32 to vector<256x128xf32>
    %7 = arith.maximumf %5, %6 : vector<256x128xf32>
    %8 = arith.truncf %7 : vector<256x128xf32> to vector<256x128xbf16>
    %c0_6 = arith.constant 0 : index
    %c0_7 = arith.constant 0 : index
    %9 = vector.load %arg5[%c0_6, %c0_7] : memref<256x128xbf16, #tpu.memory_space<vmem>>, vector<256x128xbf16>
    tpu.vector_store %arg5[%c0_6, %c0_7], %8 {strides = array<i32>} : memref<256x128xbf16, #tpu.memory_space<vmem>>, vector<256x128xbf16>,
    return
  }
  func.func @transform_0(%arg0: i32, %arg1: i32) -> (i32, i32) {
    %c0_i32 = arith.constant 0 : i32
    %c0_i32_0 = arith.constant 0 : i32
    return %arg0, %c0_i32 : i32, i32
  }
  func.func @transform_1(%arg0: i32, %arg1: i32) -> (i32, i32) {
    %c0_i32 = arith.constant 0 : i32
    %c0_i32_0 = arith.constant 0 : i32
    return %c0_i32, %arg1 : i32, i32
  }
  func.func @transform_2(%arg0: i32, %arg1: i32) -> (i32, i32) {
    %c0_i32 = arith.constant 0 : i32
    %c0_i32_0 = arith.constant 0 : i32
    return %c0_i32, %arg1 : i32, i32
  }
  func.func @transform_3(%arg0: i32, %arg1: i32) -> (i32, i32) {
    %c0_i32 = arith.constant 0 : i32
    return %arg0, %arg1 : i32, i32
  }
}

module attributes {stable_mosaic.version = 11 : i64} {
  func.func @_matmul_bias_relu_kernel(%arg0: i32, %arg1: i32, %arg2: memref<104x128xbf16, #tpu.memory_space<vmem>>, %arg3: memref<128x16xbf16, #tpu.memory_space<vmem>>, %arg4: memref<1x16xf32, #tpu.memory_space<vmem>>, %arg5: memref<104x16xbf16, #tpu.memory_space<vmem>>) attributes {dimension_semantics = [#tpu.dimension_semantics<parallel>, #tpu.dimension_semantics<parallel>], iteration_bounds = array<i64: 1, 1>, scalar_prefetch = 0 : i64, scratch_operands = 0 : i64, tpu.core_type = #tpu.core_type<tc>, window_params = [{transform_indices = @transform_0, window_bounds = array<i64: 104, 128>}, {transform_indices = @transform_1, window_bounds = array<i64: 128, 16>}, {transform_indices = @transform_2, window_bounds = array<i64: 1, 16>}, {transform_indices = @transform_3, window_bounds = array<i64: 104, 16>}]} {
    %c0 = arith.constant 0 : index
    %c0_0 = arith.constant 0 : index
    %0 = vector.load %arg2[%c0, %c0_0] : memref<104x128xbf16, #tpu.memory_space<vmem>>, vector<104x128xbf16>
    %c0_1 = arith.constant 0 : index
    %c0_2 = arith.constant 0 : index
    %1 = vector.load %arg3[%c0_1, %c0_2] : memref<128x16xbf16, #tpu.memory_space<vmem>>, vector<128x16xbf16>
    %cst = arith.constant dense<0.000000e+00> : vector<104x16xf32>
    %2 = tpu.matmul %0, %1, %cst {dimension_numbers = #tpu.dot_dimension_numbers<[1], [0], [0], [1], [0, 0, 1, 1], [], []>} : vector<104x128xbf16>, vector<128x16xbf16>, vector<104x16xf32> -> vector<104x16xf32>
    %c0_3 = arith.constant 0 : index
    %c0_4 = arith.constant 0 : index
    %3 = vector.load %arg4[%c0_3, %c0_4] : memref<1x16xf32, #tpu.memory_space<vmem>>, vector<1x16xf32>
    %4 = vector.broadcast %3 : vector<1x16xf32> to vector<104x16xf32>
    %5 = arith.addf %2, %4 : vector<104x16xf32>
    %cst_5 = arith.constant 0.000000e+00 : f32
    %6 = vector.broadcast %cst_5 : f32 to vector<104x16xf32>
    %7 = arith.maximumf %5, %6 : vector<104x16xf32>
    %8 = arith.truncf %7 : vector<104x16xf32> to vector<104x16xbf16>
    %c0_6 = arith.constant 0 : index
    %c0_7 = arith.constant 0 : index
    %9 = vector.load %arg5[%c0_6, %c0_7] : memref<104x16xbf16, #tpu.memory_space<vmem>>, vector<104x16xbf16>
    tpu.vector_store %arg5[%c0_6, %c0_7], %8 {strides = array<i32>} : memref<104x16xbf16, #tpu.memory_space<vmem>>, vector<104x16xbf16>,
    return
  }
  func.func @transform_0(%arg0: i32, %arg1: i32) -> (i32, i32) {
    %c0_i32 = arith.constant 0 : i32
    %c0_i32_0 = arith.constant 0 : i32
    return %arg0, %c0_i32 : i32, i32
  }
  func.func @transform_1(%arg0: i32, %arg1: i32) -> (i32, i32) {
    %c0_i32 = arith.constant 0 : i32
    %c0_i32_0 = arith.constant 0 : i32
    return %c0_i32, %arg1 : i32, i32
  }
  func.func @transform_2(%arg0: i32, %arg1: i32) -> (i32, i32) {
    %c0_i32 = arith.constant 0 : i32
    %c0_i32_0 = arith.constant 0 : i32
    return %c0_i32, %arg1 : i32, i32
  }
  func.func @transform_3(%arg0: i32, %arg1: i32) -> (i32, i32) {
    %c0_i32 = arith.constant 0 : i32
    return %arg0, %arg1 : i32, i32
  }
}

module attributes {stable_mosaic.version = 11 : i64} {
  func.func @_matmul_bias_relu_kernel(%arg0: i32, %arg1: i32, %arg2: memref<104x144xbf16, #tpu.memory_space<vmem>>, %arg3: memref<144x128xbf16, #tpu.memory_space<vmem>>, %arg4: memref<1x128xf32, #tpu.memory_space<vmem>>, %arg5: memref<104x128xbf16, #tpu.memory_space<vmem>>) attributes {dimension_semantics = [#tpu.dimension_semantics<parallel>, #tpu.dimension_semantics<parallel>], iteration_bounds = array<i64: 1, 1>, scalar_prefetch = 0 : i64, scratch_operands = 0 : i64, tpu.core_type = #tpu.core_type<tc>, window_params = [{transform_indices = @transform_0, window_bounds = array<i64: 104, 144>}, {transform_indices = @transform_1, window_bounds = array<i64: 144, 128>}, {transform_indices = @transform_2, window_bounds = array<i64: 1, 128>}, {transform_indices = @transform_3, window_bounds = array<i64: 104, 128>}]} {
    %c0 = arith.constant 0 : index
    %c0_0 = arith.constant 0 : index
    %0 = vector.load %arg2[%c0, %c0_0] : memref<104x144xbf16, #tpu.memory_space<vmem>>, vector<104x144xbf16>
    %c0_1 = arith.constant 0 : index
    %c0_2 = arith.constant 0 : index
    %1 = vector.load %arg3[%c0_1, %c0_2] : memref<144x128xbf16, #tpu.memory_space<vmem>>, vector<144x128xbf16>
    %cst = arith.constant dense<0.000000e+00> : vector<104x128xf32>
    %2 = tpu.matmul %0, %1, %cst {dimension_numbers = #tpu.dot_dimension_numbers<[1], [0], [0], [1], [0, 0, 1, 1], [], []>} : vector<104x144xbf16>, vector<144x128xbf16>, vector<104x128xf32> -> vector<104x128xf32>
    %c0_3 = arith.constant 0 : index
    %c0_4 = arith.constant 0 : index
    %3 = vector.load %arg4[%c0_3, %c0_4] : memref<1x128xf32, #tpu.memory_space<vmem>>, vector<1x128xf32>
    %4 = vector.broadcast %3 : vector<1x128xf32> to vector<104x128xf32>
    %5 = arith.addf %2, %4 : vector<104x128xf32>
    %cst_5 = arith.constant 0.000000e+00 : f32
    %6 = vector.broadcast %cst_5 : f32 to vector<104x128xf32>
    %7 = arith.maximumf %5, %6 : vector<104x128xf32>
    %8 = arith.truncf %7 : vector<104x128xf32> to vector<104x128xbf16>
    %c0_6 = arith.constant 0 : index
    %c0_7 = arith.constant 0 : index
    %9 = vector.load %arg5[%c0_6, %c0_7] : memref<104x128xbf16, #tpu.memory_space<vmem>>, vector<104x128xbf16>
    tpu.vector_store %arg5[%c0_6, %c0_7], %8 {strides = array<i32>} : memref<104x128xbf16, #tpu.memory_space<vmem>>, vector<104x128xbf16>,
    return
  }
  func.func @transform_0(%arg0: i32, %arg1: i32) -> (i32, i32) {
    %c0_i32 = arith.constant 0 : i32
    %c0_i32_0 = arith.constant 0 : i32
    return %arg0, %c0_i32 : i32, i32
  }
  func.func @transform_1(%arg0: i32, %arg1: i32) -> (i32, i32) {
    %c0_i32 = arith.constant 0 : i32
    %c0_i32_0 = arith.constant 0 : i32
    return %c0_i32, %arg1 : i32, i32
  }
  func.func @transform_2(%arg0: i32, %arg1: i32) -> (i32, i32) {
    %c0_i32 = arith.constant 0 : i32
    %c0_i32_0 = arith.constant 0 : i32
    return %c0_i32, %arg1 : i32, i32
  }
  func.func @transform_3(%arg0: i32, %arg1: i32) -> (i32, i32) {
    %c0_i32 = arith.constant 0 : i32
    return %arg0, %arg1 : i32, i32
  }
}

module attributes {stable_mosaic.version = 11 : i64} {
  func.func @_matmul_bias_relu_kernel(%arg0: i32, %arg1: i32, %arg2: memref<104x128xbf16, #tpu.memory_space<vmem>>, %arg3: memref<128x32xbf16, #tpu.memory_space<vmem>>, %arg4: memref<1x32xf32, #tpu.memory_space<vmem>>, %arg5: memref<104x32xbf16, #tpu.memory_space<vmem>>) attributes {dimension_semantics = [#tpu.dimension_semantics<parallel>, #tpu.dimension_semantics<parallel>], iteration_bounds = array<i64: 1, 1>, scalar_prefetch = 0 : i64, scratch_operands = 0 : i64, tpu.core_type = #tpu.core_type<tc>, window_params = [{transform_indices = @transform_0, window_bounds = array<i64: 104, 128>}, {transform_indices = @transform_1, window_bounds = array<i64: 128, 32>}, {transform_indices = @transform_2, window_bounds = array<i64: 1, 32>}, {transform_indices = @transform_3, window_bounds = array<i64: 104, 32>}]} {
    %c0 = arith.constant 0 : index
    %c0_0 = arith.constant 0 : index
    %0 = vector.load %arg2[%c0, %c0_0] : memref<104x128xbf16, #tpu.memory_space<vmem>>, vector<104x128xbf16>
    %c0_1 = arith.constant 0 : index
    %c0_2 = arith.constant 0 : index
    %1 = vector.load %arg3[%c0_1, %c0_2] : memref<128x32xbf16, #tpu.memory_space<vmem>>, vector<128x32xbf16>
    %cst = arith.constant dense<0.000000e+00> : vector<104x32xf32>
    %2 = tpu.matmul %0, %1, %cst {dimension_numbers = #tpu.dot_dimension_numbers<[1], [0], [0], [1], [0, 0, 1, 1], [], []>} : vector<104x128xbf16>, vector<128x32xbf16>, vector<104x32xf32> -> vector<104x32xf32>
    %c0_3 = arith.constant 0 : index
    %c0_4 = arith.constant 0 : index
    %3 = vector.load %arg4[%c0_3, %c0_4] : memref<1x32xf32, #tpu.memory_space<vmem>>, vector<1x32xf32>
    %4 = vector.broadcast %3 : vector<1x32xf32> to vector<104x32xf32>
    %5 = arith.addf %2, %4 : vector<104x32xf32>
    %cst_5 = arith.constant 0.000000e+00 : f32
    %6 = vector.broadcast %cst_5 : f32 to vector<104x32xf32>
    %7 = arith.maximumf %5, %6 : vector<104x32xf32>
    %8 = arith.truncf %7 : vector<104x32xf32> to vector<104x32xbf16>
    %c0_6 = arith.constant 0 : index
    %c0_7 = arith.constant 0 : index
    %9 = vector.load %arg5[%c0_6, %c0_7] : memref<104x32xbf16, #tpu.memory_space<vmem>>, vector<104x32xbf16>
    tpu.vector_store %arg5[%c0_6, %c0_7], %8 {strides = array<i32>} : memref<104x32xbf16, #tpu.memory_space<vmem>>, vector<104x32xbf16>,
    return
  }
  func.func @transform_0(%arg0: i32, %arg1: i32) -> (i32, i32) {
    %c0_i32 = arith.constant 0 : i32
    %c0_i32_0 = arith.constant 0 : i32
    return %arg0, %c0_i32 : i32, i32
  }
  func.func @transform_1(%arg0: i32, %arg1: i32) -> (i32, i32) {
    %c0_i32 = arith.constant 0 : i32
    %c0_i32_0 = arith.constant 0 : i32
    return %c0_i32, %arg1 : i32, i32
  }
  func.func @transform_2(%arg0: i32, %arg1: i32) -> (i32, i32) {
    %c0_i32 = arith.constant 0 : i32
    %c0_i32_0 = arith.constant 0 : i32
    return %c0_i32, %arg1 : i32, i32
  }
  func.func @transform_3(%arg0: i32, %arg1: i32) -> (i32, i32) {
    %c0_i32 = arith.constant 0 : i32
    return %arg0, %arg1 : i32, i32
  }
}

module attributes {stable_mosaic.version = 11 : i64} {
  func.func @_matmul_bias_relu_kernel(%arg0: i32, %arg1: i32, %arg2: memref<104x288xbf16, #tpu.memory_space<vmem>>, %arg3: memref<288x128xbf16, #tpu.memory_space<vmem>>, %arg4: memref<1x128xf32, #tpu.memory_space<vmem>>, %arg5: memref<104x128xbf16, #tpu.memory_space<vmem>>) attributes {dimension_semantics = [#tpu.dimension_semantics<parallel>, #tpu.dimension_semantics<parallel>], iteration_bounds = array<i64: 1, 2>, scalar_prefetch = 0 : i64, scratch_operands = 0 : i64, tpu.core_type = #tpu.core_type<tc>, window_params = [{transform_indices = @transform_0, window_bounds = array<i64: 104, 288>}, {transform_indices = @transform_1, window_bounds = array<i64: 288, 128>}, {transform_indices = @transform_2, window_bounds = array<i64: 1, 128>}, {transform_indices = @transform_3, window_bounds = array<i64: 104, 128>}]} {
    %c0 = arith.constant 0 : index
    %c0_0 = arith.constant 0 : index
    %0 = vector.load %arg2[%c0, %c0_0] : memref<104x288xbf16, #tpu.memory_space<vmem>>, vector<104x288xbf16>
    %c0_1 = arith.constant 0 : index
    %c0_2 = arith.constant 0 : index
    %1 = vector.load %arg3[%c0_1, %c0_2] : memref<288x128xbf16, #tpu.memory_space<vmem>>, vector<288x128xbf16>
    %cst = arith.constant dense<0.000000e+00> : vector<104x128xf32>
    %2 = tpu.matmul %0, %1, %cst {dimension_numbers = #tpu.dot_dimension_numbers<[1], [0], [0], [1], [0, 0, 1, 1], [], []>} : vector<104x288xbf16>, vector<288x128xbf16>, vector<104x128xf32> -> vector<104x128xf32>
    %c0_3 = arith.constant 0 : index
    %c0_4 = arith.constant 0 : index
    %3 = vector.load %arg4[%c0_3, %c0_4] : memref<1x128xf32, #tpu.memory_space<vmem>>, vector<1x128xf32>
    %4 = vector.broadcast %3 : vector<1x128xf32> to vector<104x128xf32>
    %5 = arith.addf %2, %4 : vector<104x128xf32>
    %cst_5 = arith.constant 0.000000e+00 : f32
    %6 = vector.broadcast %cst_5 : f32 to vector<104x128xf32>
    %7 = arith.maximumf %5, %6 : vector<104x128xf32>
    %8 = arith.truncf %7 : vector<104x128xf32> to vector<104x128xbf16>
    %c0_6 = arith.constant 0 : index
    %c0_7 = arith.constant 0 : index
    %9 = vector.load %arg5[%c0_6, %c0_7] : memref<104x128xbf16, #tpu.memory_space<vmem>>, vector<104x128xbf16>
    tpu.vector_store %arg5[%c0_6, %c0_7], %8 {strides = array<i32>} : memref<104x128xbf16, #tpu.memory_space<vmem>>, vector<104x128xbf16>,
    return
  }
  func.func @transform_0(%arg0: i32, %arg1: i32) -> (i32, i32) {
    %c0_i32 = arith.constant 0 : i32
    %c0_i32_0 = arith.constant 0 : i32
    return %arg0, %c0_i32 : i32, i32
  }
  func.func @transform_1(%arg0: i32, %arg1: i32) -> (i32, i32) {
    %c0_i32 = arith.constant 0 : i32
    %c0_i32_0 = arith.constant 0 : i32
    return %c0_i32, %arg1 : i32, i32
  }
  func.func @transform_2(%arg0: i32, %arg1: i32) -> (i32, i32) {
    %c0_i32 = arith.constant 0 : i32
    %c0_i32_0 = arith.constant 0 : i32
    return %c0_i32, %arg1 : i32, i32
  }
  func.func @transform_3(%arg0: i32, %arg1: i32) -> (i32, i32) {
    %c0_i32 = arith.constant 0 : i32
    return %arg0, %arg1 : i32, i32
  }
}

module attributes {stable_mosaic.version = 11 : i64} {
  func.func @_matmul_bias_relu_kernel(%arg0: i32, %arg1: i32, %arg2: memref<24x256xbf16, #tpu.memory_space<vmem>>, %arg3: memref<256x32xbf16, #tpu.memory_space<vmem>>, %arg4: memref<1x32xf32, #tpu.memory_space<vmem>>, %arg5: memref<24x32xbf16, #tpu.memory_space<vmem>>) attributes {dimension_semantics = [#tpu.dimension_semantics<parallel>, #tpu.dimension_semantics<parallel>], iteration_bounds = array<i64: 1, 1>, scalar_prefetch = 0 : i64, scratch_operands = 0 : i64, tpu.core_type = #tpu.core_type<tc>, window_params = [{transform_indices = @transform_0, window_bounds = array<i64: 24, 256>}, {transform_indices = @transform_1, window_bounds = array<i64: 256, 32>}, {transform_indices = @transform_2, window_bounds = array<i64: 1, 32>}, {transform_indices = @transform_3, window_bounds = array<i64: 24, 32>}]} {
    %c0 = arith.constant 0 : index
    %c0_0 = arith.constant 0 : index
    %0 = vector.load %arg2[%c0, %c0_0] : memref<24x256xbf16, #tpu.memory_space<vmem>>, vector<24x256xbf16>
    %c0_1 = arith.constant 0 : index
    %c0_2 = arith.constant 0 : index
    %1 = vector.load %arg3[%c0_1, %c0_2] : memref<256x32xbf16, #tpu.memory_space<vmem>>, vector<256x32xbf16>
    %cst = arith.constant dense<0.000000e+00> : vector<24x32xf32>
    %2 = tpu.matmul %0, %1, %cst {dimension_numbers = #tpu.dot_dimension_numbers<[1], [0], [0], [1], [0, 0, 1, 1], [], []>} : vector<24x256xbf16>, vector<256x32xbf16>, vector<24x32xf32> -> vector<24x32xf32>
    %c0_3 = arith.constant 0 : index
    %c0_4 = arith.constant 0 : index
    %3 = vector.load %arg4[%c0_3, %c0_4] : memref<1x32xf32, #tpu.memory_space<vmem>>, vector<1x32xf32>
    %4 = vector.broadcast %3 : vector<1x32xf32> to vector<24x32xf32>
    %5 = arith.addf %2, %4 : vector<24x32xf32>
    %cst_5 = arith.constant 0.000000e+00 : f32
    %6 = vector.broadcast %cst_5 : f32 to vector<24x32xf32>
    %7 = arith.maximumf %5, %6 : vector<24x32xf32>
    %8 = arith.truncf %7 : vector<24x32xf32> to vector<24x32xbf16>
    %c0_6 = arith.constant 0 : index
    %c0_7 = arith.constant 0 : index
    %9 = vector.load %arg5[%c0_6, %c0_7] : memref<24x32xbf16, #tpu.memory_space<vmem>>, vector<24x32xbf16>
    tpu.vector_store %arg5[%c0_6, %c0_7], %8 {strides = array<i32>} : memref<24x32xbf16, #tpu.memory_space<vmem>>, vector<24x32xbf16>,
    return
  }
  func.func @transform_0(%arg0: i32, %arg1: i32) -> (i32, i32) {
    %c0_i32 = arith.constant 0 : i32
    %c0_i32_0 = arith.constant 0 : i32
    return %arg0, %c0_i32 : i32, i32
  }
  func.func @transform_1(%arg0: i32, %arg1: i32) -> (i32, i32) {
    %c0_i32 = arith.constant 0 : i32
    %c0_i32_0 = arith.constant 0 : i32
    return %c0_i32, %arg1 : i32, i32
  }
  func.func @transform_2(%arg0: i32, %arg1: i32) -> (i32, i32) {
    %c0_i32 = arith.constant 0 : i32
    %c0_i32_0 = arith.constant 0 : i32
    return %c0_i32, %arg1 : i32, i32
  }
  func.func @transform_3(%arg0: i32, %arg1: i32) -> (i32, i32) {
    %c0_i32 = arith.constant 0 : i32
    return %arg0, %arg1 : i32, i32
  }
}

module attributes {stable_mosaic.version = 11 : i64} {
  func.func @_matmul_bias_relu_kernel(%arg0: i32, %arg1: i32, %arg2: memref<24x288xbf16, #tpu.memory_space<vmem>>, %arg3: memref<288x128xbf16, #tpu.memory_space<vmem>>, %arg4: memref<1x128xf32, #tpu.memory_space<vmem>>, %arg5: memref<24x128xbf16, #tpu.memory_space<vmem>>) attributes {dimension_semantics = [#tpu.dimension_semantics<parallel>, #tpu.dimension_semantics<parallel>], iteration_bounds = array<i64: 1, 2>, scalar_prefetch = 0 : i64, scratch_operands = 0 : i64, tpu.core_type = #tpu.core_type<tc>, window_params = [{transform_indices = @transform_0, window_bounds = array<i64: 24, 288>}, {transform_indices = @transform_1, window_bounds = array<i64: 288, 128>}, {transform_indices = @transform_2, window_bounds = array<i64: 1, 128>}, {transform_indices = @transform_3, window_bounds = array<i64: 24, 128>}]} {
    %c0 = arith.constant 0 : index
    %c0_0 = arith.constant 0 : index
    %0 = vector.load %arg2[%c0, %c0_0] : memref<24x288xbf16, #tpu.memory_space<vmem>>, vector<24x288xbf16>
    %c0_1 = arith.constant 0 : index
    %c0_2 = arith.constant 0 : index
    %1 = vector.load %arg3[%c0_1, %c0_2] : memref<288x128xbf16, #tpu.memory_space<vmem>>, vector<288x128xbf16>
    %cst = arith.constant dense<0.000000e+00> : vector<24x128xf32>
    %2 = tpu.matmul %0, %1, %cst {dimension_numbers = #tpu.dot_dimension_numbers<[1], [0], [0], [1], [0, 0, 1, 1], [], []>} : vector<24x288xbf16>, vector<288x128xbf16>, vector<24x128xf32> -> vector<24x128xf32>
    %c0_3 = arith.constant 0 : index
    %c0_4 = arith.constant 0 : index
    %3 = vector.load %arg4[%c0_3, %c0_4] : memref<1x128xf32, #tpu.memory_space<vmem>>, vector<1x128xf32>
    %4 = vector.broadcast %3 : vector<1x128xf32> to vector<24x128xf32>
    %5 = arith.addf %2, %4 : vector<24x128xf32>
    %cst_5 = arith.constant 0.000000e+00 : f32
    %6 = vector.broadcast %cst_5 : f32 to vector<24x128xf32>
    %7 = arith.maximumf %5, %6 : vector<24x128xf32>
    %8 = arith.truncf %7 : vector<24x128xf32> to vector<24x128xbf16>
    %c0_6 = arith.constant 0 : index
    %c0_7 = arith.constant 0 : index
    %9 = vector.load %arg5[%c0_6, %c0_7] : memref<24x128xbf16, #tpu.memory_space<vmem>>, vector<24x128xbf16>
    tpu.vector_store %arg5[%c0_6, %c0_7], %8 {strides = array<i32>} : memref<24x128xbf16, #tpu.memory_space<vmem>>, vector<24x128xbf16>,
    return
  }
  func.func @transform_0(%arg0: i32, %arg1: i32) -> (i32, i32) {
    %c0_i32 = arith.constant 0 : i32
    %c0_i32_0 = arith.constant 0 : i32
    return %arg0, %c0_i32 : i32, i32
  }
  func.func @transform_1(%arg0: i32, %arg1: i32) -> (i32, i32) {
    %c0_i32 = arith.constant 0 : i32
    %c0_i32_0 = arith.constant 0 : i32
    return %c0_i32, %arg1 : i32, i32
  }
  func.func @transform_2(%arg0: i32, %arg1: i32) -> (i32, i32) {
    %c0_i32 = arith.constant 0 : i32
    %c0_i32_0 = arith.constant 0 : i32
    return %c0_i32, %arg1 : i32, i32
  }
  func.func @transform_3(%arg0: i32, %arg1: i32) -> (i32, i32) {
    %c0_i32 = arith.constant 0 : i32
    return %arg0, %arg1 : i32, i32
  }
}

module attributes {stable_mosaic.version = 11 : i64} {
  func.func @_matmul_bias_relu_kernel(%arg0: i32, %arg1: i32, %arg2: memref<24x256xbf16, #tpu.memory_space<vmem>>, %arg3: memref<256x48xbf16, #tpu.memory_space<vmem>>, %arg4: memref<1x48xf32, #tpu.memory_space<vmem>>, %arg5: memref<24x48xbf16, #tpu.memory_space<vmem>>) attributes {dimension_semantics = [#tpu.dimension_semantics<parallel>, #tpu.dimension_semantics<parallel>], iteration_bounds = array<i64: 1, 1>, scalar_prefetch = 0 : i64, scratch_operands = 0 : i64, tpu.core_type = #tpu.core_type<tc>, window_params = [{transform_indices = @transform_0, window_bounds = array<i64: 24, 256>}, {transform_indices = @transform_1, window_bounds = array<i64: 256, 48>}, {transform_indices = @transform_2, window_bounds = array<i64: 1, 48>}, {transform_indices = @transform_3, window_bounds = array<i64: 24, 48>}]} {
    %c0 = arith.constant 0 : index
    %c0_0 = arith.constant 0 : index
    %0 = vector.load %arg2[%c0, %c0_0] : memref<24x256xbf16, #tpu.memory_space<vmem>>, vector<24x256xbf16>
    %c0_1 = arith.constant 0 : index
    %c0_2 = arith.constant 0 : index
    %1 = vector.load %arg3[%c0_1, %c0_2] : memref<256x48xbf16, #tpu.memory_space<vmem>>, vector<256x48xbf16>
    %cst = arith.constant dense<0.000000e+00> : vector<24x48xf32>
    %2 = tpu.matmul %0, %1, %cst {dimension_numbers = #tpu.dot_dimension_numbers<[1], [0], [0], [1], [0, 0, 1, 1], [], []>} : vector<24x256xbf16>, vector<256x48xbf16>, vector<24x48xf32> -> vector<24x48xf32>
    %c0_3 = arith.constant 0 : index
    %c0_4 = arith.constant 0 : index
    %3 = vector.load %arg4[%c0_3, %c0_4] : memref<1x48xf32, #tpu.memory_space<vmem>>, vector<1x48xf32>
    %4 = vector.broadcast %3 : vector<1x48xf32> to vector<24x48xf32>
    %5 = arith.addf %2, %4 : vector<24x48xf32>
    %cst_5 = arith.constant 0.000000e+00 : f32
    %6 = vector.broadcast %cst_5 : f32 to vector<24x48xf32>
    %7 = arith.maximumf %5, %6 : vector<24x48xf32>
    %8 = arith.truncf %7 : vector<24x48xf32> to vector<24x48xbf16>
    %c0_6 = arith.constant 0 : index
    %c0_7 = arith.constant 0 : index
    %9 = vector.load %arg5[%c0_6, %c0_7] : memref<24x48xbf16, #tpu.memory_space<vmem>>, vector<24x48xbf16>
    tpu.vector_store %arg5[%c0_6, %c0_7], %8 {strides = array<i32>} : memref<24x48xbf16, #tpu.memory_space<vmem>>, vector<24x48xbf16>,
    return
  }
  func.func @transform_0(%arg0: i32, %arg1: i32) -> (i32, i32) {
    %c0_i32 = arith.constant 0 : i32
    %c0_i32_0 = arith.constant 0 : i32
    return %arg0, %c0_i32 : i32, i32
  }
  func.func @transform_1(%arg0: i32, %arg1: i32) -> (i32, i32) {
    %c0_i32 = arith.constant 0 : i32
    %c0_i32_0 = arith.constant 0 : i32
    return %c0_i32, %arg1 : i32, i32
  }
  func.func @transform_2(%arg0: i32, %arg1: i32) -> (i32, i32) {
    %c0_i32 = arith.constant 0 : i32
    %c0_i32_0 = arith.constant 0 : i32
    return %c0_i32, %arg1 : i32, i32
  }
  func.func @transform_3(%arg0: i32, %arg1: i32) -> (i32, i32) {
    %c0_i32 = arith.constant 0 : i32
    return %arg0, %arg1 : i32, i32
  }
}

module attributes {stable_mosaic.version = 11 : i64} {
  func.func @_matmul_bias_relu_kernel(%arg0: i32, %arg1: i32, %arg2: memref<24x432xbf16, #tpu.memory_space<vmem>>, %arg3: memref<432x128xbf16, #tpu.memory_space<vmem>>, %arg4: memref<1x128xf32, #tpu.memory_space<vmem>>, %arg5: memref<24x128xbf16, #tpu.memory_space<vmem>>) attributes {dimension_semantics = [#tpu.dimension_semantics<parallel>, #tpu.dimension_semantics<parallel>], iteration_bounds = array<i64: 1, 3>, scalar_prefetch = 0 : i64, scratch_operands = 0 : i64, tpu.core_type = #tpu.core_type<tc>, window_params = [{transform_indices = @transform_0, window_bounds = array<i64: 24, 432>}, {transform_indices = @transform_1, window_bounds = array<i64: 432, 128>}, {transform_indices = @transform_2, window_bounds = array<i64: 1, 128>}, {transform_indices = @transform_3, window_bounds = array<i64: 24, 128>}]} {
    %c0 = arith.constant 0 : index
    %c0_0 = arith.constant 0 : index
    %0 = vector.load %arg2[%c0, %c0_0] : memref<24x432xbf16, #tpu.memory_space<vmem>>, vector<24x432xbf16>
    %c0_1 = arith.constant 0 : index
    %c0_2 = arith.constant 0 : index
    %1 = vector.load %arg3[%c0_1, %c0_2] : memref<432x128xbf16, #tpu.memory_space<vmem>>, vector<432x128xbf16>
    %cst = arith.constant dense<0.000000e+00> : vector<24x128xf32>
    %2 = tpu.matmul %0, %1, %cst {dimension_numbers = #tpu.dot_dimension_numbers<[1], [0], [0], [1], [0, 0, 1, 1], [], []>} : vector<24x432xbf16>, vector<432x128xbf16>, vector<24x128xf32> -> vector<24x128xf32>
    %c0_3 = arith.constant 0 : index
    %c0_4 = arith.constant 0 : index
    %3 = vector.load %arg4[%c0_3, %c0_4] : memref<1x128xf32, #tpu.memory_space<vmem>>, vector<1x128xf32>
    %4 = vector.broadcast %3 : vector<1x128xf32> to vector<24x128xf32>
    %5 = arith.addf %2, %4 : vector<24x128xf32>
    %cst_5 = arith.constant 0.000000e+00 : f32
    %6 = vector.broadcast %cst_5 : f32 to vector<24x128xf32>
    %7 = arith.maximumf %5, %6 : vector<24x128xf32>
    %8 = arith.truncf %7 : vector<24x128xf32> to vector<24x128xbf16>
    %c0_6 = arith.constant 0 : index
    %c0_7 = arith.constant 0 : index
    %9 = vector.load %arg5[%c0_6, %c0_7] : memref<24x128xbf16, #tpu.memory_space<vmem>>, vector<24x128xbf16>
    tpu.vector_store %arg5[%c0_6, %c0_7], %8 {strides = array<i32>} : memref<24x128xbf16, #tpu.memory_space<vmem>>, vector<24x128xbf16>,
    return
  }
  func.func @transform_0(%arg0: i32, %arg1: i32) -> (i32, i32) {
    %c0_i32 = arith.constant 0 : i32
    %c0_i32_0 = arith.constant 0 : i32
    return %arg0, %c0_i32 : i32, i32
  }
  func.func @transform_1(%arg0: i32, %arg1: i32) -> (i32, i32) {
    %c0_i32 = arith.constant 0 : i32
    %c0_i32_0 = arith.constant 0 : i32
    return %c0_i32, %arg1 : i32, i32
  }
  func.func @transform_2(%arg0: i32, %arg1: i32) -> (i32, i32) {
    %c0_i32 = arith.constant 0 : i32
    %c0_i32_0 = arith.constant 0 : i32
    return %c0_i32, %arg1 : i32, i32
  }
  func.func @transform_3(%arg0: i32, %arg1: i32) -> (i32, i32) {
    %c0_i32 = arith.constant 0 : i32
    return %arg0, %arg1 : i32, i32
  }
}

module attributes {stable_mosaic.version = 11 : i64} {
  func.func @_matmul_bias_relu_kernel(%arg0: i32, %arg1: i32, %arg2: memref<24x384xbf16, #tpu.memory_space<vmem>>, %arg3: memref<384x48xbf16, #tpu.memory_space<vmem>>, %arg4: memref<1x48xf32, #tpu.memory_space<vmem>>, %arg5: memref<24x48xbf16, #tpu.memory_space<vmem>>) attributes {dimension_semantics = [#tpu.dimension_semantics<parallel>, #tpu.dimension_semantics<parallel>], iteration_bounds = array<i64: 1, 1>, scalar_prefetch = 0 : i64, scratch_operands = 0 : i64, tpu.core_type = #tpu.core_type<tc>, window_params = [{transform_indices = @transform_0, window_bounds = array<i64: 24, 384>}, {transform_indices = @transform_1, window_bounds = array<i64: 384, 48>}, {transform_indices = @transform_2, window_bounds = array<i64: 1, 48>}, {transform_indices = @transform_3, window_bounds = array<i64: 24, 48>}]} {
    %c0 = arith.constant 0 : index
    %c0_0 = arith.constant 0 : index
    %0 = vector.load %arg2[%c0, %c0_0] : memref<24x384xbf16, #tpu.memory_space<vmem>>, vector<24x384xbf16>
    %c0_1 = arith.constant 0 : index
    %c0_2 = arith.constant 0 : index
    %1 = vector.load %arg3[%c0_1, %c0_2] : memref<384x48xbf16, #tpu.memory_space<vmem>>, vector<384x48xbf16>
    %cst = arith.constant dense<0.000000e+00> : vector<24x48xf32>
    %2 = tpu.matmul %0, %1, %cst {dimension_numbers = #tpu.dot_dimension_numbers<[1], [0], [0], [1], [0, 0, 1, 1], [], []>} : vector<24x384xbf16>, vector<384x48xbf16>, vector<24x48xf32> -> vector<24x48xf32>
    %c0_3 = arith.constant 0 : index
    %c0_4 = arith.constant 0 : index
    %3 = vector.load %arg4[%c0_3, %c0_4] : memref<1x48xf32, #tpu.memory_space<vmem>>, vector<1x48xf32>
    %4 = vector.broadcast %3 : vector<1x48xf32> to vector<24x48xf32>
    %5 = arith.addf %2, %4 : vector<24x48xf32>
    %cst_5 = arith.constant 0.000000e+00 : f32
    %6 = vector.broadcast %cst_5 : f32 to vector<24x48xf32>
    %7 = arith.maximumf %5, %6 : vector<24x48xf32>
    %8 = arith.truncf %7 : vector<24x48xf32> to vector<24x48xbf16>
    %c0_6 = arith.constant 0 : index
    %c0_7 = arith.constant 0 : index
    %9 = vector.load %arg5[%c0_6, %c0_7] : memref<24x48xbf16, #tpu.memory_space<vmem>>, vector<24x48xbf16>
    tpu.vector_store %arg5[%c0_6, %c0_7], %8 {strides = array<i32>} : memref<24x48xbf16, #tpu.memory_space<vmem>>, vector<24x48xbf16>,
    return
  }
  func.func @transform_0(%arg0: i32, %arg1: i32) -> (i32, i32) {
    %c0_i32 = arith.constant 0 : i32
    %c0_i32_0 = arith.constant 0 : i32
    return %arg0, %c0_i32 : i32, i32
  }
  func.func @transform_1(%arg0: i32, %arg1: i32) -> (i32, i32) {
    %c0_i32 = arith.constant 0 : i32
    %c0_i32_0 = arith.constant 0 : i32
    return %c0_i32, %arg1 : i32, i32
  }
  func.func @transform_2(%arg0: i32, %arg1: i32) -> (i32, i32) {
    %c0_i32 = arith.constant 0 : i32
    %c0_i32_0 = arith.constant 0 : i32
    return %c0_i32, %arg1 : i32, i32
  }
  func.func @transform_3(%arg0: i32, %arg1: i32) -> (i32, i32) {
    %c0_i32 = arith.constant 0 : i32
    return %arg0, %arg1 : i32, i32
  }
}

module attributes {stable_mosaic.version = 11 : i64} {
  func.func @_matmul_bias_relu_kernel(%arg0: i32, %arg1: i32, %arg2: memref<24x384xbf16, #tpu.memory_space<vmem>>, %arg3: memref<384x64xbf16, #tpu.memory_space<vmem>>, %arg4: memref<1x64xf32, #tpu.memory_space<vmem>>, %arg5: memref<24x64xbf16, #tpu.memory_space<vmem>>) attributes {dimension_semantics = [#tpu.dimension_semantics<parallel>, #tpu.dimension_semantics<parallel>], iteration_bounds = array<i64: 1, 1>, scalar_prefetch = 0 : i64, scratch_operands = 0 : i64, tpu.core_type = #tpu.core_type<tc>, window_params = [{transform_indices = @transform_0, window_bounds = array<i64: 24, 384>}, {transform_indices = @transform_1, window_bounds = array<i64: 384, 64>}, {transform_indices = @transform_2, window_bounds = array<i64: 1, 64>}, {transform_indices = @transform_3, window_bounds = array<i64: 24, 64>}]} {
    %c0 = arith.constant 0 : index
    %c0_0 = arith.constant 0 : index
    %0 = vector.load %arg2[%c0, %c0_0] : memref<24x384xbf16, #tpu.memory_space<vmem>>, vector<24x384xbf16>
    %c0_1 = arith.constant 0 : index
    %c0_2 = arith.constant 0 : index
    %1 = vector.load %arg3[%c0_1, %c0_2] : memref<384x64xbf16, #tpu.memory_space<vmem>>, vector<384x64xbf16>
    %cst = arith.constant dense<0.000000e+00> : vector<24x64xf32>
    %2 = tpu.matmul %0, %1, %cst {dimension_numbers = #tpu.dot_dimension_numbers<[1], [0], [0], [1], [0, 0, 1, 1], [], []>} : vector<24x384xbf16>, vector<384x64xbf16>, vector<24x64xf32> -> vector<24x64xf32>
    %c0_3 = arith.constant 0 : index
    %c0_4 = arith.constant 0 : index
    %3 = vector.load %arg4[%c0_3, %c0_4] : memref<1x64xf32, #tpu.memory_space<vmem>>, vector<1x64xf32>
    %4 = vector.broadcast %3 : vector<1x64xf32> to vector<24x64xf32>
    %5 = arith.addf %2, %4 : vector<24x64xf32>
    %cst_5 = arith.constant 0.000000e+00 : f32
    %6 = vector.broadcast %cst_5 : f32 to vector<24x64xf32>
    %7 = arith.maximumf %5, %6 : vector<24x64xf32>
    %8 = arith.truncf %7 : vector<24x64xf32> to vector<24x64xbf16>
    %c0_6 = arith.constant 0 : index
    %c0_7 = arith.constant 0 : index
    %9 = vector.load %arg5[%c0_6, %c0_7] : memref<24x64xbf16, #tpu.memory_space<vmem>>, vector<24x64xbf16>
    tpu.vector_store %arg5[%c0_6, %c0_7], %8 {strides = array<i32>} : memref<24x64xbf16, #tpu.memory_space<vmem>>, vector<24x64xbf16>,
    return
  }
  func.func @transform_0(%arg0: i32, %arg1: i32) -> (i32, i32) {
    %c0_i32 = arith.constant 0 : i32
    %c0_i32_0 = arith.constant 0 : i32
    return %arg0, %c0_i32 : i32, i32
  }
  func.func @transform_1(%arg0: i32, %arg1: i32) -> (i32, i32) {
    %c0_i32 = arith.constant 0 : i32
    %c0_i32_0 = arith.constant 0 : i32
    return %c0_i32, %arg1 : i32, i32
  }
  func.func @transform_2(%arg0: i32, %arg1: i32) -> (i32, i32) {
    %c0_i32 = arith.constant 0 : i32
    %c0_i32_0 = arith.constant 0 : i32
    return %c0_i32, %arg1 : i32, i32
  }
  func.func @transform_3(%arg0: i32, %arg1: i32) -> (i32, i32) {
    %c0_i32 = arith.constant 0 : i32
    return %arg0, %arg1 : i32, i32
  }
}

module attributes {stable_mosaic.version = 11 : i64} {
  func.func @_matmul_bias_relu_kernel(%arg0: i32, %arg1: i32, %arg2: memref<24x576xbf16, #tpu.memory_space<vmem>>, %arg3: memref<576x128xbf16, #tpu.memory_space<vmem>>, %arg4: memref<1x128xf32, #tpu.memory_space<vmem>>, %arg5: memref<24x128xbf16, #tpu.memory_space<vmem>>) attributes {dimension_semantics = [#tpu.dimension_semantics<parallel>, #tpu.dimension_semantics<parallel>], iteration_bounds = array<i64: 1, 4>, scalar_prefetch = 0 : i64, scratch_operands = 0 : i64, tpu.core_type = #tpu.core_type<tc>, window_params = [{transform_indices = @transform_0, window_bounds = array<i64: 24, 576>}, {transform_indices = @transform_1, window_bounds = array<i64: 576, 128>}, {transform_indices = @transform_2, window_bounds = array<i64: 1, 128>}, {transform_indices = @transform_3, window_bounds = array<i64: 24, 128>}]} {
    %c0 = arith.constant 0 : index
    %c0_0 = arith.constant 0 : index
    %0 = vector.load %arg2[%c0, %c0_0] : memref<24x576xbf16, #tpu.memory_space<vmem>>, vector<24x576xbf16>
    %c0_1 = arith.constant 0 : index
    %c0_2 = arith.constant 0 : index
    %1 = vector.load %arg3[%c0_1, %c0_2] : memref<576x128xbf16, #tpu.memory_space<vmem>>, vector<576x128xbf16>
    %cst = arith.constant dense<0.000000e+00> : vector<24x128xf32>
    %2 = tpu.matmul %0, %1, %cst {dimension_numbers = #tpu.dot_dimension_numbers<[1], [0], [0], [1], [0, 0, 1, 1], [], []>} : vector<24x576xbf16>, vector<576x128xbf16>, vector<24x128xf32> -> vector<24x128xf32>
    %c0_3 = arith.constant 0 : index
    %c0_4 = arith.constant 0 : index
    %3 = vector.load %arg4[%c0_3, %c0_4] : memref<1x128xf32, #tpu.memory_space<vmem>>, vector<1x128xf32>
    %4 = vector.broadcast %3 : vector<1x128xf32> to vector<24x128xf32>
    %5 = arith.addf %2, %4 : vector<24x128xf32>
    %cst_5 = arith.constant 0.000000e+00 : f32
    %6 = vector.broadcast %cst_5 : f32 to vector<24x128xf32>
    %7 = arith.maximumf %5, %6 : vector<24x128xf32>
    %8 = arith.truncf %7 : vector<24x128xf32> to vector<24x128xbf16>
    %c0_6 = arith.constant 0 : index
    %c0_7 = arith.constant 0 : index
    %9 = vector.load %arg5[%c0_6, %c0_7] : memref<24x128xbf16, #tpu.memory_space<vmem>>, vector<24x128xbf16>
    tpu.vector_store %arg5[%c0_6, %c0_7], %8 {strides = array<i32>} : memref<24x128xbf16, #tpu.memory_space<vmem>>, vector<24x128xbf16>,
    return
  }
  func.func @transform_0(%arg0: i32, %arg1: i32) -> (i32, i32) {
    %c0_i32 = arith.constant 0 : i32
    %c0_i32_0 = arith.constant 0 : i32
    return %arg0, %c0_i32 : i32, i32
  }
  func.func @transform_1(%arg0: i32, %arg1: i32) -> (i32, i32) {
    %c0_i32 = arith.constant 0 : i32
    %c0_i32_0 = arith.constant 0 : i32
    return %c0_i32, %arg1 : i32, i32
  }
  func.func @transform_2(%arg0: i32, %arg1: i32) -> (i32, i32) {
    %c0_i32 = arith.constant 0 : i32
    %c0_i32_0 = arith.constant 0 : i32
    return %c0_i32, %arg1 : i32, i32
  }
  func.func @transform_3(%arg0: i32, %arg1: i32) -> (i32, i32) {
    %c0_i32 = arith.constant 0 : i32
    return %arg0, %arg1 : i32, i32
  }
}

module attributes {stable_mosaic.version = 11 : i64} {
  func.func @_matmul_bias_relu_kernel(%arg0: i32, %arg1: i32, %arg2: memref<8x512xbf16, #tpu.memory_space<vmem>>, %arg3: memref<512x64xbf16, #tpu.memory_space<vmem>>, %arg4: memref<1x64xf32, #tpu.memory_space<vmem>>, %arg5: memref<8x64xbf16, #tpu.memory_space<vmem>>) attributes {dimension_semantics = [#tpu.dimension_semantics<parallel>, #tpu.dimension_semantics<parallel>], iteration_bounds = array<i64: 1, 1>, scalar_prefetch = 0 : i64, scratch_operands = 0 : i64, tpu.core_type = #tpu.core_type<tc>, window_params = [{transform_indices = @transform_0, window_bounds = array<i64: 8, 512>}, {transform_indices = @transform_1, window_bounds = array<i64: 512, 64>}, {transform_indices = @transform_2, window_bounds = array<i64: 1, 64>}, {transform_indices = @transform_3, window_bounds = array<i64: 8, 64>}]} {
    %c0 = arith.constant 0 : index
    %c0_0 = arith.constant 0 : index
    %0 = vector.load %arg2[%c0, %c0_0] : memref<8x512xbf16, #tpu.memory_space<vmem>>, vector<8x512xbf16>
    %c0_1 = arith.constant 0 : index
    %c0_2 = arith.constant 0 : index
    %1 = vector.load %arg3[%c0_1, %c0_2] : memref<512x64xbf16, #tpu.memory_space<vmem>>, vector<512x64xbf16>
    %cst = arith.constant dense<0.000000e+00> : vector<8x64xf32>
    %2 = tpu.matmul %0, %1, %cst {dimension_numbers = #tpu.dot_dimension_numbers<[1], [0], [0], [1], [0, 0, 1, 1], [], []>} : vector<8x512xbf16>, vector<512x64xbf16>, vector<8x64xf32> -> vector<8x64xf32>
    %c0_3 = arith.constant 0 : index
    %c0_4 = arith.constant 0 : index
    %3 = vector.load %arg4[%c0_3, %c0_4] : memref<1x64xf32, #tpu.memory_space<vmem>>, vector<1x64xf32>
    %4 = vector.broadcast %3 : vector<1x64xf32> to vector<8x64xf32>
    %5 = arith.addf %2, %4 : vector<8x64xf32>
    %cst_5 = arith.constant 0.000000e+00 : f32
    %6 = vector.broadcast %cst_5 : f32 to vector<8x64xf32>
    %7 = arith.maximumf %5, %6 : vector<8x64xf32>
    %8 = arith.truncf %7 : vector<8x64xf32> to vector<8x64xbf16>
    %c0_6 = arith.constant 0 : index
    %c0_7 = arith.constant 0 : index
    %9 = vector.load %arg5[%c0_6, %c0_7] : memref<8x64xbf16, #tpu.memory_space<vmem>>, vector<8x64xbf16>
    tpu.vector_store %arg5[%c0_6, %c0_7], %8 {strides = array<i32>} : memref<8x64xbf16, #tpu.memory_space<vmem>>, vector<8x64xbf16>,
    return
  }
  func.func @transform_0(%arg0: i32, %arg1: i32) -> (i32, i32) {
    %c0_i32 = arith.constant 0 : i32
    %c0_i32_0 = arith.constant 0 : i32
    return %arg0, %c0_i32 : i32, i32
  }
  func.func @transform_1(%arg0: i32, %arg1: i32) -> (i32, i32) {
    %c0_i32 = arith.constant 0 : i32
    %c0_i32_0 = arith.constant 0 : i32
    return %c0_i32, %arg1 : i32, i32
  }
  func.func @transform_2(%arg0: i32, %arg1: i32) -> (i32, i32) {
    %c0_i32 = arith.constant 0 : i32
    %c0_i32_0 = arith.constant 0 : i32
    return %c0_i32, %arg1 : i32, i32
  }
  func.func @transform_3(%arg0: i32, %arg1: i32) -> (i32, i32) {
    %c0_i32 = arith.constant 0 : i32
    return %arg0, %arg1 : i32, i32
  }
}

module attributes {stable_mosaic.version = 11 : i64} {
  func.func @_matmul_bias_relu_kernel(%arg0: i32, %arg1: i32, %arg2: memref<8x576xbf16, #tpu.memory_space<vmem>>, %arg3: memref<576x128xbf16, #tpu.memory_space<vmem>>, %arg4: memref<1x128xf32, #tpu.memory_space<vmem>>, %arg5: memref<8x128xbf16, #tpu.memory_space<vmem>>) attributes {dimension_semantics = [#tpu.dimension_semantics<parallel>, #tpu.dimension_semantics<parallel>], iteration_bounds = array<i64: 1, 4>, scalar_prefetch = 0 : i64, scratch_operands = 0 : i64, tpu.core_type = #tpu.core_type<tc>, window_params = [{transform_indices = @transform_0, window_bounds = array<i64: 8, 576>}, {transform_indices = @transform_1, window_bounds = array<i64: 576, 128>}, {transform_indices = @transform_2, window_bounds = array<i64: 1, 128>}, {transform_indices = @transform_3, window_bounds = array<i64: 8, 128>}]} {
    %c0 = arith.constant 0 : index
    %c0_0 = arith.constant 0 : index
    %0 = vector.load %arg2[%c0, %c0_0] : memref<8x576xbf16, #tpu.memory_space<vmem>>, vector<8x576xbf16>
    %c0_1 = arith.constant 0 : index
    %c0_2 = arith.constant 0 : index
    %1 = vector.load %arg3[%c0_1, %c0_2] : memref<576x128xbf16, #tpu.memory_space<vmem>>, vector<576x128xbf16>
    %cst = arith.constant dense<0.000000e+00> : vector<8x128xf32>
    %2 = tpu.matmul %0, %1, %cst {dimension_numbers = #tpu.dot_dimension_numbers<[1], [0], [0], [1], [0, 0, 1, 1], [], []>} : vector<8x576xbf16>, vector<576x128xbf16>, vector<8x128xf32> -> vector<8x128xf32>
    %c0_3 = arith.constant 0 : index
    %c0_4 = arith.constant 0 : index
    %3 = vector.load %arg4[%c0_3, %c0_4] : memref<1x128xf32, #tpu.memory_space<vmem>>, vector<1x128xf32>
    %4 = vector.broadcast %3 : vector<1x128xf32> to vector<8x128xf32>
    %5 = arith.addf %2, %4 : vector<8x128xf32>
    %cst_5 = arith.constant 0.000000e+00 : f32
    %6 = vector.broadcast %cst_5 : f32 to vector<8x128xf32>
    %7 = arith.maximumf %5, %6 : vector<8x128xf32>
    %8 = arith.truncf %7 : vector<8x128xf32> to vector<8x128xbf16>
    %c0_6 = arith.constant 0 : index
    %c0_7 = arith.constant 0 : index
    %9 = vector.load %arg5[%c0_6, %c0_7] : memref<8x128xbf16, #tpu.memory_space<vmem>>, vector<8x128xbf16>
    tpu.vector_store %arg5[%c0_6, %c0_7], %8 {strides = array<i32>} : memref<8x128xbf16, #tpu.memory_space<vmem>>, vector<8x128xbf16>,
    return
  }
  func.func @transform_0(%arg0: i32, %arg1: i32) -> (i32, i32) {
    %c0_i32 = arith.constant 0 : i32
    %c0_i32_0 = arith.constant 0 : i32
    return %arg0, %c0_i32 : i32, i32
  }
  func.func @transform_1(%arg0: i32, %arg1: i32) -> (i32, i32) {
    %c0_i32 = arith.constant 0 : i32
    %c0_i32_0 = arith.constant 0 : i32
    return %c0_i32, %arg1 : i32, i32
  }
  func.func @transform_2(%arg0: i32, %arg1: i32) -> (i32, i32) {
    %c0_i32 = arith.constant 0 : i32
    %c0_i32_0 = arith.constant 0 : i32
    return %c0_i32, %arg1 : i32, i32
  }
  func.func @transform_3(%arg0: i32, %arg1: i32) -> (i32, i32) {
    %c0_i32 = arith.constant 0 : i32
    return %arg0, %arg1 : i32, i32
  }
}

module attributes {stable_mosaic.version = 11 : i64} {
  func.func @_gap_classifier_kernel(%arg0: i32, %arg1: memref<2x1x512xbf16, #tpu.memory_space<vmem>>, %arg2: memref<512x128xf32, #tpu.memory_space<vmem>>, %arg3: memref<1x128xf32, #tpu.memory_space<vmem>>, %arg4: memref<2x128xf32, #tpu.memory_space<vmem>>) attributes {dimension_semantics = [#tpu.dimension_semantics<arbitrary>], iteration_bounds = array<i64: 1>, scalar_prefetch = 0 : i64, scratch_operands = 0 : i64, tpu.core_type = #tpu.core_type<tc>, window_params = [{pipeline_mode = #tpu.pipeline_mode<synchronous>, transform_indices = @transform_0, window_bounds = array<i64: 2, 1, 512>}, {pipeline_mode = #tpu.pipeline_mode<synchronous>, transform_indices = @transform_1, window_bounds = array<i64: 512, 128>}, {pipeline_mode = #tpu.pipeline_mode<synchronous>, transform_indices = @transform_2, window_bounds = array<i64: 1, 128>}, {pipeline_mode = #tpu.pipeline_mode<synchronous>, transform_indices = @transform_3, window_bounds = array<i64: 2, 128>}]} {
    %c0 = arith.constant 0 : index
    %c0_0 = arith.constant 0 : index
    %c0_1 = arith.constant 0 : index
    %0 = vector.load %arg1[%c0, %c0_0, %c0_1] : memref<2x1x512xbf16, #tpu.memory_space<vmem>>, vector<2x1x512xbf16>
    %1 = arith.extf %0 : vector<2x1x512xbf16> to vector<2x1x512xf32>
    %cst = arith.constant dense<0.000000e+00> : vector<2x512xf32>
    %2 = vector.multi_reduction <add>, %1, %cst [1] : vector<2x1x512xf32> to vector<2x512xf32>
    %cst_2 = arith.constant 1.000000e+00 : f32
    %3 = vector.broadcast %cst_2 : f32 to vector<2x512xf32>
    %4 = arith.divf %2, %3 : vector<2x512xf32>
    %c0_3 = arith.constant 0 : index
    %c0_4 = arith.constant 0 : index
    %5 = vector.load %arg2[%c0_3, %c0_4] : memref<512x128xf32, #tpu.memory_space<vmem>>, vector<512x128xf32>
    %cst_5 = arith.constant dense<0.000000e+00> : vector<2x128xf32>
    %6 = tpu.matmul %4, %5, %cst_5 {dimension_numbers = #tpu.dot_dimension_numbers<[1], [0], [0], [1], [0, 0, 1, 1], [], []>} : vector<2x512xf32>, vector<512x128xf32>, vector<2x128xf32> -> vector<2x128xf32>
    %c0_6 = arith.constant 0 : index
    %c0_7 = arith.constant 0 : index
    %7 = vector.load %arg3[%c0_6, %c0_7] : memref<1x128xf32, #tpu.memory_space<vmem>>, vector<1x128xf32>
    %8 = vector.broadcast %7 : vector<1x128xf32> to vector<2x128xf32>
    %9 = arith.addf %6, %8 : vector<2x128xf32>
    %cst_8 = arith.constant 0.000000e+00 : f32
    %10 = vector.broadcast %cst_8 : f32 to vector<2x128xf32>
    %11 = arith.maximumf %9, %10 : vector<2x128xf32>
    %c0_9 = arith.constant 0 : index
    %c0_10 = arith.constant 0 : index
    %12 = vector.load %arg4[%c0_9, %c0_10] : memref<2x128xf32, #tpu.memory_space<vmem>>, vector<2x128xf32>
    tpu.vector_store %arg4[%c0_9, %c0_10], %11 {strides = array<i32>} : memref<2x128xf32, #tpu.memory_space<vmem>>, vector<2x128xf32>,
    return
  }
  func.func @transform_0(%arg0: i32) -> (i32, i32, i32) {
    %c0_i32 = arith.constant 0 : i32
    %c0_i32_0 = arith.constant 0 : i32
    %c0_i32_1 = arith.constant 0 : i32
    %c0_i32_2 = arith.constant 0 : i32
    return %c0_i32, %c0_i32_0, %c0_i32_1 : i32, i32, i32
  }
  func.func @transform_1(%arg0: i32) -> (i32, i32) {
    %c0_i32 = arith.constant 0 : i32
    %c0_i32_0 = arith.constant 0 : i32
    %c0_i32_1 = arith.constant 0 : i32
    return %c0_i32, %c0_i32_0 : i32, i32
  }
  func.func @transform_2(%arg0: i32) -> (i32, i32) {
    %c0_i32 = arith.constant 0 : i32
    %c0_i32_0 = arith.constant 0 : i32
    %c0_i32_1 = arith.constant 0 : i32
    return %c0_i32, %c0_i32_0 : i32, i32
  }
  func.func @transform_3(%arg0: i32) -> (i32, i32) {
    %c0_i32 = arith.constant 0 : i32
    %c0_i32_0 = arith.constant 0 : i32
    %c0_i32_1 = arith.constant 0 : i32
    return %c0_i32, %c0_i32_0 : i32, i32
  }
}

</mosaic_0001>

<bundles_post_ra>
// kernel: squeezenet_forward.19
= control target key start
LH: loop header
LB: loop body
LE: loop exit
PB: predicated region body
PF: predicated region fallthrough
CT: control target
= control target key end

     0   :  { %s1850_s12 = smov 0   ;;  %s1852_s13 = smov 0   ;;  %s2177_s0 = inlined_call_operand.vmem [shape: bf16[450,147], index: 0, kind: input, shape index: {}]   ;;  %s2178_s1 = inlined_call_operand.vmem [shape: bf16[147,128], index: 1, kind: input, shape index: {}]   ;;  %s2179_s2 = inlined_call_operand.vmem [shape: f32[1,128], index: 2, kind: input, shape index: {}]   ;;  %s2180_s3 = inlined_call_operand.vmem [shape: bf16[450,128], index: 3, kind: output, shape index: {}]  }
   0x1   :  { %s1854_s14 = smov 0   ;;  %s1856_s15 = smov 0  }
   0x2   :  { %s1858_s16 = smov 0  }
   0x3 LB: > { %s1290_s17 = sadd.s32 4294967295, %s1794_s16   ;;  %s25_s18 = sadd.s32 1, %s1790_s15  ;;  %s1794_s16 = sphi %s1858_s16, %s13_s16   ;;  %s1790_s15 = sphi %s1856_s15, %s2188_s15   ;;  %s1786_s14 = sphi %s1854_s14, %s2187_s14   ;;  %s1782_s13 = sphi %s1852_s13, %s2186_s13   ;;  %s1778_s12 = sphi %s1850_s12, %s2185_s12  }
   0x4   : > { %p27_p0 = scmp.ge.s32.totalorder %s25_s18, 2  ;;  %s112_s19 = sadd.s32 1, %s1782_s13 }
   0x5   : > { %p122_p1 = scmp.ne.s32.totalorder %s1782_s13, %s1778_s12  ;;  %p123_p2 = scmp.eq.s32.totalorder %s1290_s17, 1 }
   0x6   : > { %s2190_s18 = smov (%p27_p0, %s25_s18), 0  ;;  %p1296_p4 = scmp.ge.s32.totalorder %s1794_s16, 1 }
   0x7   : > { %p1882_p3 = por %p123_p2, %p122_p1  ;;  %s107_s21 = ssub.s32 %s1790_s15, %s2190_s18 }
   0x8   : > { %p180_p5 = scmp.lt.s32.totalorder %s1794_s16, 3  ;;  %p110_p6 = scmp.eq.s32.totalorder %s107_s21, 0 }
   0xa   : > { %p181_p7 = pnand %p1296_p4, %p180_p5 }
   0xb   : > { %s1891_s22 = scalar_select %p110_p6, %s1782_s13, %s112_s19  }
   0xc   : > { %184 = sbr.rel (%p181_p7) target bundleno = 400 (0x190), region = 32  ;;  %v1666_v0 = vld [vmem:[%s2178_s1] sm:$0xff] (!%p181_p7)   ;;  %v1828_v1 = vmov (!%p181_p7), 0   ;;  %v1667_v2 = vld [vmem:[%s2178_s1 + $0x8] sm:$0xff] (!%p181_p7)   ;;  %v1668_v3 = vld [vmem:[%s2178_s1 + $0x10] sm:$0xff] (!%p181_p7)   ;;  %s1903_s29 = sshll.u32 (!%p181_p7), %s1786_s14, 5 }
   0xd   : > { %561 = vmatprep.subr.bf16.mxu0 (!%p181_p7), %v1828_v1  ;;  %1540 = vmatprep.subr.bf16.mxu1 (!%p181_p7), %v1828_v1  ;;  %p222_p8 = scmp.lt.s32.totalorder (!%p181_p7), %s1903_s29, 56  ;;  %v1669_v4 = vld [vmem:[%s2178_s1 + $0x18] sm:$0xff] (!%p181_p7)   ;;  %v1670_v5 = vld [vmem:[%s2178_s1 + $0x20] sm:$0xff] (!%p181_p7)   ;;  %vm505_vm0 = vcmask (!%p181_p7), 154624   ;;  %v1671_v8 = vld [vmem:[%s2178_s1 + $0x28] sm:$0xff] (!%p181_p7)   ;;  %vm554_vm1 = vcmask (!%p181_p7), 1040384  }
   0xe   : > { %562 = vmatpush1.bf16.msra.mxu0 (!%p181_p7), %v1666_v0  ;;  %1550 = vmatpush1.bf16.msra.mxu1 (!%p181_p7), %v1666_v0  ;;  %v1672_v9 = vld [vmem:[%s2178_s1 + $0x30] sm:$0xff] (!%p181_p7)   ;;  %v1673_v10 = vld [vmem:[%s2178_s1 + $0x38] sm:$0xff] (!%p181_p7)   ;;  %vm555_vm2 = vcmask (!%p181_p7), 1041408   ;;  %v1829_v11 = vmov (!%p181_p7), 65535   ;;  %v1674_v13 = vld [vmem:[%s2178_s1 + $0x40] sm:$0xff] (!%p181_p7)  }
   0xf   : > { %563 = vmatprep.subr.bf16.mxu0 (!%p181_p7), %v1828_v1  ;;  %1541 = vmatprep.subr.bf16.mxu1 (!%p181_p7), %v1828_v1  ;;  %v556_v12 = vsel (!%p181_p7), %vm554_vm1, 4294967295, %v1829_v11  ;;  %v1675_v14 = vld [vmem:[%s2178_s1 + $0x48] ss:$0 sps:$4 sm:$0x33] (!%p181_p7)   ;;  %v1984_v47 = vld [vmem:[%s2179_s2] ss:$0 sm:$0xff] (!%p181_p7) }
  0x10   : > { %v557_v15 = vsel (!%p181_p7), %vm555_vm2, %v556_v12, 0 }
  0x11   : > { %v559_v16 = vand.u32 (!%p181_p7), %v1675_v14, %v557_v15 }
  0x12   : > { %564 = vmatpush1.bf16.msra.mxu0 (!%p181_p7), %v1667_v2  ;;  %1551 = vmatpush1.bf16.msra.mxu1 (!%p181_p7), %v1667_v2 }
  0x13   : > { %565 = vmatprep.subr.bf16.mxu0 %v1828_v1  ;;  %1542 = vmatprep.subr.bf16.mxu1 %v1828_v1  ;;  %s223_s30 = scalar_select %p222_p8, %s1903_s29, 56 }
  0x14   : > { %s922_s8 = ssub.s32 (%p1882_p3), 57, %s1903_s29 }
  0x15   : > { %s1409_s6 = sshll.u32 %s223_s30, 3  ;;  %p923_p9 = scmp.lt.s32.totalorder (%p1882_p3), %s922_s8, 32 }
  0x16   : > { %566 = vmatpush1.bf16.msra.mxu0 %v1668_v3  ;;  %1552 = vmatpush1.bf16.msra.mxu1 %v1668_v3  ;;  %s1913_s9 = scalar_lea.vmem %s2177_s0, %s1409_s6  ;;  %s213_s6 = sand.u32 1, %s1778_s12  }
  0x17   : > { %567 = vmatprep.subr.bf16.mxu0 %v1828_v1  ;;  %1543 = vmatprep.subr.bf16.mxu1 %v1828_v1  ;;  %v1678_v6 = vld [vmem:[%s1913_s9 + $0x4] ss:$8 sps:$4 sm:$0xff]   ;;  %v1676_v17 = vld [vmem:[%s1913_s9] ss:$8 sps:$4 sm:$0xff]   ;;  %v1682_v19 = vld [vmem:[%s1913_s9 + $0x14] ss:$8 sps:$4 sm:$0xff]  }
  0x18   : > { %v1681_v7 = vld [vmem:[%s1913_s9 + $0x84] ss:$8 sps:$4 sm:$0xff]   ;;  %1344 = vmatprep.mubr.msk.bf16.mxu0 %vm505_vm0, %v1678_v6  ;;  %v1679_v18 = vld [vmem:[%s1913_s9 + $0x80] ss:$8 sps:$4 sm:$0xff]   ;;  %v1684_v20 = vld [vmem:[%s1913_s9 + $0x94] ss:$8 sps:$4 sm:$0xff]  }
  0x19   : > { %1352 = vmatprep.mubr.msk.bf16.mxu1 %vm505_vm0, %v1681_v7  ;;  %v1686_v21 = vld [vmem:[%s1913_s9 + $0x10] ss:$8 sps:$4 sm:$0xff]   ;;  %v1688_v23 = vld [vmem:[%s1913_s9 + $0x24] ss:$8 sps:$4 sm:$0xff]   ;;  %v1692_v25 = vld [vmem:[%s1913_s9 + $0x20] ss:$8 sps:$4 sm:$0xff]  }
  0x1a   : > { %568 = vmatpush1.bf16.msra.mxu0 %v1669_v4  ;;  %1553 = vmatpush1.bf16.msra.mxu1 %v1669_v4  ;;  %v1687_v22 = vld [vmem:[%s1913_s9 + $0x90] ss:$8 sps:$4 sm:$0xff]   ;;  %v1690_v24 = vld [vmem:[%s1913_s9 + $0xa4] ss:$8 sps:$4 sm:$0xff]   ;;  %v1693_v26 = vld [vmem:[%s1913_s9 + $0xa0] ss:$8 sps:$4 sm:$0xff]  }
  0x1b   : > { %569 = vmatprep.subr.bf16.mxu0 %v1828_v1  ;;  %1544 = vmatprep.subr.bf16.mxu1 %v1828_v1  ;;  %v1694_v27 = vld [vmem:[%s1913_s9 + $0x34] ss:$8 sps:$4 sm:$0xff]   ;;  %v1698_v29 = vld [vmem:[%s1913_s9 + $0x30] ss:$8 sps:$4 sm:$0xff]   ;;  %v1700_v31 = vld [vmem:[%s1913_s9 + $0x44] ss:$8 sps:$4 sm:$0xff]  }
  0x1c   : > { %v1696_v28 = vld [vmem:[%s1913_s9 + $0xb4] ss:$8 sps:$4 sm:$0xff]   ;;  %v1699_v30 = vld [vmem:[%s1913_s9 + $0xb0] ss:$8 sps:$4 sm:$0xff]   ;;  %v1702_v32 = vld [vmem:[%s1913_s9 + $0xc4] ss:$8 sps:$4 sm:$0xff]  }
  0x1d   : > { %v1704_v33 = vld [vmem:[%s1913_s9 + $0x40] ss:$8 sps:$4 sm:$0xff]   ;;  %v1706_v35 = vld [vmem:[%s1913_s9 + $0x54] ss:$8 sps:$4 sm:$0xff]   ;;  %v1710_v37 = vld [vmem:[%s1913_s9 + $0x50] ss:$8 sps:$4 sm:$0xff]  }
  0x1e   : > { %570 = vmatpush1.bf16.msra.mxu0 %v1670_v5  ;;  %1554 = vmatpush1.bf16.msra.mxu1 %v1670_v5  ;;  %v1705_v34 = vld [vmem:[%s1913_s9 + $0xc0] ss:$8 sps:$4 sm:$0xff]   ;;  %v1708_v36 = vld [vmem:[%s1913_s9 + $0xd4] ss:$8 sps:$4 sm:$0xff]   ;;  %v1711_v38 = vld [vmem:[%s1913_s9 + $0xd0] ss:$8 sps:$4 sm:$0xff]  }
  0x1f   : > { %571 = vmatprep.subr.bf16.mxu0 %v1828_v1  ;;  %1545 = vmatprep.subr.bf16.mxu1 %v1828_v1  ;;  %v1712_v39 = vld [vmem:[%s1913_s9 + $0x64] ss:$8 sps:$4 sm:$0xff]   ;;  %v1716_v41 = vld [vmem:[%s1913_s9 + $0x60] ss:$8 sps:$4 sm:$0xff]   ;;  %v1718_v43 = vld [vmem:[%s1913_s9 + $0x74] ss:$8 sps:$4 sm:$0xff]  }
  0x20   : > { %v1714_v40 = vld [vmem:[%s1913_s9 + $0xe4] ss:$8 sps:$4 sm:$0xff]   ;;  %v1717_v42 = vld [vmem:[%s1913_s9 + $0xe0] ss:$8 sps:$4 sm:$0xff]   ;;  %v1720_v44 = vld [vmem:[%s1913_s9 + $0xf4] ss:$8 sps:$4 sm:$0xff]  }
  0x21   : > { %v1722_v45 = vld [vmem:[%s1913_s9 + $0x70] ss:$8 sps:$4 sm:$0xff]   ;;  %s1297_s7 = sshll.u32 %s213_s6, 7 }
  0x22   : > { %572 = vmatpush1.bf16.msra.mxu0 %v1671_v8  ;;  %1555 = vmatpush1.bf16.msra.mxu1 %v1671_v8  ;;  %v1723_v46 = vld [vmem:[%s1913_s9 + $0xf0] ss:$8 sps:$4 sm:$0xff]   ;;  %s1991_s12 = scalar_lea.vmem [#allocation2], %s1297_s7   ;;  %s1442_s9 = sshll.u32 (%p1882_p3), %s1786_s14, 7 }
  0x23   : > { %573 = vmatprep.subr.bf16.mxu0 %v1828_v1  ;;  %1546 = vmatprep.subr.bf16.mxu1 %v1828_v1  ;;  %s2044_s17 = scalar_lea.vmem (%p1882_p3), %s2180_s3, %s1442_s9  }
  0x26   : > { %574 = vmatpush1.bf16.msra.mxu0 %v1672_v9  ;;  %1556 = vmatpush1.bf16.msra.mxu1 %v1672_v9 }
  0x27   : > { %575 = vmatprep.subr.bf16.mxu0 %v1828_v1  ;;  %1547 = vmatprep.subr.bf16.mxu1 %v1828_v1 }
  0x2a   : > { %576 = vmatpush1.bf16.msra.mxu0 %v1673_v10  ;;  %1557 = vmatpush1.bf16.msra.mxu1 %v1673_v10 }
  0x2b   : > { %577 = vmatprep.subr.bf16.mxu0 %v1828_v1  ;;  %1548 = vmatprep.subr.bf16.mxu1 %v1828_v1 }
  0x2e   : > { %578 = vmatpush1.bf16.msra.mxu0 %v1674_v13  ;;  %1558 = vmatpush1.bf16.msra.mxu1 %v1674_v13 }
  0x2f   : > { %579 = vmatprep.subr.bf16.mxu0 %v1828_v1  ;;  %1549 = vmatprep.subr.bf16.mxu1 %v1828_v1 }
  0x32   : > { %580 = vmatpush1.bf16.msra.mxu0 %v559_v16  ;;  %1559 = vmatpush1.bf16.msra.mxu1 %v559_v16 }
  0x35   : > { %594 = vmatmul.mubr.bf16.vlgmr.msra.gmra.mrb[0].mxu0 %v1676_v17  ;;  %658 = vmatmul.mubr.bf16.vlgmr.msra.gmra.mrb[0].mxu1 %v1679_v18 }
  0x36   : > { %1345 = vmatprep.mubr.msk.bf16.mxu0 %vm505_vm0, %v1682_v19  ;;  %1353 = vmatprep.mubr.msk.bf16.mxu1 %vm505_vm0, %v1684_v20 }
  0x3d   : > { %602 = vmatmul.mubr.bf16.gmra.mrb[4].mxu0 %v1686_v21  ;;  %666 = vmatmul.mubr.bf16.gmra.mrb[4].mxu1 %v1687_v22 }
  0x3e   : > { %1346 = vmatprep.mubr.msk.bf16.mxu0 %vm505_vm0, %v1688_v23  ;;  %1354 = vmatprep.mubr.msk.bf16.mxu1 %vm505_vm0, %v1690_v24 }
  0x45   : > { %610 = vmatmul.mubr.bf16.gmra.mrb[8].mxu0 %v1692_v25  ;;  %674 = vmatmul.mubr.bf16.gmra.mrb[8].mxu1 %v1693_v26 }
  0x46   : > { %1347 = vmatprep.mubr.msk.bf16.mxu0 %vm505_vm0, %v1694_v27  ;;  %1355 = vmatprep.mubr.msk.bf16.mxu1 %vm505_vm0, %v1696_v28 }
  0x4d   : > { %618 = vmatmul.mubr.bf16.gmra.mrb[12].mxu0 %v1698_v29  ;;  %682 = vmatmul.mubr.bf16.gmra.mrb[12].mxu1 %v1699_v30 }
  0x4e   : > { %1348 = vmatprep.mubr.msk.bf16.mxu0 %vm505_vm0, %v1700_v31  ;;  %1356 = vmatprep.mubr.msk.bf16.mxu1 %vm505_vm0, %v1702_v32 }
  0x55   : > { %626 = vmatmul.mubr.bf16.gmra.mrb[16].mxu0 %v1704_v33  ;;  %690 = vmatmul.mubr.bf16.gmra.mrb[16].mxu1 %v1705_v34 }
  0x56   : > { %1349 = vmatprep.mubr.msk.bf16.mxu0 %vm505_vm0, %v1706_v35  ;;  %1357 = vmatprep.mubr.msk.bf16.mxu1 %vm505_vm0, %v1708_v36 }
  0x5d   : > { %634 = vmatmul.mubr.bf16.gmra.mrb[20].mxu0 %v1710_v37  ;;  %698 = vmatmul.mubr.bf16.gmra.mrb[20].mxu1 %v1711_v38 }
  0x5e   : > { %1350 = vmatprep.mubr.msk.bf16.mxu0 %vm505_vm0, %v1712_v39  ;;  %1358 = vmatprep.mubr.msk.bf16.mxu1 %vm505_vm0, %v1714_v40 }
  0x65   : > { %642 = vmatmul.mubr.bf16.gmra.mrb[24].mxu0 %v1716_v41  ;;  %706 = vmatmul.mubr.bf16.gmra.mrb[24].mxu1 %v1717_v42 }
  0x66   : > { %1351 = vmatprep.mubr.msk.bf16.mxu0 %vm505_vm0, %v1718_v43  ;;  %1359 = vmatprep.mubr.msk.bf16.mxu1 %vm505_vm0, %v1720_v44 }
  0x6d   : > { %650 = vmatmul.mubr.bf16.gmra.mrb[28].mxu0 %v1722_v45  ;;  %714 = vmatmul.mubr.bf16.gmra.mrb[28].mxu1 %v1723_v46 }
 0x108   : > { %v595_v48 = vpop.f32.mrb[0].mxu0  ;;  %v659_v49 = vpop.f32.mrb[0].mxu1 }
 0x109   : > { %v596_v50 = vadd.f32 %v1984_v47, %v595_v48  ;;  %v660_v51 = vadd.f32 %v1984_v47, %v659_v49  ;;  %v597_v52 = vpop.f32.mrb[1].mxu0  ;;  %v661_v53 = vpop.f32.mrb[1].mxu1 }
 0x10a   : > { %v598_v54 = vpop.f32.mrb[2].mxu0  ;;  %v662_v55 = vpop.f32.mrb[2].mxu1 }
 0x10b   : > { %v599_v56 = vadd.f32 %v1984_v47, %v598_v54  ;;  %v663_v57 = vadd.f32 %v1984_v47, %v662_v55  ;;  %v600_v58 = vpop.f32.mrb[3].mxu0  ;;  %v664_v59 = vpop.f32.mrb[3].mxu1  ;;  %v722_v60 = vmax.f32 %v596_v50, 0.0  ;;  %v738_v61 = vmax.f32 %v660_v51, 0.0 }
 0x10d   : > { %v723_v62 = vmax.f32 %v599_v56, 0.0  ;;  %v739_v63 = vmax.f32 %v663_v57, 0.0 }
 0x10f   : > { %v1448_v0 = vpack.c.bf16 %v723_v62, %v722_v60  ;;  %v1488_v1 = vpack.c.bf16 %v739_v63, %v738_v61 }
 0x110   : > { %v603_v2 = vpop.f32.mrb[4].mxu0  ;;  %v667_v3 = vpop.f32.mrb[4].mxu1 }
 0x111   : > { %1449 = vst [vmem:[%s1991_s12] sm:$0xff] %v1448_v0   ;;  %1532 = vst [vmem:[%s1991_s12 + $0x40] sm:$0xff] %v1488_v1   ;;  %v604_v4 = vadd.f32 %v1984_v47, %v603_v2  ;;  %v668_v5 = vadd.f32 %v1984_v47, %v667_v3  ;;  %v605_v6 = vpop.f32.mrb[5].mxu0  ;;  %v669_v7 = vpop.f32.mrb[5].mxu1 }
 0x112   : > { %v606_v8 = vpop.f32.mrb[6].mxu0  ;;  %v670_v9 = vpop.f32.mrb[6].mxu1 }
 0x113   : > { %v607_v10 = vadd.f32 %v1984_v47, %v606_v8  ;;  %v671_v11 = vadd.f32 %v1984_v47, %v670_v9  ;;  %v608_v12 = vpop.f32.mrb[7].mxu0  ;;  %v672_v13 = vpop.f32.mrb[7].mxu1  ;;  %v724_v14 = vmax.f32 %v604_v4, 0.0  ;;  %v740_v15 = vmax.f32 %v668_v5, 0.0 }
 0x115   : > { %v725_v16 = vmax.f32 %v607_v10, 0.0  ;;  %v741_v17 = vmax.f32 %v671_v11, 0.0 }
 0x117   : > { %v1453_v18 = vpack.c.bf16 %v725_v16, %v724_v14  ;;  %v1493_v19 = vpack.c.bf16 %v741_v17, %v740_v15 }
 0x118   : > { %v611_v20 = vpop.f32.mrb[8].mxu0  ;;  %v675_v21 = vpop.f32.mrb[8].mxu1 }
 0x119   : > { %1525 = vst [vmem:[%s1991_s12 + $0x8] sm:$0xff] %v1453_v18   ;;  %1533 = vst [vmem:[%s1991_s12 + $0x48] sm:$0xff] %v1493_v19   ;;  %v612_v22 = vadd.f32 %v1984_v47, %v611_v20  ;;  %v676_v23 = vadd.f32 %v1984_v47, %v675_v21  ;;  %v613_v24 = vpop.f32.mrb[9].mxu0  ;;  %v677_v25 = vpop.f32.mrb[9].mxu1 }
 0x11a   : > { %v614_v26 = vpop.f32.mrb[10].mxu0  ;;  %v678_v27 = vpop.f32.mrb[10].mxu1 }
 0x11b   : > { %v615_v28 = vadd.f32 %v1984_v47, %v614_v26  ;;  %v679_v29 = vadd.f32 %v1984_v47, %v678_v27  ;;  %v616_v30 = vpop.f32.mrb[11].mxu0  ;;  %v680_v31 = vpop.f32.mrb[11].mxu1  ;;  %v726_v32 = vmax.f32 %v612_v22, 0.0  ;;  %v742_v33 = vmax.f32 %v676_v23, 0.0 }
 0x11d   : > { %v727_v34 = vmax.f32 %v615_v28, 0.0  ;;  %v743_v35 = vmax.f32 %v679_v29, 0.0 }
 0x11f   : > { %v1458_v36 = vpack.c.bf16 %v727_v34, %v726_v32  ;;  %v1498_v37 = vpack.c.bf16 %v743_v35, %v742_v33 }
 0x120   : > { %v619_v38 = vpop.f32.mrb[12].mxu0  ;;  %v683_v39 = vpop.f32.mrb[12].mxu1 }
 0x121   : > { %1526 = vst [vmem:[%s1991_s12 + $0x10] sm:$0xff] %v1458_v36   ;;  %1534 = vst [vmem:[%s1991_s12 + $0x50] sm:$0xff] %v1498_v37   ;;  %v620_v40 = vadd.f32 %v1984_v47, %v619_v38  ;;  %v684_v41 = vadd.f32 %v1984_v47, %v683_v39  ;;  %v621_v42 = vpop.f32.mrb[13].mxu0  ;;  %v685_v43 = vpop.f32.mrb[13].mxu1 }
 0x122   : > { %v622_v44 = vpop.f32.mrb[14].mxu0  ;;  %v686_v45 = vpop.f32.mrb[14].mxu1 }
 0x123   : > { %v623_v46 = vadd.f32 %v1984_v47, %v622_v44  ;;  %v687_v48 = vadd.f32 %v1984_v47, %v686_v45  ;;  %v624_v49 = vpop.f32.mrb[15].mxu0  ;;  %v688_v50 = vpop.f32.mrb[15].mxu1  ;;  %v728_v51 = vmax.f32 %v620_v40, 0.0  ;;  %v744_v52 = vmax.f32 %v684_v41, 0.0 }
 0x125   : > { %v729_v53 = vmax.f32 %v623_v46, 0.0  ;;  %v745_v54 = vmax.f32 %v687_v48, 0.0 }
 0x127   : > { %v1463_v55 = vpack.c.bf16 %v729_v53, %v728_v51  ;;  %v1503_v56 = vpack.c.bf16 %v745_v54, %v744_v52 }
 0x128   : > { %v627_v57 = vpop.f32.mrb[16].mxu0  ;;  %v691_v58 = vpop.f32.mrb[16].mxu1 }
 0x129   : > { %1527 = vst [vmem:[%s1991_s12 + $0x18] sm:$0xff] %v1463_v55   ;;  %1535 = vst [vmem:[%s1991_s12 + $0x58] sm:$0xff] %v1503_v56   ;;  %v628_v59 = vadd.f32 %v1984_v47, %v627_v57  ;;  %v692_v60 = vadd.f32 %v1984_v47, %v691_v58  ;;  %v629_v61 = vpop.f32.mrb[17].mxu0  ;;  %v693_v62 = vpop.f32.mrb[17].mxu1 }
 0x12a   : > { %v630_v63 = vpop.f32.mrb[18].mxu0  ;;  %v694_v0 = vpop.f32.mrb[18].mxu1 }
 0x12b   : > { %v631_v1 = vadd.f32 %v1984_v47, %v630_v63  ;;  %v695_v2 = vadd.f32 %v1984_v47, %v694_v0  ;;  %v632_v3 = vpop.f32.mrb[19].mxu0  ;;  %v696_v4 = vpop.f32.mrb[19].mxu1  ;;  %v730_v5 = vmax.f32 %v628_v59, 0.0  ;;  %v746_v6 = vmax.f32 %v692_v60, 0.0 }
 0x12d   : > { %v731_v7 = vmax.f32 %v631_v1, 0.0  ;;  %v747_v8 = vmax.f32 %v695_v2, 0.0 }
 0x12f   : > { %v1468_v9 = vpack.c.bf16 %v731_v7, %v730_v5  ;;  %v1508_v10 = vpack.c.bf16 %v747_v8, %v746_v6 }
 0x130   : > { %v635_v11 = vpop.f32.mrb[20].mxu0  ;;  %v699_v12 = vpop.f32.mrb[20].mxu1 }
 0x131   : > { %1528 = vst [vmem:[%s1991_s12 + $0x20] sm:$0xff] %v1468_v9   ;;  %1536 = vst [vmem:[%s1991_s12 + $0x60] sm:$0xff] %v1508_v10   ;;  %v636_v13 = vadd.f32 %v1984_v47, %v635_v11  ;;  %v700_v14 = vadd.f32 %v1984_v47, %v699_v12  ;;  %v637_v15 = vpop.f32.mrb[21].mxu0  ;;  %v701_v16 = vpop.f32.mrb[21].mxu1 }
 0x132   : > { %v638_v17 = vpop.f32.mrb[22].mxu0  ;;  %v702_v18 = vpop.f32.mrb[22].mxu1 }
 0x133   : > { %v639_v19 = vadd.f32 %v1984_v47, %v638_v17  ;;  %v703_v20 = vadd.f32 %v1984_v47, %v702_v18  ;;  %v640_v21 = vpop.f32.mrb[23].mxu0  ;;  %v704_v22 = vpop.f32.mrb[23].mxu1  ;;  %v732_v23 = vmax.f32 %v636_v13, 0.0  ;;  %v748_v24 = vmax.f32 %v700_v14, 0.0 }
 0x135   : > { %v733_v25 = vmax.f32 %v639_v19, 0.0  ;;  %v749_v26 = vmax.f32 %v703_v20, 0.0 }
 0x137   : > { %v1473_v27 = vpack.c.bf16 %v733_v25, %v732_v23  ;;  %v1513_v28 = vpack.c.bf16 %v749_v26, %v748_v24 }
 0x138   : > { %v643_v29 = vpop.f32.mrb[24].mxu0  ;;  %v707_v30 = vpop.f32.mrb[24].mxu1 }
 0x139   : > { %1529 = vst [vmem:[%s1991_s12 + $0x28] sm:$0xff] %v1473_v27   ;;  %1537 = vst [vmem:[%s1991_s12 + $0x68] sm:$0xff] %v1513_v28   ;;  %v644_v31 = vadd.f32 %v1984_v47, %v643_v29  ;;  %v708_v32 = vadd.f32 %v1984_v47, %v707_v30  ;;  %v645_v33 = vpop.f32.mrb[25].mxu0  ;;  %v709_v34 = vpop.f32.mrb[25].mxu1 }
 0x13a   : > { %v646_v35 = vpop.f32.mrb[26].mxu0  ;;  %v710_v36 = vpop.f32.mrb[26].mxu1 }
 0x13b   : > { %v647_v37 = vadd.f32 %v1984_v47, %v646_v35  ;;  %v711_v38 = vadd.f32 %v1984_v47, %v710_v36  ;;  %v648_v39 = vpop.f32.mrb[27].mxu0  ;;  %v712_v40 = vpop.f32.mrb[27].mxu1  ;;  %v734_v41 = vmax.f32 %v644_v31, 0.0  ;;  %v750_v42 = vmax.f32 %v708_v32, 0.0 }
 0x13d   : > { %v735_v43 = vmax.f32 %v647_v37, 0.0  ;;  %v751_v44 = vmax.f32 %v711_v38, 0.0 }
 0x13f   : > { %v1478_v45 = vpack.c.bf16 %v735_v43, %v734_v41  ;;  %v1518_v46 = vpack.c.bf16 %v751_v44, %v750_v42 }
 0x140   : > { %v651_v48 = vpop.f32.mrb[28].mxu0  ;;  %v715_v49 = vpop.f32.mrb[28].mxu1 }
 0x141   : > { %1530 = vst [vmem:[%s1991_s12 + $0x30] sm:$0xff] %v1478_v45   ;;  %1538 = vst [vmem:[%s1991_s12 + $0x70] sm:$0xff] %v1518_v46   ;;  %v652_v50 = vadd.f32 %v1984_v47, %v651_v48  ;;  %v716_v51 = vadd.f32 %v1984_v47, %v715_v49  ;;  %v653_v52 = vpop.f32.mrb[29].mxu0  ;;  %v717_v53 = vpop.f32.mrb[29].mxu1 }
 0x142   : > { %v654_v54 = vpop.f32.mrb[30].mxu0  ;;  %v718_v55 = vpop.f32.mrb[30].mxu1 }
 0x143   : > { %v655_v56 = vadd.f32 %v1984_v47, %v654_v54  ;;  %v719_v57 = vadd.f32 %v1984_v47, %v718_v55  ;;  %v656_v58 = vpop.f32.mrb[31].mxu0  ;;  %v720_v59 = vpop.f32.mrb[31].mxu1  ;;  %v736_v60 = vmax.f32 %v652_v50, 0.0  ;;  %v752_v61 = vmax.f32 %v716_v51, 0.0  ;;  %920 = sbr.rel (!%p1882_p3) target bundleno = 400 (0x190), region = 36 }
 0x145   : > { %v737_v62 = vmax.f32 %v655_v56, 0.0  ;;  %v753_v63 = vmax.f32 %v719_v57, 0.0 }
 0x147   : > { %v1483_v0 = vpack.c.bf16 %v737_v62, %v736_v60  ;;  %v1523_v1 = vpack.c.bf16 %v753_v63, %v752_v61 }
 0x149   : > { %1531 = vst [vmem:[%s1991_s12 + $0x38] sm:$0xff] %v1483_v0   ;;  %1539 = vst [vmem:[%s1991_s12 + $0x78] sm:$0xff] %v1523_v1  }
 0x14a   : > { %s2192_s8 = smov (!%p923_p9, %s922_s8), 32 }
 0x14b   : > { %s1394_s19 = sshll.u32 %s2192_s8, 6 }
 0x14c   : > { %p1397_p10 = scmp.eq.s32.totalorder %s1394_s19, 0 }
 0x14d   : > { %s2050_s21 = sshrl.u32 (!%p1397_p10), %s2192_s8, 5 }
 0x14e   : > { %932 = sbr.rel (%p1397_p10) target bundleno = 400 (0x190), region = 40  ;;  %p1398_p11 = scmp.le.s32.totalorder (!%p1397_p10), %s2050_s21, 0 }
 0x155   : > { %1220 = sbr.rel (%p1398_p11) target bundleno = 379 (0x17b), region = 118  ;;  %s2182_s14 = smov (!%p1398_p11), %s2044_s17 }
 0x156   : > { %s2183_s20 = smov (!%p1398_p11), %s1991_s12  ;;  %s2059_s29 = smov (!%p1398_p11), 0  }
 0x157   : > { %s2061_s23 = smov (!%p1398_p11), 0  }
 0x15c LB: >> { %v948_v47 = vld [vmem:[%s1802_s20] sm:$0xf]  ;;  %v950_v2 = vld [vmem:[%s1802_s20 + $0x4] sm:$0xf]  ;;  %v952_v3 = vld [vmem:[%s1802_s20 + $0x8] sm:$0xf]  ;;  %s1810_s23 = sphi %s2061_s23, %s942_s23   ;;  %s1806_s29 = sphi %s2059_s29, %s2184_s29   ;;  %s1802_s20 = sphi %s2183_s20, %s1017_s20   ;;  %s1798_s14 = sphi %s2182_s14, %s1018_s14  }
 0x15d   : >> { %949 = vst [vmem:[%s1798_s14] sm:$0xf] %v948_v47  ;;  %951 = vst [vmem:[%s1798_s14 + $0x4] sm:$0xf] %v950_v2  ;;  %v954_v4 = vld [vmem:[%s1802_s20 + $0xc] sm:$0xf]  ;;  %s1012_s24 = sadd.s32 1, %s1806_s29 }
 0x15e   : >> { %953 = vst [vmem:[%s1798_s14 + $0x8] sm:$0xf] %v952_v3  ;;  %v956_v5 = vld [vmem:[%s1802_s20 + $0x10] sm:$0xf]  ;;  %v958_v6 = vld [vmem:[%s1802_s20 + $0x14] sm:$0xf]  ;;  %p1013_p12 = scmp.ge.s32.totalorder %s1012_s24, %s2050_s21 }
 0x15f   : >> { %955 = vst [vmem:[%s1798_s14 + $0xc] sm:$0xf] %v954_v4  ;;  %957 = vst [vmem:[%s1798_s14 + $0x10] sm:$0xf] %v956_v5  ;;  %v960_v7 = vld [vmem:[%s1802_s20 + $0x18] sm:$0xf] }
 0x160   : >> { %959 = vst [vmem:[%s1798_s14 + $0x14] sm:$0xf] %v958_v6  ;;  %v962_v8 = vld [vmem:[%s1802_s20 + $0x1c] sm:$0xf]  ;;  %v964_v9 = vld [vmem:[%s1802_s20 + $0x20] sm:$0xf] }
 0x161   : >> { %961 = vst [vmem:[%s1798_s14 + $0x18] sm:$0xf] %v960_v7  ;;  %963 = vst [vmem:[%s1798_s14 + $0x1c] sm:$0xf] %v962_v8  ;;  %v966_v10 = vld [vmem:[%s1802_s20 + $0x24] sm:$0xf] }
 0x162   : >> { %965 = vst [vmem:[%s1798_s14 + $0x20] sm:$0xf] %v964_v9  ;;  %v968_v11 = vld [vmem:[%s1802_s20 + $0x28] sm:$0xf]  ;;  %v970_v12 = vld [vmem:[%s1802_s20 + $0x2c] sm:$0xf] }
 0x163   : >> { %967 = vst [vmem:[%s1798_s14 + $0x24] sm:$0xf] %v966_v10  ;;  %969 = vst [vmem:[%s1798_s14 + $0x28] sm:$0xf] %v968_v11  ;;  %v972_v13 = vld [vmem:[%s1802_s20 + $0x30] sm:$0xf] }
 0x164   : >> { %971 = vst [vmem:[%s1798_s14 + $0x2c] sm:$0xf] %v970_v12  ;;  %v974_v14 = vld [vmem:[%s1802_s20 + $0x34] sm:$0xf]  ;;  %v976_v15 = vld [vmem:[%s1802_s20 + $0x38] sm:$0xf] }
 0x165   : >> { %973 = vst [vmem:[%s1798_s14 + $0x30] sm:$0xf] %v972_v13  ;;  %975 = vst [vmem:[%s1798_s14 + $0x34] sm:$0xf] %v974_v14  ;;  %v978_v16 = vld [vmem:[%s1802_s20 + $0x3c] sm:$0xf] }
 0x166   : >> { %977 = vst [vmem:[%s1798_s14 + $0x38] sm:$0xf] %v976_v15  ;;  %v980_v17 = vld [vmem:[%s1802_s20 + $0x40] sm:$0xf]  ;;  %v982_v18 = vld [vmem:[%s1802_s20 + $0x44] sm:$0xf] }
 0x167   : >> { %979 = vst [vmem:[%s1798_s14 + $0x3c] sm:$0xf] %v978_v16  ;;  %981 = vst [vmem:[%s1798_s14 + $0x40] sm:$0xf] %v980_v17  ;;  %v984_v19 = vld [vmem:[%s1802_s20 + $0x48] sm:$0xf] }
 0x168   : >> { %983 = vst [vmem:[%s1798_s14 + $0x44] sm:$0xf] %v982_v18  ;;  %v986_v20 = vld [vmem:[%s1802_s20 + $0x4c] sm:$0xf]  ;;  %v988_v21 = vld [vmem:[%s1802_s20 + $0x50] sm:$0xf] }
 0x169   : >> { %985 = vst [vmem:[%s1798_s14 + $0x48] sm:$0xf] %v984_v19  ;;  %987 = vst [vmem:[%s1798_s14 + $0x4c] sm:$0xf] %v986_v20  ;;  %v990_v22 = vld [vmem:[%s1802_s20 + $0x54] sm:$0xf] }
 0x16a   : >> { %989 = vst [vmem:[%s1798_s14 + $0x50] sm:$0xf] %v988_v21  ;;  %v992_v23 = vld [vmem:[%s1802_s20 + $0x58] sm:$0xf]  ;;  %v994_v24 = vld [vmem:[%s1802_s20 + $0x5c] sm:$0xf] }
 0x16b   : >> { %991 = vst [vmem:[%s1798_s14 + $0x54] sm:$0xf] %v990_v22  ;;  %993 = vst [vmem:[%s1798_s14 + $0x58] sm:$0xf] %v992_v23  ;;  %v996_v25 = vld [vmem:[%s1802_s20 + $0x60] sm:$0xf] }
 0x16c   : >> { %995 = vst [vmem:[%s1798_s14 + $0x5c] sm:$0xf] %v994_v24  ;;  %v998_v26 = vld [vmem:[%s1802_s20 + $0x64] sm:$0xf]  ;;  %v1000_v27 = vld [vmem:[%s1802_s20 + $0x68] sm:$0xf] }
 0x16d   : >> { %997 = vst [vmem:[%s1798_s14 + $0x60] sm:$0xf] %v996_v25  ;;  %999 = vst [vmem:[%s1798_s14 + $0x64] sm:$0xf] %v998_v26  ;;  %v1002_v28 = vld [vmem:[%s1802_s20 + $0x6c] sm:$0xf] }
 0x16e   : >> { %1001 = vst [vmem:[%s1798_s14 + $0x68] sm:$0xf] %v1000_v27  ;;  %v1004_v29 = vld [vmem:[%s1802_s20 + $0x70] sm:$0xf]  ;;  %v1006_v30 = vld [vmem:[%s1802_s20 + $0x74] sm:$0xf] }
 0x16f   : >> { %1003 = vst [vmem:[%s1798_s14 + $0x6c] sm:$0xf] %v1002_v28  ;;  %1005 = vst [vmem:[%s1798_s14 + $0x70] sm:$0xf] %v1004_v29  ;;  %v1008_v31 = vld [vmem:[%s1802_s20 + $0x78] sm:$0xf] }
 0x170   : >> { %1007 = vst [vmem:[%s1798_s14 + $0x74] sm:$0xf] %v1006_v30  ;;  %v1010_v32 = vld [vmem:[%s1802_s20 + $0x7c] sm:$0xf]  ;;  %1009 = vst [vmem:[%s1798_s14 + $0x78] sm:$0xf] %v1008_v31 }
 0x171   : >> { %1011 = vst [vmem:[%s1798_s14 + $0x7c] sm:$0xf] %v1010_v32  ;;  %s2194_s24 = smov (%p1013_p12, %s1012_s24), 0  ;;  %s942_s23 = sadd.s32 1, %s1810_s23  }
 0x172   : >> { %s1399_s25 = sshll.u32 %s2194_s24, 7  ;;  %p941_p13 = scmp.ge.s32.totalorder %s942_s23, %s2050_s21 }
 0x173   : >> { %s1017_s20 = scalar_lea.vmem %s1991_s12, %s1399_s25 [#allocation2]   ;;  %s1018_s14 = scalar_lea.vmem %s2044_s17, %s1399_s25  }
 0x174   : >> { %s2184_s29 = smov %s2194_s24  ;;  %944 = sbr.rel (!%p941_p13) target bundleno = 348 (0x15c), region = 124 }
 0x17b PF: > { %s2154_s26 = sand.u32 31, %s2192_s8   ;;  %s1443_s27 = sshll.u32 %s2050_s21, 7 }
 0x17c   : > { %s1023_s28 = scalar_lea.vmem %s1991_s12, %s1443_s27 [#allocation2]   ;;  %s1025_s30 = scalar_lea.vmem %s2044_s17, %s1443_s27  }
 0x17d   : > { %p1404_p0 = scmp.le.s32.totalorder %s2154_s26, 0 }
 0x17e   : > { %s1812_s4 = smov (!%p1404_p0), %s1025_s30   ;;  %s1816_s5 = smov (!%p1404_p0), %s1023_s28  }
 0x17f   : > { %1234 = sbr.rel (%p1404_p0) target bundleno = 400 (0x190), region = 129  ;;  %s1820_s6 = smov (!%p1404_p0), 0  }
 0x180   : > { %s1824_s7 = smov (!%p1404_p0), 0  }
 0x186 LB: >> { %v1035_v33 = vld [vmem:[%s1818_s5] sm:$0xf]  ;;  %s1037_s8 = sadd.s32 1, %s1822_s6  ;;  %s1029_s7 = sadd.s32 1, %s1826_s7   ;;  %s1826_s7 = sphi %s1824_s7, %s1029_s7   ;;  %s1822_s6 = sphi %s1820_s6, %s1821_s6   ;;  %s1818_s5 = sphi %s1816_s5, %s1042_s5   ;;  %s1814_s4 = sphi %s1812_s4, %s1043_s4  }
 0x187   : >> { %1036 = vst [vmem:[%s1814_s4] sm:$0xf] %v1035_v33  ;;  %p1038_p1 = scmp.ge.s32.totalorder %s1037_s8, %s2154_s26  ;;  %p1028_p2 = scmp.ge.s32.totalorder %s1029_s7, %s2154_s26 }
 0x189   : >> { %s2196_s8 = smov (%p1038_p1, %s1037_s8), 0  ;;  %1031 = sbr.rel (!%p1028_p2) target bundleno = 390 (0x186), region = 135 }
 0x18a   : >> { %s1405_s12 = sshll.u32 %s2196_s8, 2  ;;  %s1821_s6 = smov %s2196_s8  }
 0x18b   : >> { %s1042_s5 = scalar_lea.vmem %s1023_s28, %s1405_s12 [#allocation2]   ;;  %s1043_s4 = scalar_lea.vmem %s1025_s30, %s1405_s12  }
 0x190 PF: > { %s13_s16 = sadd.s32 1, %s1794_s16   ;;  %s2185_s12 = smov %s1782_s13 }
 0x191   : > { %p10_p3 = scmp.ge.s32.totalorder %s13_s16, 4   ;;  %s2186_s13 = smov %s1891_s22 }
 0x192   : > { %s2187_s14 = smov %s1790_s15  ;;  %s2188_s15 = smov %s2190_s18 }
 0x193   :  { %12 = sbr.rel (!%p10_p3) target bundleno = 3 (0x3), region = 146 }

// kernel: squeezenet_forward.20
= control target key start
LH: loop header
LB: loop body
LE: loop exit
PB: predicated region body
PF: predicated region fallthrough
CT: control target
= control target key end

     0   :  { %v445_v0 = vmov 0.0   ;;  %vm446_vm0 = vmmov 0   ;;  %vm293_vm1 = vcmask 125952   ;;  %s589_s1 = inlined_call_operand.vmem [shape: bf16[128,16], index: 1, kind: input, shape index: {}]   ;;  %s590_s0 = inlined_call_operand.vmem [shape: bf16[98,128], index: 0, kind: input, shape index: {}]   ;;  %s591_s2 = inlined_call_operand.vmem [shape: f32[1,16], index: 2, kind: input, shape index: {}]   ;;  %s592_s3 = inlined_call_operand.vmem [shape: bf16[98,16], index: 3, kind: output, shape index: {}]  }
   0x1   :  { %368 = vmatprep.subr.bf16.mxu0 %v445_v0  ;;  %v430_v1 = vld [vmem:[%s589_s1] sm:$0xff]   ;;  %412 = vmatprep.subr.bf16.mxu1 %v445_v0  ;;  %v431_v2 = vld [vmem:[%s589_s1 + $0x8] sm:$0xff]   ;;  %v432_v3 = vld [vmem:[%s589_s1 + $0x10] sm:$0xff]  }
   0x2   :  { %384 = vmatprep.mubr.msk.bf16.mxu0 %vm446_vm0, %v445_v0  ;;  %400 = vmatprep.mubr.msk.bf16.mxu1 %vm446_vm0, %v445_v0  ;;  %v433_v4 = vld [vmem:[%s589_s1 + $0x18] sm:$0xff]   ;;  %v434_v5 = vld [vmem:[%s589_s1 + $0x20] sm:$0xff]   ;;  %v435_v6 = vld [vmem:[%s589_s1 + $0x28] sm:$0xff]  }
   0x3   :  { %369 = vmatpush3.bf16.msra.mxu0 %v430_v1  ;;  %420 = vmatpush3.bf16.msra.mxu1 %v430_v1  ;;  %v436_v7 = vld [vmem:[%s589_s1 + $0x30] sm:$0xff]   ;;  %v437_v8 = vld [vmem:[%s589_s1 + $0x38] sm:$0xff]   ;;  %v438_v9 = vld [vmem:[%s590_s0] sm:$0xff]  }
   0x4   :  { %370 = vmatprep.subr.bf16.mxu0 %v445_v0  ;;  %413 = vmatprep.subr.bf16.mxu1 %v445_v0  ;;  %v439_v10 = vld [vmem:[%s590_s0 + $0x20] sm:$0xff]   ;;  %v440_v11 = vld [vmem:[%s590_s0 + $0x8] sm:$0xff]   ;;  %v442_v13 = vld [vmem:[%s590_s0 + $0x10] sm:$0xff]  }
   0x5   :  { %v441_v12 = vld [vmem:[%s590_s0 + $0x28] sm:$0xff]   ;;  %v443_v14 = vld [vmem:[%s590_s0 + $0x30] ss:$0 sps:$4 sm:$0xff]   ;;  %v444_v15 = vld [vmem:[%s590_s0 + $0x18] sm:$0xff]  }
   0x6   :  { %v522_v16 = vld [vmem:[%s591_s2] ss:$0 sm:$0xff] }
   0x7   :  { %371 = vmatpush3.bf16.msra.mxu0 %v431_v2  ;;  %421 = vmatpush3.bf16.msra.mxu1 %v431_v2 }
   0x8   :  { %372 = vmatprep.subr.bf16.mxu0 %v445_v0  ;;  %414 = vmatprep.subr.bf16.mxu1 %v445_v0 }
   0xb   :  { %373 = vmatpush3.bf16.msra.mxu0 %v432_v3  ;;  %422 = vmatpush3.bf16.msra.mxu1 %v432_v3 }
   0xc   :  { %374 = vmatprep.subr.bf16.mxu0 %v445_v0  ;;  %415 = vmatprep.subr.bf16.mxu1 %v445_v0 }
   0xf   :  { %375 = vmatpush3.bf16.msra.mxu0 %v433_v4  ;;  %423 = vmatpush3.bf16.msra.mxu1 %v433_v4 }
  0x10   :  { %376 = vmatprep.subr.bf16.mxu0 %v445_v0  ;;  %416 = vmatprep.subr.bf16.mxu1 %v445_v0 }
  0x13   :  { %377 = vmatpush3.bf16.msra.mxu0 %v434_v5  ;;  %424 = vmatpush3.bf16.msra.mxu1 %v434_v5 }
  0x14   :  { %378 = vmatprep.subr.bf16.mxu0 %v445_v0  ;;  %417 = vmatprep.subr.bf16.mxu1 %v445_v0 }
  0x17   :  { %379 = vmatpush3.bf16.msra.mxu0 %v435_v6  ;;  %425 = vmatpush3.bf16.msra.mxu1 %v435_v6 }
  0x18   :  { %380 = vmatprep.subr.bf16.mxu0 %v445_v0  ;;  %418 = vmatprep.subr.bf16.mxu1 %v445_v0 }
  0x1b   :  { %381 = vmatpush3.bf16.msra.mxu0 %v436_v7  ;;  %426 = vmatpush3.bf16.msra.mxu1 %v436_v7 }
  0x1c   :  { %382 = vmatprep.subr.bf16.mxu0 %v445_v0  ;;  %419 = vmatprep.subr.bf16.mxu1 %v445_v0 }
  0x1f   :  { %383 = vmatpush3.bf16.msra.mxu0 %v437_v8  ;;  %427 = vmatpush3.bf16.msra.mxu1 %v437_v8 }
  0x22   :  { %385 = vmatmul.mubr.bf16.vlgmr.msra.gmra.mrb[0].mxu0 %v438_v9  ;;  %401 = vmatmul.mubr.bf16.vlgmr.msra.gmra.mrb[0].mxu1 %v439_v10 }
  0x23   :  { %388 = vmatprep.mubr.msk.bf16.mxu0 %vm446_vm0, %v445_v0  ;;  %404 = vmatprep.mubr.msk.bf16.mxu1 %vm446_vm0, %v445_v0 }
  0x2a   :  { %389 = vmatmul.mubr.bf16.gmra.mrb[4].mxu0 %v440_v11  ;;  %405 = vmatmul.mubr.bf16.gmra.mrb[4].mxu1 %v441_v12 }
  0x2b   :  { %392 = vmatprep.mubr.msk.bf16.mxu0 %vm446_vm0, %v445_v0  ;;  %408 = vmatprep.mubr.msk.bf16.mxu1 %vm446_vm0, %v445_v0 }
  0x32   :  { %393 = vmatmul.mubr.bf16.gmra.mrb[8].mxu0 %v442_v13  ;;  %409 = vmatmul.mubr.bf16.gmra.mrb[8].mxu1 %v443_v14 }
  0x33   :  { %396 = vmatprep.mubr.msk.bf16.mxu0 %vm446_vm0, %v445_v0 }
  0x3a   :  { %397 = vmatmul.mubr.bf16.gmra.mrb[12].mxu0 %v444_v15 }
  0xf5   :  { %v173_v17 = vpop.f32.mrb[0].mxu0  ;;  %v205_v18 = vpop.f32.mrb[0].mxu1 }
  0xf6   :  { %v174_v19 = vadd.f32 %v522_v16, %v173_v17  ;;  %v386_v20 = vpop.f32.mrb[1].mxu0  ;;  %v206_v21 = vadd.f32 %v522_v16, %v205_v18  ;;  %v402_v22 = vpop.f32.mrb[1].mxu1 }
  0xf7   :  { %v176_v23 = vpop.f32.mrb[2].mxu0  ;;  %v208_v24 = vpop.f32.mrb[2].mxu1 }
  0xf8   :  { %v227_v25 = vmax.f32 %v174_v19, 0.0  ;;  %v177_v26 = vadd.f32 %v522_v16, %v176_v23  ;;  %v387_v27 = vpop.f32.mrb[3].mxu0  ;;  %v235_v28 = vmax.f32 %v206_v21, 0.0  ;;  %v209_v29 = vadd.f32 %v522_v16, %v208_v24  ;;  %v403_v30 = vpop.f32.mrb[3].mxu1 }
  0xfa   :  { %v340_v31 = vpack.c.bf16 %v227_v25, %v227_v25  ;;  %v228_v32 = vmax.f32 %v177_v26, 0.0  ;;  %v348_v33 = vpack.c.bf16 %v235_v28, %v235_v28  ;;  %v236_v34 = vmax.f32 %v209_v29, 0.0 }
  0xfc   :  { %294 = vst.msk [vmem:[%s592_s3] sm:$0xf] %vm293_vm1, %v340_v31  ;;  %v341_v35 = vpack.c.bf16 %v228_v32, %v228_v32  ;;  %302 = vst.msk [vmem:[%s592_s3 + $0x20] sm:$0xf] %vm293_vm1, %v348_v33  ;;  %v349_v36 = vpack.c.bf16 %v236_v34, %v236_v34 }
  0xfd   :  { %v181_v37 = vpop.f32.mrb[4].mxu0  ;;  %v213_v38 = vpop.f32.mrb[4].mxu1 }
  0xfe   :  { %295 = vst.msk [vmem:[%s592_s3 + $0x4] sm:$0xf] %vm293_vm1, %v341_v35  ;;  %v182_v39 = vadd.f32 %v522_v16, %v181_v37  ;;  %v390_v40 = vpop.f32.mrb[5].mxu0  ;;  %303 = vst.msk [vmem:[%s592_s3 + $0x24] sm:$0xf] %vm293_vm1, %v349_v36  ;;  %v214_v41 = vadd.f32 %v522_v16, %v213_v38  ;;  %v406_v42 = vpop.f32.mrb[5].mxu1 }
  0xff   :  { %v184_v43 = vpop.f32.mrb[6].mxu0  ;;  %v216_v44 = vpop.f32.mrb[6].mxu1 }
 0x100   :  { %v229_v45 = vmax.f32 %v182_v39, 0.0  ;;  %v185_v46 = vadd.f32 %v522_v16, %v184_v43  ;;  %v391_v47 = vpop.f32.mrb[7].mxu0  ;;  %v237_v48 = vmax.f32 %v214_v41, 0.0  ;;  %v217_v49 = vadd.f32 %v522_v16, %v216_v44  ;;  %v407_v50 = vpop.f32.mrb[7].mxu1 }
 0x102   :  { %v342_v51 = vpack.c.bf16 %v229_v45, %v229_v45  ;;  %v230_v52 = vmax.f32 %v185_v46, 0.0  ;;  %v350_v53 = vpack.c.bf16 %v237_v48, %v237_v48  ;;  %v238_v54 = vmax.f32 %v217_v49, 0.0 }
 0x104   :  { %296 = vst.msk [vmem:[%s592_s3 + $0x8] sm:$0xf] %vm293_vm1, %v342_v51  ;;  %v343_v55 = vpack.c.bf16 %v230_v52, %v230_v52  ;;  %304 = vst.msk [vmem:[%s592_s3 + $0x28] sm:$0xf] %vm293_vm1, %v350_v53  ;;  %v351_v56 = vpack.c.bf16 %v238_v54, %v238_v54 }
 0x105   :  { %v189_v57 = vpop.f32.mrb[8].mxu0  ;;  %v221_v58 = vpop.f32.mrb[8].mxu1 }
 0x106   :  { %297 = vst.msk [vmem:[%s592_s3 + $0xc] sm:$0xf] %vm293_vm1, %v343_v55  ;;  %v190_v59 = vadd.f32 %v522_v16, %v189_v57  ;;  %v394_v60 = vpop.f32.mrb[9].mxu0  ;;  %305 = vst.msk [vmem:[%s592_s3 + $0x2c] sm:$0xf] %vm293_vm1, %v351_v56  ;;  %v222_v61 = vadd.f32 %v522_v16, %v221_v58  ;;  %v410_v62 = vpop.f32.mrb[9].mxu1 }
 0x107   :  { %v192_v63 = vpop.f32.mrb[10].mxu0  ;;  %v224_v0 = vpop.f32.mrb[10].mxu1 }
 0x108   :  { %v231_v1 = vmax.f32 %v190_v59, 0.0  ;;  %v193_v2 = vadd.f32 %v522_v16, %v192_v63  ;;  %v395_v3 = vpop.f32.mrb[11].mxu0  ;;  %v239_v4 = vmax.f32 %v222_v61, 0.0  ;;  %v411_v5 = vpop.f32.mrb[11].mxu1 }
 0x10a   :  { %v344_v6 = vpack.c.bf16 %v231_v1, %v231_v1  ;;  %v232_v7 = vmax.f32 %v193_v2, 0.0  ;;  %v352_v8 = vpack.c.bf16 %v239_v4, %v239_v4 }
 0x10c   :  { %298 = vst.msk [vmem:[%s592_s3 + $0x10] sm:$0xf] %vm293_vm1, %v344_v6  ;;  %v345_v9 = vpack.c.bf16 %v232_v7, %v232_v7  ;;  %306 = vst.msk [vmem:[%s592_s3 + $0x30] sm:$0xf] %vm293_vm1, %v352_v8 }
 0x10d   :  { %v197_v10 = vpop.f32.mrb[12].mxu0 }
 0x10e   :  { %299 = vst.msk [vmem:[%s592_s3 + $0x14] sm:$0xf] %vm293_vm1, %v345_v9  ;;  %v198_v11 = vadd.f32 %v522_v16, %v197_v10  ;;  %v398_v12 = vpop.f32.mrb[13].mxu0 }
 0x10f   :  { %v200_v13 = vpop.f32.mrb[14].mxu0 }
 0x110   :  { %v233_v14 = vmax.f32 %v198_v11, 0.0  ;;  %v201_v15 = vadd.f32 %v522_v16, %v200_v13  ;;  %v399_v17 = vpop.f32.mrb[15].mxu0 }
 0x112   :  { %v346_v18 = vpack.c.bf16 %v233_v14, %v233_v14  ;;  %v234_v19 = vmax.f32 %v201_v15, 0.0 }
 0x114   :  { %300 = vst.msk [vmem:[%s592_s3 + $0x18] sm:$0xf] %vm293_vm1, %v346_v18  ;;  %v347_v20 = vpack.c.bf16 %v234_v19, %v234_v19 }
 0x116   :  { %301 = vst.msk [vmem:[%s592_s3 + $0x1c] sm:$0xf] %vm293_vm1, %v347_v20 }

// kernel: squeezenet_forward.21
= control target key start
LH: loop header
LB: loop body
LE: loop exit
PB: predicated region body
PF: predicated region fallthrough
CT: control target
= control target key end

     0   :  { %v500_v0 = vmov 0   ;;  %vm167_vm0 = vcmask 130048   ;;  %s633_s1 = inlined_call_operand.vmem [shape: bf16[144,128], index: 1, kind: input, shape index: {}]   ;;  %s634_s0 = inlined_call_operand.vmem [shape: bf16[98,144], index: 0, kind: input, shape index: {}]   ;;  %s635_s2 = inlined_call_operand.vmem [shape: f32[1,128], index: 2, kind: input, shape index: {}]   ;;  %s636_s3 = inlined_call_operand.vmem [shape: bf16[98,128], index: 3, kind: output, shape index: {}]  }
   0x1   :  { %189 = vmatprep.subr.bf16.mxu0 %v500_v0  ;;  %v471_v1 = vld [vmem:[%s633_s1] sm:$0xff]   ;;  %452 = vmatprep.subr.bf16.mxu1 %v500_v0  ;;  %v472_v2 = vld [vmem:[%s633_s1 + $0x8] sm:$0xff]   ;;  %v473_v3 = vld [vmem:[%s633_s1 + $0x10] sm:$0xff]  }
   0x2   :  { %190 = vmatpush1.bf16.msra.mxu0 %v471_v1  ;;  %461 = vmatpush1.bf16.msra.mxu1 %v471_v1  ;;  %v474_v4 = vld [vmem:[%s633_s1 + $0x18] sm:$0xff]   ;;  %v482_v5 = vld [vmem:[%s634_s0 + $0x4] ss:$8 sps:$4 sm:$0xff]   ;;  %v477_v9 = vld [vmem:[%s633_s1 + $0x30] sm:$0xff]  }
   0x3   :  { %191 = vmatprep.subr.bf16.mxu0 %v500_v0  ;;  %453 = vmatprep.subr.bf16.mxu1 %v500_v0  ;;  %v485_v6 = vld [vmem:[%s634_s0 + $0x44] ss:$8 sps:$4 sm:$0xff]   ;;  %v478_v10 = vld [vmem:[%s633_s1 + $0x38] sm:$0xff]   ;;  %v480_v12 = vld [vmem:[%s634_s0] ss:$8 sps:$4 sm:$0xff]  }
   0x4   :  { %384 = vmatprep.mubr.msk.bf16.mxu0 %vm167_vm0, %v482_v5  ;;  %388 = vmatprep.mubr.msk.bf16.mxu1 %vm167_vm0, %v485_v6  ;;  %v475_v7 = vld [vmem:[%s633_s1 + $0x20] sm:$0xff]   ;;  %v476_v8 = vld [vmem:[%s633_s1 + $0x28] sm:$0xff]   ;;  %v486_v14 = vld [vmem:[%s634_s0 + $0x14] ss:$8 sps:$4 sm:$0xff]  }
   0x5   :  { %v479_v11 = vld [vmem:[%s633_s1 + $0x40] sm:$0xff]   ;;  %v489_v15 = vld [vmem:[%s634_s0 + $0x54] ss:$8 sps:$4 sm:$0xff]   ;;  %v488_v17 = vld [vmem:[%s634_s0 + $0x10] ss:$8 sps:$4 sm:$0xff]  }
   0x6   :  { %192 = vmatpush1.bf16.msra.mxu0 %v472_v2  ;;  %462 = vmatpush1.bf16.msra.mxu1 %v472_v2  ;;  %v483_v13 = vld [vmem:[%s634_s0 + $0x40] ss:$8 sps:$4 sm:$0xff]   ;;  %v493_v18 = vld [vmem:[%s634_s0 + $0x50] ss:$8 sps:$4 sm:$0xff]   ;;  %v491_v19 = vld [vmem:[%s634_s0 + $0x24] ss:$8 sps:$4 sm:$0xff]  }
   0x7   :  { %193 = vmatprep.subr.bf16.mxu0 %v500_v0  ;;  %454 = vmatprep.subr.bf16.mxu1 %v500_v0  ;;  %v27_v16 = vld [vmem:[%s634_s0 + $0x60] sm:$0xff]  ;;  %v496_v23 = vld [vmem:[%s634_s0 + $0x34] ss:$8 sps:$4 sm:$0xff]   ;;  %v499_v24 = vld [vmem:[%s634_s0 + $0x30] ss:$8 sps:$4 sm:$0xff]  }
   0x8   :  { %v374_v20 = vcombine.high %v27_v16, %v27_v16  ;;  %v494_v21 = vld [vmem:[%s634_s0 + $0x20] ss:$8 sps:$4 sm:$0xff]   ;;  %v373_v22 = vcombine.low %v27_v16, %v27_v16 }
   0x9   :  { %v597_v25 = vld [vmem:[%s635_s2] ss:$0 sm:$0xff] }
   0xa   :  { %194 = vmatpush1.bf16.msra.mxu0 %v473_v3  ;;  %463 = vmatpush1.bf16.msra.mxu1 %v473_v3 }
   0xb   :  { %195 = vmatprep.subr.bf16.mxu0 %v500_v0  ;;  %455 = vmatprep.subr.bf16.mxu1 %v500_v0 }
   0xe   :  { %196 = vmatpush1.bf16.msra.mxu0 %v474_v4  ;;  %464 = vmatpush1.bf16.msra.mxu1 %v474_v4 }
   0xf   :  { %197 = vmatprep.subr.bf16.mxu0 %v500_v0  ;;  %456 = vmatprep.subr.bf16.mxu1 %v500_v0 }
  0x12   :  { %198 = vmatpush1.bf16.msra.mxu0 %v475_v7  ;;  %465 = vmatpush1.bf16.msra.mxu1 %v475_v7 }
  0x13   :  { %199 = vmatprep.subr.bf16.mxu0 %v500_v0  ;;  %457 = vmatprep.subr.bf16.mxu1 %v500_v0 }
  0x16   :  { %200 = vmatpush1.bf16.msra.mxu0 %v476_v8  ;;  %466 = vmatpush1.bf16.msra.mxu1 %v476_v8 }
  0x17   :  { %201 = vmatprep.subr.bf16.mxu0 %v500_v0  ;;  %458 = vmatprep.subr.bf16.mxu1 %v500_v0 }
  0x1a   :  { %202 = vmatpush1.bf16.msra.mxu0 %v477_v9  ;;  %467 = vmatpush1.bf16.msra.mxu1 %v477_v9 }
  0x1b   :  { %203 = vmatprep.subr.bf16.mxu0 %v500_v0  ;;  %459 = vmatprep.subr.bf16.mxu1 %v500_v0 }
  0x1e   :  { %204 = vmatpush1.bf16.msra.mxu0 %v478_v10  ;;  %468 = vmatpush1.bf16.msra.mxu1 %v478_v10 }
  0x1f   :  { %205 = vmatprep.subr.bf16.mxu0 %v500_v0  ;;  %460 = vmatprep.subr.bf16.mxu1 %v500_v0 }
  0x22   :  { %206 = vmatpush1.bf16.msra.mxu0 %v479_v11  ;;  %469 = vmatpush1.bf16.msra.mxu1 %v479_v11 }
  0x25   :  { %222 = vmatmul.mubr.bf16.vlgmr.msra.gmra.mrb[0].mxu0 %v480_v12  ;;  %254 = vmatmul.mubr.bf16.vlgmr.msra.gmra.mrb[0].mxu1 %v483_v13 }
  0x26   :  { %385 = vmatprep.mubr.msk.bf16.mxu0 %vm167_vm0, %v486_v14  ;;  %389 = vmatprep.mubr.msk.bf16.mxu1 %vm167_vm0, %v489_v15 }
  0x2d   :  { %230 = vmatmul.mubr.bf16.gmra.mrb[4].mxu0 %v488_v17  ;;  %262 = vmatmul.mubr.bf16.gmra.mrb[4].mxu1 %v493_v18 }
  0x2e   :  { %386 = vmatprep.mubr.msk.bf16.mxu0 %vm167_vm0, %v491_v19  ;;  %390 = vmatprep.mubr.msk.bf16.mxu1 %vm167_vm0, %v374_v20 }
  0x35   :  { %238 = vmatmul.mubr.bf16.gmra.mrb[8].mxu0 %v494_v21  ;;  %270 = vmatmul.mubr.bf16.gmra.mrb[8].mxu1 %v373_v22 }
  0x36   :  { %387 = vmatprep.mubr.msk.bf16.mxu0 %vm167_vm0, %v496_v23 }
  0x3d   :  { %246 = vmatmul.mubr.bf16.gmra.mrb[12].mxu0 %v499_v24 }
  0xf8   :  { %v223_v26 = vpop.f32.mrb[0].mxu0  ;;  %v255_v27 = vpop.f32.mrb[0].mxu1 }
  0xf9   :  { %v224_v28 = vadd.f32 %v597_v25, %v223_v26  ;;  %v225_v29 = vpop.f32.mrb[1].mxu0  ;;  %v256_v30 = vadd.f32 %v597_v25, %v255_v27  ;;  %v257_v31 = vpop.f32.mrb[1].mxu1 }
  0xfa   :  { %v226_v32 = vpop.f32.mrb[2].mxu0  ;;  %v258_v33 = vpop.f32.mrb[2].mxu1 }
  0xfb   :  { %v227_v34 = vadd.f32 %v597_v25, %v226_v32  ;;  %v228_v35 = vpop.f32.mrb[3].mxu0  ;;  %v285_v36 = vmax.f32 %v256_v30, 0.0  ;;  %v259_v37 = vadd.f32 %v597_v25, %v258_v33  ;;  %v260_v38 = vpop.f32.mrb[3].mxu1  ;;  %v277_v39 = vmax.f32 %v224_v28, 0.0 }
  0xfd   :  { %v278_v40 = vmax.f32 %v227_v34, 0.0  ;;  %v286_v41 = vmax.f32 %v259_v37, 0.0 }
  0xff   :  { %v420_v42 = vpack.c.bf16 %v278_v40, %v277_v39  ;;  %v440_v43 = vpack.c.bf16 %v286_v41, %v285_v36 }
 0x100   :  { %v231_v44 = vpop.f32.mrb[4].mxu0  ;;  %v263_v45 = vpop.f32.mrb[4].mxu1 }
 0x101   :  { %421 = vst [vmem:[%s636_s3] sm:$0xff] %v420_v42   ;;  %v232_v46 = vadd.f32 %v597_v25, %v231_v44  ;;  %v233_v47 = vpop.f32.mrb[5].mxu0  ;;  %450 = vst [vmem:[%s636_s3 + $0x20] sm:$0xff] %v440_v43   ;;  %v264_v48 = vadd.f32 %v597_v25, %v263_v45  ;;  %v265_v49 = vpop.f32.mrb[5].mxu1 }
 0x102   :  { %v234_v50 = vpop.f32.mrb[6].mxu0  ;;  %v266_v51 = vpop.f32.mrb[6].mxu1 }
 0x103   :  { %v235_v52 = vadd.f32 %v597_v25, %v234_v50  ;;  %v236_v53 = vpop.f32.mrb[7].mxu0  ;;  %v287_v54 = vmax.f32 %v264_v48, 0.0  ;;  %v267_v55 = vadd.f32 %v597_v25, %v266_v51  ;;  %v268_v56 = vpop.f32.mrb[7].mxu1  ;;  %v279_v57 = vmax.f32 %v232_v46, 0.0 }
 0x105   :  { %v280_v58 = vmax.f32 %v235_v52, 0.0  ;;  %v288_v59 = vmax.f32 %v267_v55, 0.0 }
 0x107   :  { %v425_v60 = vpack.c.bf16 %v280_v58, %v279_v57  ;;  %v445_v61 = vpack.c.bf16 %v288_v59, %v287_v54 }
 0x108   :  { %v239_v62 = vpop.f32.mrb[8].mxu0  ;;  %v271_v63 = vpop.f32.mrb[8].mxu1 }
 0x109   :  { %447 = vst [vmem:[%s636_s3 + $0x8] sm:$0xff] %v425_v60   ;;  %v240_v0 = vadd.f32 %v597_v25, %v239_v62  ;;  %v241_v1 = vpop.f32.mrb[9].mxu0  ;;  %451 = vst [vmem:[%s636_s3 + $0x28] sm:$0xff] %v445_v61   ;;  %v272_v2 = vadd.f32 %v597_v25, %v271_v63  ;;  %v273_v3 = vpop.f32.mrb[9].mxu1 }
 0x10a   :  { %v242_v4 = vpop.f32.mrb[10].mxu0  ;;  %v274_v5 = vpop.f32.mrb[10].mxu1 }
 0x10b   :  { %v243_v6 = vadd.f32 %v597_v25, %v242_v4  ;;  %v244_v7 = vpop.f32.mrb[11].mxu0  ;;  %v289_v8 = vmax.f32 %v272_v2, 0.0  ;;  %v275_v9 = vpop.f32.mrb[11].mxu1  ;;  %v281_v10 = vmax.f32 %v240_v0, 0.0 }
 0x10d   :  { %v282_v11 = vmax.f32 %v243_v6, 0.0  ;;  %v416_v12 = vpack.c.bf16 %v289_v8, %v289_v8 }
 0x10f   :  { %v430_v13 = vpack.c.bf16 %v282_v11, %v281_v10  ;;  %355 = vst [vmem:[%s636_s3 + $0x30] sm:$0xf] %v416_v12 }
 0x110   :  { %v247_v14 = vpop.f32.mrb[12].mxu0 }
 0x111   :  { %448 = vst [vmem:[%s636_s3 + $0x10] sm:$0xff] %v430_v13   ;;  %v248_v15 = vadd.f32 %v597_v25, %v247_v14  ;;  %v249_v16 = vpop.f32.mrb[13].mxu0 }
 0x112   :  { %v250_v17 = vpop.f32.mrb[14].mxu0 }
 0x113   :  { %v251_v18 = vadd.f32 %v597_v25, %v250_v17  ;;  %v252_v19 = vpop.f32.mrb[15].mxu0  ;;  %v283_v20 = vmax.f32 %v248_v15, 0.0 }
 0x115   :  { %v284_v21 = vmax.f32 %v251_v18, 0.0 }
 0x117   :  { %v435_v22 = vpack.c.bf16 %v284_v21, %v283_v20 }
 0x119   :  { %449 = vst [vmem:[%s636_s3 + $0x18] sm:$0xff] %v435_v22  }

// kernel: squeezenet_forward.24
= control target key start
LH: loop header
LB: loop body
LE: loop exit
PB: predicated region body
PF: predicated region fallthrough
CT: control target
= control target key end

     0   :  { %v445_v0 = vmov 0.0   ;;  %vm446_vm0 = vmmov 0   ;;  %vm293_vm1 = vcmask 257024   ;;  %s589_s1 = inlined_call_operand.vmem [shape: bf16[128,32], index: 1, kind: input, shape index: {}]   ;;  %s590_s0 = inlined_call_operand.vmem [shape: bf16[98,128], index: 0, kind: input, shape index: {}]   ;;  %s591_s2 = inlined_call_operand.vmem [shape: f32[1,32], index: 2, kind: input, shape index: {}]   ;;  %s592_s3 = inlined_call_operand.vmem [shape: bf16[98,32], index: 3, kind: output, shape index: {}]  }
   0x1   :  { %368 = vmatprep.subr.bf16.mxu0 %v445_v0  ;;  %v430_v1 = vld [vmem:[%s589_s1] sm:$0xff]   ;;  %412 = vmatprep.subr.bf16.mxu1 %v445_v0  ;;  %v431_v2 = vld [vmem:[%s589_s1 + $0x8] sm:$0xff]   ;;  %v432_v3 = vld [vmem:[%s589_s1 + $0x10] sm:$0xff]  }
   0x2   :  { %384 = vmatprep.mubr.msk.bf16.mxu0 %vm446_vm0, %v445_v0  ;;  %400 = vmatprep.mubr.msk.bf16.mxu1 %vm446_vm0, %v445_v0  ;;  %v433_v4 = vld [vmem:[%s589_s1 + $0x18] sm:$0xff]   ;;  %v434_v5 = vld [vmem:[%s589_s1 + $0x20] sm:$0xff]   ;;  %v435_v6 = vld [vmem:[%s589_s1 + $0x28] sm:$0xff]  }
   0x3   :  { %369 = vmatpush3.bf16.msra.mxu0 %v430_v1  ;;  %420 = vmatpush3.bf16.msra.mxu1 %v430_v1  ;;  %v436_v7 = vld [vmem:[%s589_s1 + $0x30] sm:$0xff]   ;;  %v437_v8 = vld [vmem:[%s589_s1 + $0x38] sm:$0xff]   ;;  %v438_v9 = vld [vmem:[%s590_s0] sm:$0xff]  }
   0x4   :  { %370 = vmatprep.subr.bf16.mxu0 %v445_v0  ;;  %413 = vmatprep.subr.bf16.mxu1 %v445_v0  ;;  %v439_v10 = vld [vmem:[%s590_s0 + $0x20] sm:$0xff]   ;;  %v440_v11 = vld [vmem:[%s590_s0 + $0x8] sm:$0xff]   ;;  %v442_v13 = vld [vmem:[%s590_s0 + $0x10] sm:$0xff]  }
   0x5   :  { %v441_v12 = vld [vmem:[%s590_s0 + $0x28] sm:$0xff]   ;;  %v443_v14 = vld [vmem:[%s590_s0 + $0x30] ss:$0 sps:$4 sm:$0xff]   ;;  %v444_v15 = vld [vmem:[%s590_s0 + $0x18] sm:$0xff]  }
   0x6   :  { %v522_v16 = vld [vmem:[%s591_s2] ss:$0 sm:$0xff] }
   0x7   :  { %371 = vmatpush3.bf16.msra.mxu0 %v431_v2  ;;  %421 = vmatpush3.bf16.msra.mxu1 %v431_v2 }
   0x8   :  { %372 = vmatprep.subr.bf16.mxu0 %v445_v0  ;;  %414 = vmatprep.subr.bf16.mxu1 %v445_v0 }
   0xb   :  { %373 = vmatpush3.bf16.msra.mxu0 %v432_v3  ;;  %422 = vmatpush3.bf16.msra.mxu1 %v432_v3 }
   0xc   :  { %374 = vmatprep.subr.bf16.mxu0 %v445_v0  ;;  %415 = vmatprep.subr.bf16.mxu1 %v445_v0 }
   0xf   :  { %375 = vmatpush3.bf16.msra.mxu0 %v433_v4  ;;  %423 = vmatpush3.bf16.msra.mxu1 %v433_v4 }
  0x10   :  { %376 = vmatprep.subr.bf16.mxu0 %v445_v0  ;;  %416 = vmatprep.subr.bf16.mxu1 %v445_v0 }
  0x13   :  { %377 = vmatpush3.bf16.msra.mxu0 %v434_v5  ;;  %424 = vmatpush3.bf16.msra.mxu1 %v434_v5 }
  0x14   :  { %378 = vmatprep.subr.bf16.mxu0 %v445_v0  ;;  %417 = vmatprep.subr.bf16.mxu1 %v445_v0 }
  0x17   :  { %379 = vmatpush3.bf16.msra.mxu0 %v435_v6  ;;  %425 = vmatpush3.bf16.msra.mxu1 %v435_v6 }
  0x18   :  { %380 = vmatprep.subr.bf16.mxu0 %v445_v0  ;;  %418 = vmatprep.subr.bf16.mxu1 %v445_v0 }
  0x1b   :  { %381 = vmatpush3.bf16.msra.mxu0 %v436_v7  ;;  %426 = vmatpush3.bf16.msra.mxu1 %v436_v7 }
  0x1c   :  { %382 = vmatprep.subr.bf16.mxu0 %v445_v0  ;;  %419 = vmatprep.subr.bf16.mxu1 %v445_v0 }
  0x1f   :  { %383 = vmatpush3.bf16.msra.mxu0 %v437_v8  ;;  %427 = vmatpush3.bf16.msra.mxu1 %v437_v8 }
  0x22   :  { %385 = vmatmul.mubr.bf16.vlgmr.msra.gmra.mrb[0].mxu0 %v438_v9  ;;  %401 = vmatmul.mubr.bf16.vlgmr.msra.gmra.mrb[0].mxu1 %v439_v10 }
  0x23   :  { %388 = vmatprep.mubr.msk.bf16.mxu0 %vm446_vm0, %v445_v0  ;;  %404 = vmatprep.mubr.msk.bf16.mxu1 %vm446_vm0, %v445_v0 }
  0x2a   :  { %389 = vmatmul.mubr.bf16.gmra.mrb[4].mxu0 %v440_v11  ;;  %405 = vmatmul.mubr.bf16.gmra.mrb[4].mxu1 %v441_v12 }
  0x2b   :  { %392 = vmatprep.mubr.msk.bf16.mxu0 %vm446_vm0, %v445_v0  ;;  %408 = vmatprep.mubr.msk.bf16.mxu1 %vm446_vm0, %v445_v0 }
  0x32   :  { %393 = vmatmul.mubr.bf16.gmra.mrb[8].mxu0 %v442_v13  ;;  %409 = vmatmul.mubr.bf16.gmra.mrb[8].mxu1 %v443_v14 }
  0x33   :  { %396 = vmatprep.mubr.msk.bf16.mxu0 %vm446_vm0, %v445_v0 }
  0x3a   :  { %397 = vmatmul.mubr.bf16.gmra.mrb[12].mxu0 %v444_v15 }
  0xf5   :  { %v173_v17 = vpop.f32.mrb[0].mxu0  ;;  %v205_v18 = vpop.f32.mrb[0].mxu1 }
  0xf6   :  { %v174_v19 = vadd.f32 %v522_v16, %v173_v17  ;;  %v386_v20 = vpop.f32.mrb[1].mxu0  ;;  %v206_v21 = vadd.f32 %v522_v16, %v205_v18  ;;  %v402_v22 = vpop.f32.mrb[1].mxu1 }
  0xf7   :  { %v176_v23 = vpop.f32.mrb[2].mxu0  ;;  %v208_v24 = vpop.f32.mrb[2].mxu1 }
  0xf8   :  { %v227_v25 = vmax.f32 %v174_v19, 0.0  ;;  %v177_v26 = vadd.f32 %v522_v16, %v176_v23  ;;  %v387_v27 = vpop.f32.mrb[3].mxu0  ;;  %v235_v28 = vmax.f32 %v206_v21, 0.0  ;;  %v209_v29 = vadd.f32 %v522_v16, %v208_v24  ;;  %v403_v30 = vpop.f32.mrb[3].mxu1 }
  0xfa   :  { %v340_v31 = vpack.c.bf16 %v227_v25, %v227_v25  ;;  %v228_v32 = vmax.f32 %v177_v26, 0.0  ;;  %v348_v33 = vpack.c.bf16 %v235_v28, %v235_v28  ;;  %v236_v34 = vmax.f32 %v209_v29, 0.0 }
  0xfc   :  { %294 = vst.msk [vmem:[%s592_s3] sm:$0xf] %vm293_vm1, %v340_v31  ;;  %v341_v35 = vpack.c.bf16 %v228_v32, %v228_v32  ;;  %302 = vst.msk [vmem:[%s592_s3 + $0x20] sm:$0xf] %vm293_vm1, %v348_v33  ;;  %v349_v36 = vpack.c.bf16 %v236_v34, %v236_v34 }
  0xfd   :  { %v181_v37 = vpop.f32.mrb[4].mxu0  ;;  %v213_v38 = vpop.f32.mrb[4].mxu1 }
  0xfe   :  { %295 = vst.msk [vmem:[%s592_s3 + $0x4] sm:$0xf] %vm293_vm1, %v341_v35  ;;  %v182_v39 = vadd.f32 %v522_v16, %v181_v37  ;;  %v390_v40 = vpop.f32.mrb[5].mxu0  ;;  %303 = vst.msk [vmem:[%s592_s3 + $0x24] sm:$0xf] %vm293_vm1, %v349_v36  ;;  %v214_v41 = vadd.f32 %v522_v16, %v213_v38  ;;  %v406_v42 = vpop.f32.mrb[5].mxu1 }
  0xff   :  { %v184_v43 = vpop.f32.mrb[6].mxu0  ;;  %v216_v44 = vpop.f32.mrb[6].mxu1 }
 0x100   :  { %v229_v45 = vmax.f32 %v182_v39, 0.0  ;;  %v185_v46 = vadd.f32 %v522_v16, %v184_v43  ;;  %v391_v47 = vpop.f32.mrb[7].mxu0  ;;  %v237_v48 = vmax.f32 %v214_v41, 0.0  ;;  %v217_v49 = vadd.f32 %v522_v16, %v216_v44  ;;  %v407_v50 = vpop.f32.mrb[7].mxu1 }
 0x102   :  { %v342_v51 = vpack.c.bf16 %v229_v45, %v229_v45  ;;  %v230_v52 = vmax.f32 %v185_v46, 0.0  ;;  %v350_v53 = vpack.c.bf16 %v237_v48, %v237_v48  ;;  %v238_v54 = vmax.f32 %v217_v49, 0.0 }
 0x104   :  { %296 = vst.msk [vmem:[%s592_s3 + $0x8] sm:$0xf] %vm293_vm1, %v342_v51  ;;  %v343_v55 = vpack.c.bf16 %v230_v52, %v230_v52  ;;  %304 = vst.msk [vmem:[%s592_s3 + $0x28] sm:$0xf] %vm293_vm1, %v350_v53  ;;  %v351_v56 = vpack.c.bf16 %v238_v54, %v238_v54 }
 0x105   :  { %v189_v57 = vpop.f32.mrb[8].mxu0  ;;  %v221_v58 = vpop.f32.mrb[8].mxu1 }
 0x106   :  { %297 = vst.msk [vmem:[%s592_s3 + $0xc] sm:$0xf] %vm293_vm1, %v343_v55  ;;  %v190_v59 = vadd.f32 %v522_v16, %v189_v57  ;;  %v394_v60 = vpop.f32.mrb[9].mxu0  ;;  %305 = vst.msk [vmem:[%s592_s3 + $0x2c] sm:$0xf] %vm293_vm1, %v351_v56  ;;  %v222_v61 = vadd.f32 %v522_v16, %v221_v58  ;;  %v410_v62 = vpop.f32.mrb[9].mxu1 }
 0x107   :  { %v192_v63 = vpop.f32.mrb[10].mxu0  ;;  %v224_v0 = vpop.f32.mrb[10].mxu1 }
 0x108   :  { %v231_v1 = vmax.f32 %v190_v59, 0.0  ;;  %v193_v2 = vadd.f32 %v522_v16, %v192_v63  ;;  %v395_v3 = vpop.f32.mrb[11].mxu0  ;;  %v239_v4 = vmax.f32 %v222_v61, 0.0  ;;  %v411_v5 = vpop.f32.mrb[11].mxu1 }
 0x10a   :  { %v344_v6 = vpack.c.bf16 %v231_v1, %v231_v1  ;;  %v232_v7 = vmax.f32 %v193_v2, 0.0  ;;  %v352_v8 = vpack.c.bf16 %v239_v4, %v239_v4 }
 0x10c   :  { %298 = vst.msk [vmem:[%s592_s3 + $0x10] sm:$0xf] %vm293_vm1, %v344_v6  ;;  %v345_v9 = vpack.c.bf16 %v232_v7, %v232_v7  ;;  %306 = vst.msk [vmem:[%s592_s3 + $0x30] sm:$0xf] %vm293_vm1, %v352_v8 }
 0x10d   :  { %v197_v10 = vpop.f32.mrb[12].mxu0 }
 0x10e   :  { %299 = vst.msk [vmem:[%s592_s3 + $0x14] sm:$0xf] %vm293_vm1, %v345_v9  ;;  %v198_v11 = vadd.f32 %v522_v16, %v197_v10  ;;  %v398_v12 = vpop.f32.mrb[13].mxu0 }
 0x10f   :  { %v200_v13 = vpop.f32.mrb[14].mxu0 }
 0x110   :  { %v233_v14 = vmax.f32 %v198_v11, 0.0  ;;  %v201_v15 = vadd.f32 %v522_v16, %v200_v13  ;;  %v399_v17 = vpop.f32.mrb[15].mxu0 }
 0x112   :  { %v346_v18 = vpack.c.bf16 %v233_v14, %v233_v14  ;;  %v234_v19 = vmax.f32 %v201_v15, 0.0 }
 0x114   :  { %300 = vst.msk [vmem:[%s592_s3 + $0x18] sm:$0xf] %vm293_vm1, %v346_v18  ;;  %v347_v20 = vpack.c.bf16 %v234_v19, %v234_v19 }
 0x116   :  { %301 = vst.msk [vmem:[%s592_s3 + $0x1c] sm:$0xf] %vm293_vm1, %v347_v20 }

// kernel: squeezenet_forward.25
= control target key start
LH: loop header
LB: loop body
LE: loop exit
PB: predicated region body
PF: predicated region fallthrough
CT: control target
= control target key end

     0   :  { %s1514_s12 = smov 0   ;;  %s1516_s13 = smov 0   ;;  %s1811_s0 = inlined_call_operand.vmem [shape: bf16[98,288], index: 0, kind: input, shape index: {}]   ;;  %s1812_s1 = inlined_call_operand.vmem [shape: bf16[288,256], index: 1, kind: input, shape index: {}]   ;;  %s1813_s2 = inlined_call_operand.vmem [shape: f32[1,256], index: 2, kind: input, shape index: {}]   ;;  %s1814_s3 = inlined_call_operand.vmem [shape: bf16[98,256], index: 3, kind: output, shape index: {}]  }
   0x1   :  { %s1518_s14 = smov 0   ;;  %s1520_s15 = smov 0  }
   0x2   :  { %s1522_s16 = smov 0  }
   0x3 LB: > { %s22_s17 = sadd.s32 1, %s1486_s15  ;;  %s1145_s18 = sadd.s32 4294967295, %s1490_s16   ;;  %s1490_s16 = sphi %s1522_s16, %s13_s16   ;;  %s1486_s15 = sphi %s1520_s15, %s1819_s15   ;;  %s1482_s14 = sphi %s1518_s14, %s1818_s14   ;;  %s1478_s13 = sphi %s1516_s13, %s1817_s13   ;;  %s1474_s12 = sphi %s1514_s12, %s1816_s12  }
   0x4   : > { %p23_p0 = scmp.ge.s32.totalorder %s22_s17, 2  ;;  %p65_p1 = scmp.ne.s32.totalorder %s1478_s13, %s1474_s12 }
   0x5   : > { %p66_p2 = scmp.eq.s32.totalorder %s1490_s16, 0  ;;  %p123_p4 = scmp.eq.s32.totalorder %s1145_s18, 1 }
   0x6   : > { %s1821_s17 = smov (%p23_p0, %s22_s17), 0  ;;  %s58_s20 = sadd.s32 1, %s1478_s13 }
   0x7   : > { %p67_p3 = por %p66_p2, %p65_p1  ;;  %s55_s19 = ssub.s32 %s1486_s15, %s1821_s17 }
   0x8   : > { %p56_p5 = scmp.eq.s32.totalorder %s55_s19, 0  ;;  %p1549_p6 = por %p123_p4, %p65_p1 }
   0x9   : > { %p1149_p7 = scmp.ge.s32.totalorder %s1490_s16, 2 }
   0xa   : > { %s1554_s22 = scalar_select %p56_p5, %s1478_s13, %s58_s20  }
   0xb   : > { %155 = sbr.rel (%p1149_p7) target bundleno = 46 (0x2e), region = 20 }
  0x12   : > { %158 = sbr.rel (!%p67_p3) target bundleno = 46 (0x2e), region = 24  ;;  %s160_s23 = sand.u32 (%p67_p3), 1, %s1478_s13  }
  0x13   : > { %s1150_s24 = sshll.u32 (%p67_p3), %s1486_s15, 2  ;;  %s1362_s25 = smul.u32 (%p67_p3), 144, %s160_s23 }
  0x14   : > { %s1562_s28 = scalar_lea.vmem (%p67_p3), %s1812_s1, %s1150_s24 }
  0x15   : > { %v180_v0 = vld [vmem:[%s1562_s28] sm:$0xf] (%p67_p3)  ;;  %v182_v1 = vld [vmem:[%s1562_s28 + $0x8] sm:$0xf] (%p67_p3)  ;;  %v184_v2 = vld [vmem:[%s1562_s28 + $0x10] sm:$0xf] (%p67_p3) }
  0x16   : > { %v186_v3 = vld [vmem:[%s1562_s28 + $0x18] sm:$0xf] (%p67_p3)  ;;  %v188_v4 = vld [vmem:[%s1562_s28 + $0x20] sm:$0xf] (%p67_p3)  ;;  %s1569_s29 = scalar_lea.vmem (%p67_p3), [#allocation2], %s1362_s25 }
  0x17   : > { %181 = vst [vmem:[%s1569_s29] sm:$0xf] (%p67_p3), %v180_v0  ;;  %183 = vst [vmem:[%s1569_s29 + $0x4] sm:$0xf] (%p67_p3), %v182_v1  ;;  %v190_v5 = vld [vmem:[%s1562_s28 + $0x28] sm:$0xf] (%p67_p3) }
  0x18   : > { %185 = vst [vmem:[%s1569_s29 + $0x8] sm:$0xf] (%p67_p3), %v184_v2  ;;  %187 = vst [vmem:[%s1569_s29 + $0xc] sm:$0xf] (%p67_p3), %v186_v3  ;;  %v192_v6 = vld [vmem:[%s1562_s28 + $0x30] sm:$0xf] (%p67_p3) }
  0x19   : > { %189 = vst [vmem:[%s1569_s29 + $0x10] sm:$0xf] %v188_v4  ;;  %v194_v7 = vld [vmem:[%s1562_s28 + $0x38] sm:$0xf]  ;;  %191 = vst [vmem:[%s1569_s29 + $0x14] sm:$0xf] %v190_v5 }
  0x1a   : > { %193 = vst [vmem:[%s1569_s29 + $0x18] sm:$0xf] %v192_v6  ;;  %195 = vst [vmem:[%s1569_s29 + $0x1c] sm:$0xf] %v194_v7  ;;  %v196_v8 = vld [vmem:[%s1562_s28 + $0x40] sm:$0xf] }
  0x1b   : > { %v198_v9 = vld [vmem:[%s1562_s28 + $0x48] sm:$0xf]  ;;  %v200_v10 = vld [vmem:[%s1562_s28 + $0x50] sm:$0xf]  ;;  %197 = vst [vmem:[%s1569_s29 + $0x20] sm:$0xf] %v196_v8 }
  0x1c   : > { %199 = vst [vmem:[%s1569_s29 + $0x24] sm:$0xf] %v198_v9  ;;  %201 = vst [vmem:[%s1569_s29 + $0x28] sm:$0xf] %v200_v10  ;;  %v202_v11 = vld [vmem:[%s1562_s28 + $0x58] sm:$0xf] }
  0x1d   : > { %v204_v12 = vld [vmem:[%s1562_s28 + $0x60] sm:$0xf]  ;;  %v206_v13 = vld [vmem:[%s1562_s28 + $0x68] sm:$0xf]  ;;  %203 = vst [vmem:[%s1569_s29 + $0x2c] sm:$0xf] %v202_v11 }
  0x1e   : > { %205 = vst [vmem:[%s1569_s29 + $0x30] sm:$0xf] %v204_v12  ;;  %207 = vst [vmem:[%s1569_s29 + $0x34] sm:$0xf] %v206_v13  ;;  %v208_v14 = vld [vmem:[%s1562_s28 + $0x70] sm:$0xf] }
  0x1f   : > { %v210_v15 = vld [vmem:[%s1562_s28 + $0x78] sm:$0xf]  ;;  %v212_v16 = vld [vmem:[%s1562_s28 + $0x80] sm:$0xf]  ;;  %209 = vst [vmem:[%s1569_s29 + $0x38] sm:$0xf] %v208_v14 }
  0x20   : > { %211 = vst [vmem:[%s1569_s29 + $0x3c] sm:$0xf] %v210_v15  ;;  %213 = vst [vmem:[%s1569_s29 + $0x40] sm:$0xf] %v212_v16  ;;  %v214_v17 = vld [vmem:[%s1562_s28 + $0x88] sm:$0xf] }
  0x21   : > { %v216_v18 = vld [vmem:[%s1562_s28 + $0x90] sm:$0xf]  ;;  %v218_v19 = vld [vmem:[%s1562_s28 + $0x98] sm:$0xf]  ;;  %215 = vst [vmem:[%s1569_s29 + $0x44] sm:$0xf] %v214_v17 }
  0x22   : > { %217 = vst [vmem:[%s1569_s29 + $0x48] sm:$0xf] %v216_v18  ;;  %219 = vst [vmem:[%s1569_s29 + $0x4c] sm:$0xf] %v218_v19  ;;  %v220_v20 = vld [vmem:[%s1562_s28 + $0xa0] sm:$0xf] }
  0x23   : > { %v222_v21 = vld [vmem:[%s1562_s28 + $0xa8] sm:$0xf]  ;;  %v224_v22 = vld [vmem:[%s1562_s28 + $0xb0] sm:$0xf]  ;;  %221 = vst [vmem:[%s1569_s29 + $0x50] sm:$0xf] %v220_v20 }
  0x24   : > { %223 = vst [vmem:[%s1569_s29 + $0x54] sm:$0xf] %v222_v21  ;;  %225 = vst [vmem:[%s1569_s29 + $0x58] sm:$0xf] %v224_v22  ;;  %v226_v23 = vld [vmem:[%s1562_s28 + $0xb8] sm:$0xf] }
  0x25   : > { %v228_v24 = vld [vmem:[%s1562_s28 + $0xc0] sm:$0xf]  ;;  %v230_v25 = vld [vmem:[%s1562_s28 + $0xc8] sm:$0xf]  ;;  %227 = vst [vmem:[%s1569_s29 + $0x5c] sm:$0xf] %v226_v23 }
  0x26   : > { %229 = vst [vmem:[%s1569_s29 + $0x60] sm:$0xf] %v228_v24  ;;  %231 = vst [vmem:[%s1569_s29 + $0x64] sm:$0xf] %v230_v25  ;;  %v232_v26 = vld [vmem:[%s1562_s28 + $0xd0] sm:$0xf] }
  0x27   : > { %v234_v27 = vld [vmem:[%s1562_s28 + $0xd8] sm:$0xf]  ;;  %v236_v28 = vld [vmem:[%s1562_s28 + $0xe0] sm:$0xf]  ;;  %233 = vst [vmem:[%s1569_s29 + $0x68] sm:$0xf] %v232_v26 }
  0x28   : > { %235 = vst [vmem:[%s1569_s29 + $0x6c] sm:$0xf] %v234_v27  ;;  %237 = vst [vmem:[%s1569_s29 + $0x70] sm:$0xf] %v236_v28  ;;  %v238_v29 = vld [vmem:[%s1562_s28 + $0xe8] sm:$0xf] }
  0x29   : > { %v240_v30 = vld [vmem:[%s1562_s28 + $0xf0] sm:$0xf]  ;;  %v242_v31 = vld [vmem:[%s1562_s28 + $0xf8] sm:$0xf]  ;;  %239 = vst [vmem:[%s1569_s29 + $0x74] sm:$0xf] %v238_v29 }
  0x2a   : > { %241 = vst [vmem:[%s1569_s29 + $0x78] sm:$0xf] %v240_v30  ;;  %243 = vst [vmem:[%s1569_s29 + $0x7c] sm:$0xf] %v242_v31  ;;  %v244_v32 = vld [vmem:[%s1562_s28 + $0x100] sm:$0xf] }
  0x2b   : > { %v246_v33 = vld [vmem:[%s1562_s28 + $0x108] sm:$0xf]  ;;  %v248_v34 = vld [vmem:[%s1562_s28 + $0x110] sm:$0xf]  ;;  %245 = vst [vmem:[%s1569_s29 + $0x80] sm:$0xf] %v244_v32 }
  0x2c   : > { %247 = vst [vmem:[%s1569_s29 + $0x84] sm:$0xf] %v246_v33  ;;  %249 = vst [vmem:[%s1569_s29 + $0x88] sm:$0xf] %v248_v34  ;;  %v250_v35 = vld [vmem:[%s1562_s28 + $0x118] sm:$0xf] }
  0x2d   : > { %251 = vst [vmem:[%s1569_s29 + $0x8c] sm:$0xf] %v250_v35 }
  0x2e PF: > { %p1151_p8 = scmp.ge.s32.totalorder %s1490_s16, 1  ;;  %p351_p9 = scmp.lt.s32.totalorder %s1490_s16, 3 }
  0x30   : > { %p352_p10 = pnand %p1151_p8, %p351_p9 }
  0x31   : > { %s358_s30 = sand.u32 (!%p352_p10), 1, %s1474_s12   ;;  %v1492_v36 = vmov (!%p352_p10), 0.0   ;;  %v1426_v37 = vld [vmem:[%s1811_s0 + $0x4] ss:$12 sps:$4 sm:$0xff] (!%p352_p10)   ;;  %vm1493_vm0 = vmmov (!%p352_p10), 0   ;;  %vm678_vm1 = vcmask (!%p352_p10), 261120  }
  0x32   : > { %355 = sbr.rel (%p352_p10) target bundleno = 367 (0x16f), region = 69  ;;  %1330 = vmatprep.subr.bf16.mxu1 (!%p352_p10), %v1492_v36  ;;  %1334 = vmatprep.mubr.msk.bf16.mxu1 (!%p352_p10), %vm1493_vm0, %v1492_v36  ;;  %v1428_v51 = vld [vmem:[%s1811_s0 + $0x8] ss:$12 sps:$4 sm:$0xff] (!%p352_p10)   ;;  %v1432_v57 = vld [vmem:[%s1811_s0 + $0x20] ss:$12 sps:$4 sm:$0xff] (!%p352_p10)   ;;  %p396_p11 = scmp.lt.s32.totalorder (!%p352_p10), %s1482_s14, 1 }
  0x33   : > { %s1363_s4 = smul.u32 (!%p352_p10), 144, %s358_s30  ;;  %732 = vmatprep.mubr.bf16.mxu0 (!%p352_p10), %v1426_v37  ;;  %v1424_v58 = vld [vmem:[%s1811_s0] ss:$12 sps:$4 sm:$0xff] (!%p352_p10)   ;;  %v1429_v59 = vld [vmem:[%s1811_s0 + $0x1c] ss:$12 sps:$4 sm:$0xff] (!%p352_p10)   ;;  %v425_v9 = vld [vmem:[%s1811_s0 + $0x90] sm:$0xff] (!%p352_p10) }
  0x34   : > { %v1436_v60 = vld [vmem:[%s1811_s0 + $0x38] ss:$12 sps:$4 sm:$0xff] (!%p352_p10)   ;;  %v1433_v62 = vld [vmem:[%s1811_s0 + $0x34] ss:$12 sps:$4 sm:$0xff] (!%p352_p10)   ;;  %v1440_v63 = vld [vmem:[%s1811_s0 + $0x50] ss:$12 sps:$4 sm:$0xff] (!%p352_p10)   ;;  %v1172_v11 = vcombine.high (!%p352_p10), %v425_v9, %v425_v9  ;;  %v1171_v12 = vcombine.low (!%p352_p10), %v425_v9, %v425_v9 }
  0x35   : > { %s1649_s7 = scalar_lea.vmem (!%p352_p10), [#allocation2], %s1363_s4  ;;  %v1431_v61 = vld [vmem:[%s1811_s0 + $0x18] ss:$12 sps:$4 sm:$0xff] (!%p352_p10)   ;;  %v1435_v0 = vld [vmem:[%s1811_s0 + $0x30] ss:$12 sps:$4 sm:$0xff] (!%p352_p10)   ;;  %s1364_s20 = smul.u32 (!%p352_p10), 52, %s358_s30 }
  0x36   : > { %v1407_v38 = vld [vmem:[%s1649_s7 + $0x40] sm:$0xff] (!%p352_p10)   ;;  %v1409_v40 = vld [vmem:[%s1649_s7 + $0x48] sm:$0xff] (!%p352_p10)   ;;  %v1411_v42 = vld [vmem:[%s1649_s7 + $0x50] sm:$0xff] (!%p352_p10)  }
  0x37   : > { %v1408_v39 = vld [vmem:[%s1649_s7] sm:$0xff] (!%p352_p10)   ;;  %1263 = vmatprep.subr.bf16.mxu0 (!%p352_p10), %v1407_v38  ;;  %v1410_v41 = vld [vmem:[%s1649_s7 + $0x8] sm:$0xff] (!%p352_p10)   ;;  %v1412_v43 = vld [vmem:[%s1649_s7 + $0x10] sm:$0xff] (!%p352_p10)   ;;  %s1758_s23 = scalar_lea.vmem (!%p352_p10), [#allocation3], %s1364_s20 }
  0x38   : > { %1264 = vmatpush3.bf16.msra.mxu0 (!%p352_p10), %v1408_v39  ;;  %v1413_v44 = vld [vmem:[%s1649_s7 + $0x58] sm:$0xff] (!%p352_p10)   ;;  %v1415_v46 = vld [vmem:[%s1649_s7 + $0x60] sm:$0xff] (!%p352_p10)   ;;  %v1417_v49 = vld [vmem:[%s1649_s7 + $0x68] sm:$0xff] (!%p352_p10)  }
  0x39   : > { %1265 = vmatprep.subr.bf16.mxu0 %v1409_v40  ;;  %v1414_v45 = vld [vmem:[%s1649_s7 + $0x18] sm:$0xff]   ;;  %v1421_v47 = vld [vmem:[%s1649_s7 + $0x80] sm:$0xff]   ;;  %v1427_v50 = vld [vmem:[%s1649_s7 + $0x88] sm:$0xff]   ;;  %s397_s10 = scalar_select %p396_p11, %s1482_s14, 1 }
  0x3a   : > { %v1416_v48 = vld [vmem:[%s1649_s7 + $0x20] sm:$0xff]   ;;  %1331 = vmatpush3.bf16.msra.mxu1 %v1421_v47  ;;  %v1418_v52 = vld [vmem:[%s1649_s7 + $0x28] sm:$0xff]   ;;  %v1419_v53 = vld [vmem:[%s1649_s7 + $0x70] sm:$0xff]   ;;  %s1212_s12 = sshll.u32 (%p1549_p6), %s1482_s14, 2 }
  0x3b   : > { %1332 = vmatprep.subr.bf16.mxu1 %v1492_v36  ;;  %v1420_v54 = vld [vmem:[%s1649_s7 + $0x30] sm:$0xff]   ;;  %v1422_v55 = vld [vmem:[%s1649_s7 + $0x78] sm:$0xff]   ;;  %s398_s19 = scalar_lea.vmem %s1813_s2, %s397_s10  ;;  %s966_s25 = scalar_lea.vmem (%p1549_p6), %s1814_s3, %s1212_s12 }
  0x3c   : > { %1266 = vmatpush3.bf16.msra.mxu0 %v1410_v41  ;;  %v1423_v56 = vld [vmem:[%s1649_s7 + $0x38] sm:$0xff]   ;;  %v1441_v4 = vld [vmem:[%s1811_s0 + $0x64] ss:$12 sps:$4 sm:$0xff]   ;;  %v1751_v23 = vld [vmem:[%s398_s19] ss:$0 sm:$0xff] }
  0x3d   : > { %1267 = vmatprep.subr.bf16.mxu0 %v1411_v42  ;;  %v1437_v1 = vld [vmem:[%s1811_s0 + $0x4c] ss:$12 sps:$4 sm:$0xff]   ;;  %v1444_v2 = vld [vmem:[%s1811_s0 + $0x68] ss:$12 sps:$4 sm:$0xff]  }
  0x3e   : > { %1333 = vmatpush3.bf16.msra.mxu1 %v1427_v50  ;;  %v1439_v3 = vld [vmem:[%s1811_s0 + $0x48] ss:$12 sps:$4 sm:$0xff]   ;;  %v1448_v5 = vld [vmem:[%s1811_s0 + $0x80] ss:$12 sps:$4 sm:$0xff]   ;;  %v1451_v8 = vld [vmem:[%s1811_s0 + $0x98] ss:$0 sps:$4 sm:$0xff]  }
  0x3f   : > { %v1443_v6 = vld [vmem:[%s1811_s0 + $0x60] ss:$12 sps:$4 sm:$0xff]   ;;  %v1445_v7 = vld [vmem:[%s1811_s0 + $0x7c] ss:$12 sps:$4 sm:$0xff]   ;;  %v1447_v10 = vld [vmem:[%s1811_s0 + $0x78] ss:$12 sps:$4 sm:$0xff]  }
  0x40   : > { %1268 = vmatpush3.bf16.msra.mxu0 %v1412_v43 }
  0x41   : > { %1269 = vmatprep.subr.bf16.mxu0 %v1413_v44  ;;  %1335 = vmatmul.mubr.msk.bf16.vlgmr.msra.gmra.mrb[0].mxu1 %vm678_vm1, %v1428_v51 }
  0x42   : > { %1338 = vmatprep.mubr.msk.bf16.mxu1 %vm1493_vm0, %v1492_v36 }
  0x44   : > { %1270 = vmatpush3.bf16.msra.mxu0 %v1414_v45 }
  0x45   : > { %1271 = vmatprep.subr.bf16.mxu0 %v1415_v46 }
  0x48   : > { %1272 = vmatpush3.bf16.msra.mxu0 %v1416_v48 }
  0x49   : > { %1273 = vmatprep.subr.bf16.mxu0 %v1417_v49  ;;  %1339 = vmatmul.mubr.msk.bf16.gmra.mrb[4].mxu1 %vm678_vm1, %v1432_v57 }
  0x4a   : > { %1342 = vmatprep.mubr.msk.bf16.mxu1 %vm1493_vm0, %v1492_v36 }
  0x4c   : > { %1274 = vmatpush3.bf16.msra.mxu0 %v1418_v52 }
  0x4d   : > { %1275 = vmatprep.subr.bf16.mxu0 %v1419_v53 }
  0x50   : > { %1276 = vmatpush3.bf16.msra.mxu0 %v1420_v54 }
  0x51   : > { %1277 = vmatprep.subr.bf16.mxu0 %v1422_v55  ;;  %1343 = vmatmul.mubr.msk.bf16.gmra.mrb[8].mxu1 %vm678_vm1, %v1436_v60 }
  0x52   : > { %1346 = vmatprep.mubr.msk.bf16.mxu1 %vm1493_vm0, %v1492_v36 }
  0x54   : > { %1278 = vmatpush3.bf16.msra.mxu0 %v1423_v56 }
  0x57   : > { %733 = vmatmul.mubr.bf16.vlgmr.msra.gmra.mrb[0].mxu0 %v1424_v58 }
  0x58   : > { %740 = vmatprep.mubr.bf16.mxu0 %v1429_v59 }
  0x59   : > { %1347 = vmatmul.mubr.msk.bf16.gmra.mrb[12].mxu1 %vm678_vm1, %v1440_v63 }
  0x5a   : > { %1350 = vmatprep.mubr.msk.bf16.mxu1 %vm1493_vm0, %v1492_v36 }
  0x5f   : > { %741 = vmatmul.mubr.bf16.gmra.mrb[4].mxu0 %v1431_v61 }
  0x60   : > { %748 = vmatprep.mubr.bf16.mxu0 %v1433_v62 }
  0x61   : > { %1351 = vmatmul.mubr.msk.bf16.gmra.mrb[16].mxu1 %vm678_vm1, %v1444_v2 }
  0x62   : > { %1354 = vmatprep.mubr.msk.bf16.mxu1 %vm1493_vm0, %v1492_v36 }
  0x67   : > { %749 = vmatmul.mubr.bf16.gmra.mrb[8].mxu0 %v1435_v0 }
  0x68   : > { %756 = vmatprep.mubr.bf16.mxu0 %v1437_v1 }
  0x69   : > { %1355 = vmatmul.mubr.msk.bf16.gmra.mrb[20].mxu1 %vm678_vm1, %v1448_v5 }
  0x6a   : > { %1358 = vmatprep.mubr.msk.bf16.mxu1 %vm1493_vm0, %v1492_v36 }
  0x6f   : > { %757 = vmatmul.mubr.bf16.gmra.mrb[12].mxu0 %v1439_v3 }
  0x70   : > { %764 = vmatprep.mubr.bf16.mxu0 %v1441_v4 }
  0x71   : > { %1359 = vmatmul.mubr.msk.bf16.gmra.mrb[24].mxu1 %vm678_vm1, %v1451_v8 }
  0x77   : > { %765 = vmatmul.mubr.bf16.gmra.mrb[16].mxu0 %v1443_v6 }
  0x78   : > { %772 = vmatprep.mubr.bf16.mxu0 %v1445_v7 }
  0x7f   : > { %773 = vmatmul.mubr.bf16.gmra.mrb[20].mxu0 %v1447_v10 }
  0x80   : > { %780 = vmatprep.mubr.bf16.mxu0 %v1172_v11 }
  0x87   : > { %781 = vmatmul.mubr.bf16.gmra.mrb[24].mxu0 %v1171_v12 }
 0x114   : > { %v822_v13 = vpop.f32.mrb[0].mxu1 }
 0x115   : > { %v1336_v14 = vpop.f32.mrb[1].mxu1 }
 0x116   : > { %v825_v15 = vpop.f32.mrb[2].mxu1 }
 0x117   : > { %v1337_v16 = vpop.f32.mrb[3].mxu1 }
 0x11c   : > { %v830_v17 = vpop.f32.mrb[4].mxu1 }
 0x11d   : > { %v1340_v18 = vpop.f32.mrb[5].mxu1 }
 0x11e   : > { %v833_v19 = vpop.f32.mrb[6].mxu1 }
 0x11f   : > { %v1341_v21 = vpop.f32.mrb[7].mxu1 }
 0x124   : > { %v838_v29 = vpop.f32.mrb[8].mxu1 }
 0x125   : > { %v1344_v32 = vpop.f32.mrb[9].mxu1 }
 0x126   : > { %v841_v33 = vpop.f32.mrb[10].mxu1 }
 0x127   : > { %v1345_v36 = vpop.f32.mrb[11].mxu1 }
 0x12a   : > { %v1279_v20 = vpop.f32.mrb[0].mxu0 }
 0x12b   : > { %v1280_v22 = vpop.f32.mrb[1].mxu0 }
 0x12c   : > { %v1281_v24 = vadd.f32 %v1280_v22, %v1279_v20  ;;  %v1282_v25 = vpop.f32.mrb[2].mxu0  ;;  %v846_v46 = vpop.f32.mrb[12].mxu1 }
 0x12d   : > { %v1283_v26 = vpop.f32.mrb[3].mxu0  ;;  %v1348_v49 = vpop.f32.mrb[13].mxu1 }
 0x12e   : > { %v735_v27 = vadd.f32 %v1281_v24, %v1751_v23  ;;  %v1284_v28 = vadd.f32 %v1283_v26, %v1282_v25  ;;  %v849_v50 = vpop.f32.mrb[14].mxu1 }
 0x12f   : > { %v1349_v53 = vpop.f32.mrb[15].mxu1 }
 0x130   : > { %v823_v30 = vadd.f32 %v822_v13, %v735_v27  ;;  %v738_v31 = vadd.f32 %v1284_v28, %v1751_v23 }
 0x132   : > { %v826_v34 = vadd.f32 %v825_v15, %v738_v31  ;;  %v1285_v35 = vpop.f32.mrb[4].mxu0  ;;  %v876_v38 = vmax.f32 %v823_v30, 0.0 }
 0x133   : > { %v1286_v37 = vpop.f32.mrb[5].mxu0 }
 0x134   : > { %v877_v39 = vmax.f32 %v826_v34, 0.0  ;;  %v1287_v40 = vadd.f32 %v1286_v37, %v1285_v35  ;;  %v1288_v41 = vpop.f32.mrb[6].mxu0  ;;  %v854_v63 = vpop.f32.mrb[16].mxu1 }
 0x135   : > { %v1289_v42 = vpop.f32.mrb[7].mxu0  ;;  %v1352_v2 = vpop.f32.mrb[17].mxu1 }
 0x136   : > { %v1231_v43 = vpack.c.bf16 %v877_v39, %v876_v38  ;;  %v743_v44 = vadd.f32 %v1287_v40, %v1751_v23  ;;  %v1290_v45 = vadd.f32 %v1289_v42, %v1288_v41  ;;  %v857_v3 = vpop.f32.mrb[18].mxu1 }
 0x137   : > { %v1353_v6 = vpop.f32.mrb[19].mxu1 }
 0x138   : > { %1232 = vst [vmem:[%s1758_s23] sm:$0xff] %v1231_v43   ;;  %v831_v47 = vadd.f32 %v830_v17, %v743_v44  ;;  %v746_v48 = vadd.f32 %v1290_v45, %v1751_v23 }
 0x13a   : > { %v834_v51 = vadd.f32 %v833_v19, %v746_v48  ;;  %v1291_v52 = vpop.f32.mrb[8].mxu0  ;;  %v878_v55 = vmax.f32 %v831_v47, 0.0 }
 0x13b   : > { %v1292_v54 = vpop.f32.mrb[9].mxu0 }
 0x13c   : > { %v879_v56 = vmax.f32 %v834_v51, 0.0  ;;  %v1293_v57 = vadd.f32 %v1292_v54, %v1291_v52  ;;  %v1294_v58 = vpop.f32.mrb[10].mxu0  ;;  %v862_v16 = vpop.f32.mrb[20].mxu1 }
 0x13d   : > { %v1295_v59 = vpop.f32.mrb[11].mxu0  ;;  %v1356_v19 = vpop.f32.mrb[21].mxu1 }
 0x13e   : > { %v1236_v60 = vpack.c.bf16 %v879_v56, %v878_v55  ;;  %v751_v61 = vadd.f32 %v1293_v57, %v1751_v23  ;;  %v1296_v62 = vadd.f32 %v1295_v59, %v1294_v58  ;;  %v865_v20 = vpop.f32.mrb[22].mxu1 }
 0x13f   : > { %v1357_v24 = vpop.f32.mrb[23].mxu1  ;;  %v982_v2 = vld [vmem:[%s1758_s23] sm:$0xf] (%p1549_p6) }
 0x140   : > { %1258 = vst [vmem:[%s1758_s23 + $0x8] sm:$0xff] %v1236_v60   ;;  %v839_v0 = vadd.f32 %v838_v29, %v751_v61  ;;  %v754_v1 = vadd.f32 %v1296_v62, %v1751_v23  ;;  %983 = vst [vmem:[%s966_s25] sm:$0xf] (%p1549_p6), %v982_v2 }
 0x142   : > { %v842_v4 = vadd.f32 %v841_v33, %v754_v1  ;;  %v1297_v5 = vpop.f32.mrb[12].mxu0  ;;  %v880_v8 = vmax.f32 %v839_v0, 0.0 }
 0x143   : > { %v1298_v7 = vpop.f32.mrb[13].mxu0 }
 0x144   : > { %v881_v9 = vmax.f32 %v842_v4, 0.0  ;;  %v1299_v10 = vadd.f32 %v1298_v7, %v1297_v5  ;;  %v1300_v11 = vpop.f32.mrb[14].mxu0  ;;  %v870_v34 = vpop.f32.mrb[24].mxu1 }
 0x145   : > { %v1301_v12 = vpop.f32.mrb[15].mxu0  ;;  %v1360_v37 = vpop.f32.mrb[25].mxu1 }
 0x146   : > { %v1241_v13 = vpack.c.bf16 %v881_v9, %v880_v8  ;;  %v759_v14 = vadd.f32 %v1299_v10, %v1751_v23  ;;  %v1302_v15 = vadd.f32 %v1301_v12, %v1300_v11  ;;  %v873_v38 = vpop.f32.mrb[26].mxu1 }
 0x147   : > { %v1361_v41 = vpop.f32.mrb[27].mxu1  ;;  %v988_v4 = vld [vmem:[%s1758_s23 + $0xc] sm:$0xf] (%p1549_p6) }
 0x148   : > { %1259 = vst [vmem:[%s1758_s23 + $0x10] sm:$0xff] %v1241_v13   ;;  %v847_v17 = vadd.f32 %v846_v46, %v759_v14  ;;  %v762_v18 = vadd.f32 %v1302_v15, %v1751_v23  ;;  %989 = vst [vmem:[%s966_s25 + $0x18] sm:$0xf] (%p1549_p6), %v988_v4 }
 0x14a   : > { %v850_v21 = vadd.f32 %v849_v50, %v762_v18  ;;  %v1303_v22 = vpop.f32.mrb[16].mxu0  ;;  %v882_v26 = vmax.f32 %v847_v17, 0.0 }
 0x14b   : > { %v1304_v25 = vpop.f32.mrb[17].mxu0 }
 0x14c   : > { %v883_v27 = vmax.f32 %v850_v21, 0.0  ;;  %v1305_v28 = vadd.f32 %v1304_v25, %v1303_v22  ;;  %v1306_v29 = vpop.f32.mrb[18].mxu0 }
 0x14d   : > { %v1307_v30 = vpop.f32.mrb[19].mxu0 }
 0x14e   : > { %v1246_v31 = vpack.c.bf16 %v883_v27, %v882_v26  ;;  %v767_v32 = vadd.f32 %v1305_v28, %v1751_v23  ;;  %v1308_v33 = vadd.f32 %v1307_v30, %v1306_v29 }
 0x14f   : > { %v990_v5 = vld [vmem:[%s1758_s23 + $0x10] sm:$0xf] (%p1549_p6)  ;;  %v992_v6 = vld [vmem:[%s1758_s23 + $0x14] sm:$0xf] (%p1549_p6) }
 0x150   : > { %1260 = vst [vmem:[%s1758_s23 + $0x18] sm:$0xff] %v1246_v31   ;;  %v855_v35 = vadd.f32 %v854_v63, %v767_v32  ;;  %v770_v36 = vadd.f32 %v1308_v33, %v1751_v23  ;;  %991 = vst [vmem:[%s966_s25 + $0x20] sm:$0xf] (%p1549_p6), %v990_v5 }
 0x151   : > { %993 = vst [vmem:[%s966_s25 + $0x28] sm:$0xf] (%p1549_p6), %v992_v6 }
 0x152   : > { %v858_v39 = vadd.f32 %v857_v3, %v770_v36  ;;  %v1309_v40 = vpop.f32.mrb[20].mxu0  ;;  %v884_v43 = vmax.f32 %v855_v35, 0.0  ;;  %v986_v3 = vld [vmem:[%s1758_s23 + $0x8] sm:$0xf] (%p1549_p6) }
 0x153   : > { %v1310_v42 = vpop.f32.mrb[21].mxu0  ;;  %987 = vst [vmem:[%s966_s25 + $0x10] sm:$0xf] (%p1549_p6), %v986_v3 }
 0x154   : > { %v885_v44 = vmax.f32 %v858_v39, 0.0  ;;  %v1311_v45 = vadd.f32 %v1310_v42, %v1309_v40  ;;  %v1312_v46 = vpop.f32.mrb[22].mxu0 }
 0x155   : > { %v1313_v47 = vpop.f32.mrb[23].mxu0 }
 0x156   : > { %v1251_v48 = vpack.c.bf16 %v885_v44, %v884_v43  ;;  %v775_v49 = vadd.f32 %v1311_v45, %v1751_v23  ;;  %v1314_v50 = vadd.f32 %v1313_v47, %v1312_v46 }
 0x157   : > { %v994_v7 = vld [vmem:[%s1758_s23 + $0x18] sm:$0xf] (%p1549_p6)  ;;  %v996_v8 = vld [vmem:[%s1758_s23 + $0x1c] sm:$0xf] (%p1549_p6) }
 0x158   : > { %1261 = vst [vmem:[%s1758_s23 + $0x20] sm:$0xff] %v1251_v48   ;;  %v863_v51 = vadd.f32 %v862_v16, %v775_v49  ;;  %v778_v52 = vadd.f32 %v1314_v50, %v1751_v23  ;;  %995 = vst [vmem:[%s966_s25 + $0x30] sm:$0xf] (%p1549_p6), %v994_v7 }
 0x159   : > { %997 = vst [vmem:[%s966_s25 + $0x38] sm:$0xf] (%p1549_p6), %v996_v8 }
 0x15a   : > { %v866_v53 = vadd.f32 %v865_v20, %v778_v52  ;;  %v1315_v54 = vpop.f32.mrb[24].mxu0  ;;  %v886_v56 = vmax.f32 %v863_v51, 0.0 }
 0x15b   : > { %v1316_v55 = vpop.f32.mrb[25].mxu0 }
 0x15c   : > { %v887_v57 = vmax.f32 %v866_v53, 0.0  ;;  %v1317_v58 = vadd.f32 %v1316_v55, %v1315_v54  ;;  %v1318_v59 = vpop.f32.mrb[26].mxu0 }
 0x15d   : > { %v1319_v60 = vpop.f32.mrb[27].mxu0 }
 0x15e   : > { %v1256_v61 = vpack.c.bf16 %v887_v57, %v886_v56  ;;  %v783_v62 = vadd.f32 %v1317_v58, %v1751_v23  ;;  %v984_v23 = vld [vmem:[%s1758_s23 + $0x4] sm:$0xf] (%p1549_p6) }
 0x15f   : > { %985 = vst [vmem:[%s966_s25 + $0x8] sm:$0xf] (%p1549_p6), %v984_v23  ;;  %v998_v9 = vld [vmem:[%s1758_s23 + $0x20] sm:$0xf] (%p1549_p6)  ;;  %v1000_v10 = vld [vmem:[%s1758_s23 + $0x24] sm:$0xf] (%p1549_p6) }
 0x160   : > { %1262 = vst [vmem:[%s1758_s23 + $0x28] sm:$0xff] %v1256_v61   ;;  %v871_v63 = vadd.f32 %v870_v34, %v783_v62  ;;  %961 = sbr.rel (!%p1549_p6) target bundleno = 367 (0x16f), region = 77  ;;  %999 = vst [vmem:[%s966_s25 + $0x40] sm:$0xf] (%p1549_p6), %v998_v9 }
 0x161   : > { %1001 = vst [vmem:[%s966_s25 + $0x48] sm:$0xf] (%p1549_p6), %v1000_v10 }
 0x162   : > { %v888_v0 = vmax.f32 %v871_v63, 0.0 }
 0x164   : > { %v1227_v1 = vpack.c.bf16 %v888_v0, %v888_v0 }
 0x166   : > { %954 = vst [vmem:[%s1758_s23 + $0x30] sm:$0xf] %v1227_v1 }
 0x167   : > { %v1002_v11 = vld [vmem:[%s1758_s23 + $0x28] sm:$0xf]  ;;  %v1004_v12 = vld [vmem:[%s1758_s23 + $0x2c] sm:$0xf] }
 0x168   : > { %1003 = vst [vmem:[%s966_s25 + $0x50] sm:$0xf] %v1002_v11  ;;  %1005 = vst [vmem:[%s966_s25 + $0x58] sm:$0xf] %v1004_v12 }
 0x16d   : > { %v1006_v13 = vld [vmem:[%s1758_s23 + $0x30] sm:$0xf] }
 0x16e   : > { %1007 = vst [vmem:[%s966_s25 + $0x60] sm:$0xf] %v1006_v13 }
 0x16f PF: > { %s13_s16 = sadd.s32 1, %s1490_s16   ;;  %s1816_s12 = smov %s1478_s13 }
 0x170   : > { %p10_p12 = scmp.ge.s32.totalorder %s13_s16, 4   ;;  %s1817_s13 = smov %s1554_s22 }
 0x171   : > { %s1818_s14 = smov %s1486_s15  ;;  %s1819_s15 = smov %s1821_s17 }
 0x172   :  { %12 = sbr.rel (!%p10_p12) target bundleno = 3 (0x3), region = 155 }

// kernel: squeezenet_forward.26
= control target key start
LH: loop header
LB: loop body
LE: loop exit
PB: predicated region body
PF: predicated region fallthrough
CT: control target
= control target key end

     0   :  { %vm234_vm0 = vcmask 257024   ;;  %s423_s1 = inlined_call_operand.vmem [shape: bf16[256,32], index: 1, kind: input, shape index: {}]   ;;  %s424_s0 = inlined_call_operand.vmem [shape: bf16[18,256], index: 0, kind: input, shape index: {}]   ;;  %s425_s2 = inlined_call_operand.vmem [shape: f32[1,32], index: 2, kind: input, shape index: {}]   ;;  %s426_s3 = inlined_call_operand.vmem [shape: bf16[18,32], index: 3, kind: output, shape index: {}]  }
   0x1   :  { %v313_v0 = vld [vmem:[%s423_s1 + $0x40] sm:$0xff]   ;;  %v315_v2 = vld [vmem:[%s423_s1 + $0x48] sm:$0xff]   ;;  %v317_v4 = vld [vmem:[%s423_s1 + $0x50] sm:$0xff]  }
   0x2   :  { %v314_v1 = vld [vmem:[%s423_s1] sm:$0xff]   ;;  %269 = vmatprep.subr.bf16.mxu0 %v313_v0  ;;  %297 = vmatprep.subr.bf16.mxu1 %v313_v0  ;;  %v316_v3 = vld [vmem:[%s423_s1 + $0x8] sm:$0xff]   ;;  %v318_v5 = vld [vmem:[%s423_s1 + $0x10] sm:$0xff]  }
   0x3   :  { %270 = vmatpush3.bf16.msra.mxu0 %v314_v1  ;;  %305 = vmatpush3.bf16.msra.mxu1 %v314_v1  ;;  %v319_v6 = vld [vmem:[%s423_s1 + $0x58] sm:$0xff]   ;;  %v321_v8 = vld [vmem:[%s423_s1 + $0x60] sm:$0xff]   ;;  %v323_v10 = vld [vmem:[%s423_s1 + $0x68] sm:$0xff]  }
   0x4   :  { %271 = vmatprep.subr.bf16.mxu0 %v315_v2  ;;  %298 = vmatprep.subr.bf16.mxu1 %v315_v2  ;;  %v320_v7 = vld [vmem:[%s423_s1 + $0x18] sm:$0xff]   ;;  %v322_v9 = vld [vmem:[%s423_s1 + $0x20] sm:$0xff]   ;;  %v17_v12 = vld [vmem:[%s424_s0 + $0x10] sm:$0xff] }
   0x5   :  { %v331_v11 = vld [vmem:[%s424_s0 + $0x4] ss:$8 sps:$4 sm:$0xff]   ;;  %v246_v13 = vcombine.high %v17_v12, %v17_v12  ;;  %v325_v15 = vld [vmem:[%s423_s1 + $0x70] sm:$0xff]   ;;  %v327_v17 = vld [vmem:[%s423_s1 + $0x78] sm:$0xff]   ;;  %v245_v20 = vcombine.low %v17_v12, %v17_v12 }
   0x6   :  { %v324_v14 = vld [vmem:[%s423_s1 + $0x28] sm:$0xff]   ;;  %202 = vmatprep.mubr.bf16.mxu0 %v331_v11  ;;  %v326_v16 = vld [vmem:[%s423_s1 + $0x30] sm:$0xff]   ;;  %v328_v18 = vld [vmem:[%s423_s1 + $0x38] sm:$0xff]  }
   0x7   :  { %272 = vmatpush3.bf16.msra.mxu0 %v316_v3  ;;  %306 = vmatpush3.bf16.msra.mxu1 %v316_v3  ;;  %v329_v19 = vld [vmem:[%s424_s0] ss:$8 sps:$4 sm:$0xff]  }
   0x8   :  { %273 = vmatprep.subr.bf16.mxu0 %v317_v4  ;;  %299 = vmatprep.subr.bf16.mxu1 %v317_v4  ;;  %v242_v23 = vld [vmem:[%s425_s2] ss:$0 sm:$0xff] }
   0x9   :  { %210 = vmatprep.mubr.bf16.mxu1 %v246_v13 }
   0xb   :  { %274 = vmatpush3.bf16.msra.mxu0 %v318_v5  ;;  %307 = vmatpush3.bf16.msra.mxu1 %v318_v5 }
   0xc   :  { %275 = vmatprep.subr.bf16.mxu0 %v319_v6  ;;  %300 = vmatprep.subr.bf16.mxu1 %v319_v6 }
   0xf   :  { %276 = vmatpush3.bf16.msra.mxu0 %v320_v7  ;;  %308 = vmatpush3.bf16.msra.mxu1 %v320_v7 }
  0x10   :  { %277 = vmatprep.subr.bf16.mxu0 %v321_v8  ;;  %301 = vmatprep.subr.bf16.mxu1 %v321_v8 }
  0x13   :  { %278 = vmatpush3.bf16.msra.mxu0 %v322_v9  ;;  %309 = vmatpush3.bf16.msra.mxu1 %v322_v9 }
  0x14   :  { %279 = vmatprep.subr.bf16.mxu0 %v323_v10  ;;  %302 = vmatprep.subr.bf16.mxu1 %v323_v10 }
  0x17   :  { %280 = vmatpush3.bf16.msra.mxu0 %v324_v14  ;;  %310 = vmatpush3.bf16.msra.mxu1 %v324_v14 }
  0x18   :  { %281 = vmatprep.subr.bf16.mxu0 %v325_v15  ;;  %303 = vmatprep.subr.bf16.mxu1 %v325_v15 }
  0x1b   :  { %282 = vmatpush3.bf16.msra.mxu0 %v326_v16  ;;  %311 = vmatpush3.bf16.msra.mxu1 %v326_v16 }
  0x1c   :  { %283 = vmatprep.subr.bf16.mxu0 %v327_v17  ;;  %304 = vmatprep.subr.bf16.mxu1 %v327_v17 }
  0x1f   :  { %284 = vmatpush3.bf16.msra.mxu0 %v328_v18  ;;  %312 = vmatpush3.bf16.msra.mxu1 %v328_v18 }
  0x22   :  { %203 = vmatmul.mubr.bf16.vlgmr.msra.gmra.mrb[0].mxu0 %v329_v19  ;;  %211 = vmatmul.mubr.bf16.vlgmr.msra.gmra.mrb[0].mxu1 %v245_v20 }
  0xf5   :  { %v285_v21 = vpop.f32.mrb[0].mxu0  ;;  %v291_v22 = vpop.f32.mrb[0].mxu1 }
  0xf6   :  { %v286_v24 = vpop.f32.mrb[1].mxu0  ;;  %v292_v25 = vpop.f32.mrb[1].mxu1 }
  0xf7   :  { %v287_v26 = vadd.f32 %v286_v24, %v285_v21  ;;  %v293_v27 = vadd.f32 %v292_v25, %v291_v22  ;;  %v288_v28 = vpop.f32.mrb[2].mxu0  ;;  %v294_v29 = vpop.f32.mrb[2].mxu1 }
  0xf8   :  { %v289_v30 = vpop.f32.mrb[3].mxu0  ;;  %v295_v31 = vpop.f32.mrb[3].mxu1 }
  0xf9   :  { %v205_v32 = vadd.f32 %v287_v26, %v242_v23  ;;  %v213_v33 = vadd.f32 %v293_v27, %v242_v23  ;;  %v290_v34 = vadd.f32 %v289_v30, %v288_v28 }
  0xfb   :  { %v218_v35 = vmax.f32 %v205_v32, 0.0  ;;  %v220_v36 = vmax.f32 %v213_v33, 0.0  ;;  %v208_v37 = vadd.f32 %v290_v34, %v242_v23 }
  0xfd   :  { %v266_v38 = vpack.c.bf16 %v218_v35, %v218_v35  ;;  %v268_v39 = vpack.c.bf16 %v220_v36, %v220_v36  ;;  %v219_v40 = vmax.f32 %v208_v37, 0.0 }
  0xff   :  { %235 = vst.msk [vmem:[%s426_s3] sm:$0xf] %vm234_vm0, %v266_v38  ;;  %237 = vst.msk [vmem:[%s426_s3 + $0x8] sm:$0xf] %vm234_vm0, %v268_v39  ;;  %v267_v41 = vpack.c.bf16 %v219_v40, %v219_v40 }
 0x101   :  { %236 = vst.msk [vmem:[%s426_s3 + $0x4] sm:$0xf] %vm234_vm0, %v267_v41 }

// kernel: squeezenet_forward.27
= control target key start
LH: loop header
LB: loop body
LE: loop exit
PB: predicated region body
PF: predicated region fallthrough
CT: control target
= control target key end

     0   :  { %s1071_s12 = smov 0   ;;  %s1073_s13 = smov 0   ;;  %s1265_s0 = inlined_call_operand.vmem [shape: bf16[18,288], index: 0, kind: input, shape index: {}]   ;;  %s1266_s1 = inlined_call_operand.vmem [shape: bf16[288,256], index: 1, kind: input, shape index: {}]   ;;  %s1267_s2 = inlined_call_operand.vmem [shape: f32[1,256], index: 2, kind: input, shape index: {}]   ;;  %s1268_s3 = inlined_call_operand.vmem [shape: bf16[18,256], index: 3, kind: output, shape index: {}]  }
   0x1   :  { %s1075_s14 = smov 0   ;;  %s1077_s15 = smov 0  }
   0x2   :  { %s1079_s16 = smov 0  }
   0x3 LB: > { %s22_s17 = sadd.s32 1, %s1045_s15  ;;  %s855_s18 = sadd.s32 4294967295, %s1049_s16   ;;  %s1049_s16 = sphi %s1079_s16, %s13_s16   ;;  %s1045_s15 = sphi %s1077_s15, %s1273_s15   ;;  %s1041_s14 = sphi %s1075_s14, %s1272_s14   ;;  %s1037_s13 = sphi %s1073_s13, %s1271_s13   ;;  %s1033_s12 = sphi %s1071_s12, %s1270_s12  }
   0x4   : > { %p23_p0 = scmp.ge.s32.totalorder %s22_s17, 2  ;;  %p65_p1 = scmp.ne.s32.totalorder %s1037_s13, %s1033_s12 }
   0x5   : > { %p66_p2 = scmp.eq.s32.totalorder %s1049_s16, 0  ;;  %p123_p4 = scmp.eq.s32.totalorder %s855_s18, 1 }
   0x6   : > { %s1275_s17 = smov (%p23_p0, %s22_s17), 0  ;;  %s58_s20 = sadd.s32 1, %s1037_s13 }
   0x7   : > { %p67_p3 = por %p66_p2, %p65_p1  ;;  %s55_s19 = ssub.s32 %s1045_s15, %s1275_s17 }
   0x8   : > { %p56_p5 = scmp.eq.s32.totalorder %s55_s19, 0  ;;  %p1106_p6 = por %p123_p4, %p65_p1 }
   0x9   : > { %p859_p7 = scmp.ge.s32.totalorder %s1049_s16, 2 }
   0xa   : > { %s1111_s22 = scalar_select %p56_p5, %s1037_s13, %s58_s20  }
   0xb   : > { %155 = sbr.rel (%p859_p7) target bundleno = 46 (0x2e), region = 20 }
  0x12   : > { %158 = sbr.rel (!%p67_p3) target bundleno = 46 (0x2e), region = 24  ;;  %s160_s23 = sand.u32 (%p67_p3), 1, %s1037_s13  }
  0x13   : > { %s860_s24 = sshll.u32 (%p67_p3), %s1045_s15, 2  ;;  %s943_s25 = smul.u32 (%p67_p3), 144, %s160_s23 }
  0x14   : > { %s1119_s28 = scalar_lea.vmem (%p67_p3), %s1266_s1, %s860_s24 }
  0x15   : > { %v180_v0 = vld [vmem:[%s1119_s28] sm:$0xf] (%p67_p3)  ;;  %v182_v1 = vld [vmem:[%s1119_s28 + $0x8] sm:$0xf] (%p67_p3)  ;;  %v184_v2 = vld [vmem:[%s1119_s28 + $0x10] sm:$0xf] (%p67_p3) }
  0x16   : > { %v186_v3 = vld [vmem:[%s1119_s28 + $0x18] sm:$0xf] (%p67_p3)  ;;  %v188_v4 = vld [vmem:[%s1119_s28 + $0x20] sm:$0xf] (%p67_p3)  ;;  %s1126_s29 = scalar_lea.vmem (%p67_p3), [#allocation2], %s943_s25 }
  0x17   : > { %181 = vst [vmem:[%s1126_s29] sm:$0xf] (%p67_p3), %v180_v0  ;;  %183 = vst [vmem:[%s1126_s29 + $0x4] sm:$0xf] (%p67_p3), %v182_v1  ;;  %v190_v5 = vld [vmem:[%s1119_s28 + $0x28] sm:$0xf] (%p67_p3) }
  0x18   : > { %185 = vst [vmem:[%s1126_s29 + $0x8] sm:$0xf] (%p67_p3), %v184_v2  ;;  %187 = vst [vmem:[%s1126_s29 + $0xc] sm:$0xf] (%p67_p3), %v186_v3  ;;  %v192_v6 = vld [vmem:[%s1119_s28 + $0x30] sm:$0xf] (%p67_p3) }
  0x19   : > { %189 = vst [vmem:[%s1126_s29 + $0x10] sm:$0xf] %v188_v4  ;;  %v194_v7 = vld [vmem:[%s1119_s28 + $0x38] sm:$0xf]  ;;  %191 = vst [vmem:[%s1126_s29 + $0x14] sm:$0xf] %v190_v5 }
  0x1a   : > { %193 = vst [vmem:[%s1126_s29 + $0x18] sm:$0xf] %v192_v6  ;;  %195 = vst [vmem:[%s1126_s29 + $0x1c] sm:$0xf] %v194_v7  ;;  %v196_v8 = vld [vmem:[%s1119_s28 + $0x40] sm:$0xf] }
  0x1b   : > { %v198_v9 = vld [vmem:[%s1119_s28 + $0x48] sm:$0xf]  ;;  %v200_v10 = vld [vmem:[%s1119_s28 + $0x50] sm:$0xf]  ;;  %197 = vst [vmem:[%s1126_s29 + $0x20] sm:$0xf] %v196_v8 }
  0x1c   : > { %199 = vst [vmem:[%s1126_s29 + $0x24] sm:$0xf] %v198_v9  ;;  %201 = vst [vmem:[%s1126_s29 + $0x28] sm:$0xf] %v200_v10  ;;  %v202_v11 = vld [vmem:[%s1119_s28 + $0x58] sm:$0xf] }
  0x1d   : > { %v204_v12 = vld [vmem:[%s1119_s28 + $0x60] sm:$0xf]  ;;  %v206_v13 = vld [vmem:[%s1119_s28 + $0x68] sm:$0xf]  ;;  %203 = vst [vmem:[%s1126_s29 + $0x2c] sm:$0xf] %v202_v11 }
  0x1e   : > { %205 = vst [vmem:[%s1126_s29 + $0x30] sm:$0xf] %v204_v12  ;;  %207 = vst [vmem:[%s1126_s29 + $0x34] sm:$0xf] %v206_v13  ;;  %v208_v14 = vld [vmem:[%s1119_s28 + $0x70] sm:$0xf] }
  0x1f   : > { %v210_v15 = vld [vmem:[%s1119_s28 + $0x78] sm:$0xf]  ;;  %v212_v16 = vld [vmem:[%s1119_s28 + $0x80] sm:$0xf]  ;;  %209 = vst [vmem:[%s1126_s29 + $0x38] sm:$0xf] %v208_v14 }
  0x20   : > { %211 = vst [vmem:[%s1126_s29 + $0x3c] sm:$0xf] %v210_v15  ;;  %213 = vst [vmem:[%s1126_s29 + $0x40] sm:$0xf] %v212_v16  ;;  %v214_v17 = vld [vmem:[%s1119_s28 + $0x88] sm:$0xf] }
  0x21   : > { %v216_v18 = vld [vmem:[%s1119_s28 + $0x90] sm:$0xf]  ;;  %v218_v19 = vld [vmem:[%s1119_s28 + $0x98] sm:$0xf]  ;;  %215 = vst [vmem:[%s1126_s29 + $0x44] sm:$0xf] %v214_v17 }
  0x22   : > { %217 = vst [vmem:[%s1126_s29 + $0x48] sm:$0xf] %v216_v18  ;;  %219 = vst [vmem:[%s1126_s29 + $0x4c] sm:$0xf] %v218_v19  ;;  %v220_v20 = vld [vmem:[%s1119_s28 + $0xa0] sm:$0xf] }
  0x23   : > { %v222_v21 = vld [vmem:[%s1119_s28 + $0xa8] sm:$0xf]  ;;  %v224_v22 = vld [vmem:[%s1119_s28 + $0xb0] sm:$0xf]  ;;  %221 = vst [vmem:[%s1126_s29 + $0x50] sm:$0xf] %v220_v20 }
  0x24   : > { %223 = vst [vmem:[%s1126_s29 + $0x54] sm:$0xf] %v222_v21  ;;  %225 = vst [vmem:[%s1126_s29 + $0x58] sm:$0xf] %v224_v22  ;;  %v226_v23 = vld [vmem:[%s1119_s28 + $0xb8] sm:$0xf] }
  0x25   : > { %v228_v24 = vld [vmem:[%s1119_s28 + $0xc0] sm:$0xf]  ;;  %v230_v25 = vld [vmem:[%s1119_s28 + $0xc8] sm:$0xf]  ;;  %227 = vst [vmem:[%s1126_s29 + $0x5c] sm:$0xf] %v226_v23 }
  0x26   : > { %229 = vst [vmem:[%s1126_s29 + $0x60] sm:$0xf] %v228_v24  ;;  %231 = vst [vmem:[%s1126_s29 + $0x64] sm:$0xf] %v230_v25  ;;  %v232_v26 = vld [vmem:[%s1119_s28 + $0xd0] sm:$0xf] }
  0x27   : > { %v234_v27 = vld [vmem:[%s1119_s28 + $0xd8] sm:$0xf]  ;;  %v236_v28 = vld [vmem:[%s1119_s28 + $0xe0] sm:$0xf]  ;;  %233 = vst [vmem:[%s1126_s29 + $0x68] sm:$0xf] %v232_v26 }
  0x28   : > { %235 = vst [vmem:[%s1126_s29 + $0x6c] sm:$0xf] %v234_v27  ;;  %237 = vst [vmem:[%s1126_s29 + $0x70] sm:$0xf] %v236_v28  ;;  %v238_v29 = vld [vmem:[%s1119_s28 + $0xe8] sm:$0xf] }
  0x29   : > { %v240_v30 = vld [vmem:[%s1119_s28 + $0xf0] sm:$0xf]  ;;  %v242_v31 = vld [vmem:[%s1119_s28 + $0xf8] sm:$0xf]  ;;  %239 = vst [vmem:[%s1126_s29 + $0x74] sm:$0xf] %v238_v29 }
  0x2a   : > { %241 = vst [vmem:[%s1126_s29 + $0x78] sm:$0xf] %v240_v30  ;;  %243 = vst [vmem:[%s1126_s29 + $0x7c] sm:$0xf] %v242_v31  ;;  %v244_v32 = vld [vmem:[%s1119_s28 + $0x100] sm:$0xf] }
  0x2b   : > { %v246_v33 = vld [vmem:[%s1119_s28 + $0x108] sm:$0xf]  ;;  %v248_v34 = vld [vmem:[%s1119_s28 + $0x110] sm:$0xf]  ;;  %245 = vst [vmem:[%s1126_s29 + $0x80] sm:$0xf] %v244_v32 }
  0x2c   : > { %247 = vst [vmem:[%s1126_s29 + $0x84] sm:$0xf] %v246_v33  ;;  %249 = vst [vmem:[%s1126_s29 + $0x88] sm:$0xf] %v248_v34  ;;  %v250_v35 = vld [vmem:[%s1119_s28 + $0x118] sm:$0xf] }
  0x2d   : > { %251 = vst [vmem:[%s1126_s29 + $0x8c] sm:$0xf] %v250_v35 }
  0x2e PF: > { %p861_p8 = scmp.ge.s32.totalorder %s1049_s16, 1  ;;  %p351_p9 = scmp.lt.s32.totalorder %s1049_s16, 3 }
  0x30   : > { %p352_p10 = pnand %p861_p8, %p351_p9 }
  0x31   : > { %s358_s30 = sand.u32 (!%p352_p10), 1, %s1033_s12   ;;  %v1005_v36 = vld [vmem:[%s1265_s0 + $0x4] ss:$12 sps:$4 sm:$0xff] (!%p352_p10)   ;;  %vm583_vm0 = vcmask (!%p352_p10), 261120   ;;  %v1007_v37 = vld [vmem:[%s1265_s0 + $0x8] ss:$12 sps:$4 sm:$0xff] (!%p352_p10)  }
  0x32   : > { %355 = sbr.rel (%p352_p10) target bundleno = 327 (0x147), region = 69  ;;  %622 = vmatprep.mubr.bf16.mxu0 (!%p352_p10), %v1005_v36  ;;  %939 = vmatprep.mubr.msk.bf16.mxu1 (!%p352_p10), %vm583_vm0, %v1007_v37  ;;  %v1008_v53 = vld [vmem:[%s1265_s0 + $0x20] ss:$0 sps:$4 sm:$0xff] (!%p352_p10)   ;;  %v405_v57 = vld [vmem:[%s1265_s0 + $0x18] sm:$0xff] (!%p352_p10)  ;;  %p396_p11 = scmp.lt.s32.totalorder (!%p352_p10), %s1041_s14, 1 }
  0x33   : > { %s944_s4 = smul.u32 (!%p352_p10), 144, %s358_s30  ;;  %v1003_v58 = vld [vmem:[%s1265_s0] ss:$12 sps:$4 sm:$0xff] (!%p352_p10)   ;;  %v867_v59 = vcombine.high (!%p352_p10), %v405_v57, %v405_v57  ;;  %v866_v60 = vcombine.low (!%p352_p10), %v405_v57, %v405_v57 }
  0x34   : > { %s945_s28 = smul.u32 (!%p352_p10), 12, %s358_s30 }
  0x35   : > { %s1206_s9 = scalar_lea.vmem (!%p352_p10), [#allocation2], %s944_s4 }
  0x36   : > { %v986_v38 = vld [vmem:[%s1206_s9 + $0x40] sm:$0xff] (!%p352_p10)   ;;  %v988_v40 = vld [vmem:[%s1206_s9 + $0x48] sm:$0xff] (!%p352_p10)   ;;  %v990_v42 = vld [vmem:[%s1206_s9 + $0x50] sm:$0xff] (!%p352_p10)   ;;  %s388_s29 = scalar_lea.vmem (!%p352_p10), [#allocation3], %s945_s28 }
  0x37   : > { %v987_v39 = vld [vmem:[%s1206_s9] sm:$0xff] (!%p352_p10)   ;;  %903 = vmatprep.subr.bf16.mxu0 (!%p352_p10), %v986_v38  ;;  %v989_v41 = vld [vmem:[%s1206_s9 + $0x8] sm:$0xff] (!%p352_p10)   ;;  %v991_v43 = vld [vmem:[%s1206_s9 + $0x10] sm:$0xff] (!%p352_p10)  }
  0x38   : > { %904 = vmatpush3.bf16.msra.mxu0 (!%p352_p10), %v987_v39  ;;  %v992_v44 = vld [vmem:[%s1206_s9 + $0x58] sm:$0xff] (!%p352_p10)   ;;  %v994_v46 = vld [vmem:[%s1206_s9 + $0x60] sm:$0xff] (!%p352_p10)   ;;  %v996_v49 = vld [vmem:[%s1206_s9 + $0x68] sm:$0xff] (!%p352_p10)  }
  0x39   : > { %905 = vmatprep.subr.bf16.mxu0 %v988_v40  ;;  %v993_v45 = vld [vmem:[%s1206_s9 + $0x18] sm:$0xff]   ;;  %v995_v47 = vld [vmem:[%s1206_s9 + $0x20] sm:$0xff]   ;;  %v1006_v50 = vld [vmem:[%s1206_s9 + $0x88] sm:$0xff]   ;;  %s397_s24 = scalar_select %p396_p11, %s1041_s14, 1 }
  0x3a   : > { %v1001_v48 = vld [vmem:[%s1206_s9 + $0x80] sm:$0xff]   ;;  %v997_v51 = vld [vmem:[%s1206_s9 + $0x28] sm:$0xff]   ;;  %v998_v52 = vld [vmem:[%s1206_s9 + $0x70] sm:$0xff]   ;;  %s892_s12 = sshll.u32 (%p1106_p6), %s1041_s14, 2 }
  0x3b   : > { %935 = vmatprep.subr.bf16.mxu1 %v1001_v48  ;;  %v999_v54 = vld [vmem:[%s1206_s9 + $0x30] sm:$0xff]   ;;  %v1000_v55 = vld [vmem:[%s1206_s9 + $0x78] sm:$0xff]   ;;  %s398_s27 = scalar_lea.vmem %s1267_s2, %s397_s24  ;;  %s716_s5 = scalar_lea.vmem (%p1106_p6), %s1268_s3, %s892_s12 }
  0x3c   : > { %906 = vmatpush3.bf16.msra.mxu0 %v989_v41  ;;  %936 = vmatpush3.bf16.msra.mxu1 %v1001_v48  ;;  %v1002_v56 = vld [vmem:[%s1206_s9 + $0x38] sm:$0xff]   ;;  %v862_v3 = vld [vmem:[%s398_s27] ss:$0 sm:$0xff] }
  0x3d   : > { %907 = vmatprep.subr.bf16.mxu0 %v990_v42  ;;  %937 = vmatprep.subr.bf16.mxu1 %v1006_v50 }
  0x40   : > { %908 = vmatpush3.bf16.msra.mxu0 %v991_v43  ;;  %938 = vmatpush3.bf16.msra.mxu1 %v1006_v50 }
  0x41   : > { %909 = vmatprep.subr.bf16.mxu0 %v992_v44 }
  0x43   : > { %940 = vmatmul.mubr.msk.bf16.vlgmr.msra.gmra.mrb[0].mxu1 %vm583_vm0, %v1008_v53 }
  0x44   : > { %910 = vmatpush3.bf16.msra.mxu0 %v993_v45 }
  0x45   : > { %911 = vmatprep.subr.bf16.mxu0 %v994_v46 }
  0x48   : > { %912 = vmatpush3.bf16.msra.mxu0 %v995_v47 }
  0x49   : > { %913 = vmatprep.subr.bf16.mxu0 %v996_v49 }
  0x4c   : > { %914 = vmatpush3.bf16.msra.mxu0 %v997_v51 }
  0x4d   : > { %915 = vmatprep.subr.bf16.mxu0 %v998_v52 }
  0x50   : > { %916 = vmatpush3.bf16.msra.mxu0 %v999_v54 }
  0x51   : > { %917 = vmatprep.subr.bf16.mxu0 %v1000_v55 }
  0x54   : > { %918 = vmatpush3.bf16.msra.mxu0 %v1002_v56 }
  0x57   : > { %623 = vmatmul.mubr.bf16.vlgmr.msra.gmra.mrb[0].mxu0 %v1003_v58 }
  0x58   : > { %630 = vmatprep.mubr.bf16.mxu0 %v867_v59 }
  0x5f   : > { %631 = vmatmul.mubr.bf16.gmra.mrb[4].mxu0 %v866_v60 }
 0x116   : > { %v941_v61 = vpop.f32.mrb[0].mxu1 }
 0x117   : > { %v672_v62 = vpop.f32.mrb[1].mxu1 }
 0x118   : > { %v942_v63 = vpop.f32.mrb[2].mxu1 }
 0x119   : > { %v675_v0 = vpop.f32.mrb[3].mxu1 }
 0x12a   : > { %v919_v1 = vpop.f32.mrb[0].mxu0 }
 0x12b   : > { %v920_v2 = vpop.f32.mrb[1].mxu0 }
 0x12c   : > { %v921_v4 = vadd.f32 %v920_v2, %v919_v1  ;;  %v922_v5 = vpop.f32.mrb[2].mxu0 }
 0x12d   : > { %v923_v6 = vpop.f32.mrb[3].mxu0 }
 0x12e   : > { %v924_v7 = vadd.f32 %v923_v6, %v922_v5  ;;  %v625_v8 = vadd.f32 %v921_v4, %v862_v3 }
 0x130   : > { %v673_v9 = vadd.f32 %v672_v62, %v625_v8  ;;  %v628_v10 = vadd.f32 %v924_v7, %v862_v3 }
 0x132   : > { %v676_v11 = vadd.f32 %v675_v0, %v628_v10  ;;  %v925_v12 = vpop.f32.mrb[4].mxu0  ;;  %v686_v14 = vmax.f32 %v673_v9, 0.0 }
 0x133   : > { %v926_v13 = vpop.f32.mrb[5].mxu0 }
 0x134   : > { %v687_v15 = vmax.f32 %v676_v11, 0.0  ;;  %v927_v16 = vadd.f32 %v926_v13, %v925_v12  ;;  %v928_v17 = vpop.f32.mrb[6].mxu0 }
 0x135   : > { %v929_v18 = vpop.f32.mrb[7].mxu0 }
 0x136   : > { %v901_v19 = vpack.c.bf16 %v687_v15, %v686_v14  ;;  %v633_v20 = vadd.f32 %v927_v16, %v862_v3 }
 0x138   : > { %902 = vst [vmem:[%s388_s29] sm:$0xff] %v901_v19   ;;  %v681_v21 = vadd.f32 %v941_v61, %v633_v20  ;;  %711 = sbr.rel (!%p1106_p6) target bundleno = 327 (0x147), region = 77 }
 0x13a   : > { %v688_v22 = vmax.f32 %v681_v21, 0.0 }
 0x13c   : > { %v897_v23 = vpack.c.bf16 %v688_v22, %v688_v22 }
 0x13e   : > { %704 = vst [vmem:[%s388_s29 + $0x8] sm:$0xf] %v897_v23 }
 0x13f   : > { %v732_v24 = vld [vmem:[%s388_s29] sm:$0xf]  ;;  %v734_v25 = vld [vmem:[%s388_s29 + $0x4] sm:$0xf] }
 0x140   : > { %733 = vst [vmem:[%s716_s5] sm:$0xf] %v732_v24  ;;  %735 = vst [vmem:[%s716_s5 + $0x8] sm:$0xf] %v734_v25 }
 0x145   : > { %v736_v26 = vld [vmem:[%s388_s29 + $0x8] sm:$0xf] }
 0x146   : > { %737 = vst [vmem:[%s716_s5 + $0x10] sm:$0xf] %v736_v26 }
 0x147 PF: > { %s13_s16 = sadd.s32 1, %s1049_s16   ;;  %s1270_s12 = smov %s1037_s13 }
 0x148   : > { %p10_p12 = scmp.ge.s32.totalorder %s13_s16, 4   ;;  %s1271_s13 = smov %s1111_s22 }
 0x149   : > { %s1272_s14 = smov %s1045_s15  ;;  %s1273_s15 = smov %s1275_s17 }
 0x14a   :  { %12 = sbr.rel (!%p10_p12) target bundleno = 3 (0x3), region = 155 }

// kernel: squeezenet_forward.28
= control target key start
LH: loop header
LB: loop body
LE: loop exit
PB: predicated region body
PF: predicated region fallthrough
CT: control target
= control target key end

     0   :  { %vm234_vm0 = vcmask 388096   ;;  %s423_s1 = inlined_call_operand.vmem [shape: bf16[256,48], index: 1, kind: input, shape index: {}]   ;;  %s424_s0 = inlined_call_operand.vmem [shape: bf16[18,256], index: 0, kind: input, shape index: {}]   ;;  %s425_s2 = inlined_call_operand.vmem [shape: f32[1,48], index: 2, kind: input, shape index: {}]   ;;  %s426_s3 = inlined_call_operand.vmem [shape: bf16[18,48], index: 3, kind: output, shape index: {}]  }
   0x1   :  { %v313_v0 = vld [vmem:[%s423_s1 + $0x40] sm:$0xff]   ;;  %v315_v2 = vld [vmem:[%s423_s1 + $0x48] sm:$0xff]   ;;  %v317_v4 = vld [vmem:[%s423_s1 + $0x50] sm:$0xff]  }
   0x2   :  { %v314_v1 = vld [vmem:[%s423_s1] sm:$0xff]   ;;  %269 = vmatprep.subr.bf16.mxu0 %v313_v0  ;;  %297 = vmatprep.subr.bf16.mxu1 %v313_v0  ;;  %v316_v3 = vld [vmem:[%s423_s1 + $0x8] sm:$0xff]   ;;  %v318_v5 = vld [vmem:[%s423_s1 + $0x10] sm:$0xff]  }
   0x3   :  { %270 = vmatpush3.bf16.msra.mxu0 %v314_v1  ;;  %305 = vmatpush3.bf16.msra.mxu1 %v314_v1  ;;  %v319_v6 = vld [vmem:[%s423_s1 + $0x58] sm:$0xff]   ;;  %v321_v8 = vld [vmem:[%s423_s1 + $0x60] sm:$0xff]   ;;  %v323_v10 = vld [vmem:[%s423_s1 + $0x68] sm:$0xff]  }
   0x4   :  { %271 = vmatprep.subr.bf16.mxu0 %v315_v2  ;;  %298 = vmatprep.subr.bf16.mxu1 %v315_v2  ;;  %v320_v7 = vld [vmem:[%s423_s1 + $0x18] sm:$0xff]   ;;  %v322_v9 = vld [vmem:[%s423_s1 + $0x20] sm:$0xff]   ;;  %v17_v12 = vld [vmem:[%s424_s0 + $0x10] sm:$0xff] }
   0x5   :  { %v331_v11 = vld [vmem:[%s424_s0 + $0x4] ss:$8 sps:$4 sm:$0xff]   ;;  %v246_v13 = vcombine.high %v17_v12, %v17_v12  ;;  %v325_v15 = vld [vmem:[%s423_s1 + $0x70] sm:$0xff]   ;;  %v327_v17 = vld [vmem:[%s423_s1 + $0x78] sm:$0xff]   ;;  %v245_v20 = vcombine.low %v17_v12, %v17_v12 }
   0x6   :  { %v324_v14 = vld [vmem:[%s423_s1 + $0x28] sm:$0xff]   ;;  %202 = vmatprep.mubr.bf16.mxu0 %v331_v11  ;;  %v326_v16 = vld [vmem:[%s423_s1 + $0x30] sm:$0xff]   ;;  %v328_v18 = vld [vmem:[%s423_s1 + $0x38] sm:$0xff]  }
   0x7   :  { %272 = vmatpush3.bf16.msra.mxu0 %v316_v3  ;;  %306 = vmatpush3.bf16.msra.mxu1 %v316_v3  ;;  %v329_v19 = vld [vmem:[%s424_s0] ss:$8 sps:$4 sm:$0xff]  }
   0x8   :  { %273 = vmatprep.subr.bf16.mxu0 %v317_v4  ;;  %299 = vmatprep.subr.bf16.mxu1 %v317_v4  ;;  %v242_v23 = vld [vmem:[%s425_s2] ss:$0 sm:$0xff] }
   0x9   :  { %210 = vmatprep.mubr.bf16.mxu1 %v246_v13 }
   0xb   :  { %274 = vmatpush3.bf16.msra.mxu0 %v318_v5  ;;  %307 = vmatpush3.bf16.msra.mxu1 %v318_v5 }
   0xc   :  { %275 = vmatprep.subr.bf16.mxu0 %v319_v6  ;;  %300 = vmatprep.subr.bf16.mxu1 %v319_v6 }
   0xf   :  { %276 = vmatpush3.bf16.msra.mxu0 %v320_v7  ;;  %308 = vmatpush3.bf16.msra.mxu1 %v320_v7 }
  0x10   :  { %277 = vmatprep.subr.bf16.mxu0 %v321_v8  ;;  %301 = vmatprep.subr.bf16.mxu1 %v321_v8 }
  0x13   :  { %278 = vmatpush3.bf16.msra.mxu0 %v322_v9  ;;  %309 = vmatpush3.bf16.msra.mxu1 %v322_v9 }
  0x14   :  { %279 = vmatprep.subr.bf16.mxu0 %v323_v10  ;;  %302 = vmatprep.subr.bf16.mxu1 %v323_v10 }
  0x17   :  { %280 = vmatpush3.bf16.msra.mxu0 %v324_v14  ;;  %310 = vmatpush3.bf16.msra.mxu1 %v324_v14 }
  0x18   :  { %281 = vmatprep.subr.bf16.mxu0 %v325_v15  ;;  %303 = vmatprep.subr.bf16.mxu1 %v325_v15 }
  0x1b   :  { %282 = vmatpush3.bf16.msra.mxu0 %v326_v16  ;;  %311 = vmatpush3.bf16.msra.mxu1 %v326_v16 }
  0x1c   :  { %283 = vmatprep.subr.bf16.mxu0 %v327_v17  ;;  %304 = vmatprep.subr.bf16.mxu1 %v327_v17 }
  0x1f   :  { %284 = vmatpush3.bf16.msra.mxu0 %v328_v18  ;;  %312 = vmatpush3.bf16.msra.mxu1 %v328_v18 }
  0x22   :  { %203 = vmatmul.mubr.bf16.vlgmr.msra.gmra.mrb[0].mxu0 %v329_v19  ;;  %211 = vmatmul.mubr.bf16.vlgmr.msra.gmra.mrb[0].mxu1 %v245_v20 }
  0xf5   :  { %v285_v21 = vpop.f32.mrb[0].mxu0  ;;  %v291_v22 = vpop.f32.mrb[0].mxu1 }
  0xf6   :  { %v286_v24 = vpop.f32.mrb[1].mxu0  ;;  %v292_v25 = vpop.f32.mrb[1].mxu1 }
  0xf7   :  { %v287_v26 = vadd.f32 %v286_v24, %v285_v21  ;;  %v293_v27 = vadd.f32 %v292_v25, %v291_v22  ;;  %v288_v28 = vpop.f32.mrb[2].mxu0  ;;  %v294_v29 = vpop.f32.mrb[2].mxu1 }
  0xf8   :  { %v289_v30 = vpop.f32.mrb[3].mxu0  ;;  %v295_v31 = vpop.f32.mrb[3].mxu1 }
  0xf9   :  { %v205_v32 = vadd.f32 %v287_v26, %v242_v23  ;;  %v213_v33 = vadd.f32 %v293_v27, %v242_v23  ;;  %v290_v34 = vadd.f32 %v289_v30, %v288_v28 }
  0xfb   :  { %v218_v35 = vmax.f32 %v205_v32, 0.0  ;;  %v220_v36 = vmax.f32 %v213_v33, 0.0  ;;  %v208_v37 = vadd.f32 %v290_v34, %v242_v23 }
  0xfd   :  { %v266_v38 = vpack.c.bf16 %v218_v35, %v218_v35  ;;  %v268_v39 = vpack.c.bf16 %v220_v36, %v220_v36  ;;  %v219_v40 = vmax.f32 %v208_v37, 0.0 }
  0xff   :  { %235 = vst.msk [vmem:[%s426_s3] sm:$0xf] %vm234_vm0, %v266_v38  ;;  %237 = vst.msk [vmem:[%s426_s3 + $0x8] sm:$0xf] %vm234_vm0, %v268_v39  ;;  %v267_v41 = vpack.c.bf16 %v219_v40, %v219_v40 }
 0x101   :  { %236 = vst.msk [vmem:[%s426_s3 + $0x4] sm:$0xf] %vm234_vm0, %v267_v41 }

// kernel: squeezenet_forward.29
= control target key start
LH: loop header
LB: loop body
LE: loop exit
PB: predicated region body
PF: predicated region fallthrough
CT: control target
= control target key end

     0   :  { %s1235_s12 = smov 0   ;;  %s1237_s13 = smov 0   ;;  %s1488_s0 = inlined_call_operand.vmem [shape: bf16[18,432], index: 0, kind: input, shape index: {}]   ;;  %s1489_s1 = inlined_call_operand.vmem [shape: bf16[432,384], index: 1, kind: input, shape index: {}]   ;;  %s1490_s2 = inlined_call_operand.vmem [shape: f32[1,384], index: 2, kind: input, shape index: {}]   ;;  %s1491_s3 = inlined_call_operand.vmem [shape: bf16[18,384], index: 3, kind: output, shape index: {}]  }
   0x1   :  { %s1239_s14 = smov 0   ;;  %s1241_s15 = smov 0  }
   0x2   :  { %s1243_s16 = smov 0  }
   0x3 LB: > { %s22_s17 = sadd.s32 1, %s1208_s15  ;;  %s1006_s18 = sadd.s32 4294967295, %s1212_s16   ;;  %s1212_s16 = sphi %s1243_s16, %s13_s16   ;;  %s1208_s15 = sphi %s1241_s15, %s1496_s15   ;;  %s1204_s14 = sphi %s1239_s14, %s1495_s14   ;;  %s1200_s13 = sphi %s1237_s13, %s1494_s13   ;;  %s1196_s12 = sphi %s1235_s12, %s1493_s12  }
   0x4   : > { %p23_p0 = scmp.ge.s32.totalorder %s22_s17, 3  ;;  %p65_p1 = scmp.ne.s32.totalorder %s1200_s13, %s1196_s12 }
   0x5   : > { %p66_p2 = scmp.eq.s32.totalorder %s1212_s16, 0  ;;  %p123_p4 = scmp.eq.s32.totalorder %s1006_s18, 2 }
   0x6   : > { %s1498_s17 = smov (%p23_p0, %s22_s17), 0  ;;  %s58_s20 = sadd.s32 1, %s1200_s13 }
   0x7   : > { %p67_p3 = por %p66_p2, %p65_p1  ;;  %s55_s19 = ssub.s32 %s1208_s15, %s1498_s17 }
   0x8   : > { %p56_p5 = scmp.eq.s32.totalorder %s55_s19, 0  ;;  %p1270_p6 = por %p123_p4, %p65_p1 }
   0x9   : > { %p1010_p7 = scmp.ge.s32.totalorder %s1212_s16, 3 }
   0xa   : > { %s1275_s22 = scalar_select %p56_p5, %s1200_s13, %s58_s20  }
   0xb   : > { %155 = sbr.rel (%p1010_p7) target bundleno = 58 (0x3a), region = 20 }
  0x12   : > { %158 = sbr.rel (!%p67_p3) target bundleno = 58 (0x3a), region = 24  ;;  %s160_s23 = sand.u32 (%p67_p3), 1, %s1200_s13  }
  0x13   : > { %s1011_s24 = sshll.u32 (%p67_p3), %s1208_s15, 2  ;;  %s1093_s25 = smul.u32 (%p67_p3), 216, %s160_s23 }
  0x14   : > { %s1283_s28 = scalar_lea.vmem (%p67_p3), %s1489_s1, %s1011_s24 }
  0x15   : > { %v180_v0 = vld [vmem:[%s1283_s28] sm:$0xf] (%p67_p3)  ;;  %v182_v1 = vld [vmem:[%s1283_s28 + $0xc] sm:$0xf] (%p67_p3)  ;;  %v184_v2 = vld [vmem:[%s1283_s28 + $0x18] sm:$0xf] (%p67_p3) }
  0x16   : > { %v186_v3 = vld [vmem:[%s1283_s28 + $0x24] sm:$0xf] (%p67_p3)  ;;  %v188_v4 = vld [vmem:[%s1283_s28 + $0x30] sm:$0xf] (%p67_p3)  ;;  %s1290_s29 = scalar_lea.vmem (%p67_p3), [#allocation2], %s1093_s25 }
  0x17   : > { %181 = vst [vmem:[%s1290_s29] sm:$0xf] (%p67_p3), %v180_v0  ;;  %183 = vst [vmem:[%s1290_s29 + $0x4] sm:$0xf] (%p67_p3), %v182_v1  ;;  %v190_v5 = vld [vmem:[%s1283_s28 + $0x3c] sm:$0xf] (%p67_p3) }
  0x18   : > { %185 = vst [vmem:[%s1290_s29 + $0x8] sm:$0xf] (%p67_p3), %v184_v2  ;;  %187 = vst [vmem:[%s1290_s29 + $0xc] sm:$0xf] (%p67_p3), %v186_v3  ;;  %v192_v6 = vld [vmem:[%s1283_s28 + $0x48] sm:$0xf] (%p67_p3) }
  0x19   : > { %189 = vst [vmem:[%s1290_s29 + $0x10] sm:$0xf] %v188_v4  ;;  %v194_v7 = vld [vmem:[%s1283_s28 + $0x54] sm:$0xf]  ;;  %191 = vst [vmem:[%s1290_s29 + $0x14] sm:$0xf] %v190_v5 }
  0x1a   : > { %193 = vst [vmem:[%s1290_s29 + $0x18] sm:$0xf] %v192_v6  ;;  %195 = vst [vmem:[%s1290_s29 + $0x1c] sm:$0xf] %v194_v7  ;;  %v196_v8 = vld [vmem:[%s1283_s28 + $0x60] sm:$0xf] }
  0x1b   : > { %v198_v9 = vld [vmem:[%s1283_s28 + $0x6c] sm:$0xf]  ;;  %v200_v10 = vld [vmem:[%s1283_s28 + $0x78] sm:$0xf]  ;;  %197 = vst [vmem:[%s1290_s29 + $0x20] sm:$0xf] %v196_v8 }
  0x1c   : > { %199 = vst [vmem:[%s1290_s29 + $0x24] sm:$0xf] %v198_v9  ;;  %201 = vst [vmem:[%s1290_s29 + $0x28] sm:$0xf] %v200_v10  ;;  %v202_v11 = vld [vmem:[%s1283_s28 + $0x84] sm:$0xf] }
  0x1d   : > { %v204_v12 = vld [vmem:[%s1283_s28 + $0x90] sm:$0xf]  ;;  %v206_v13 = vld [vmem:[%s1283_s28 + $0x9c] sm:$0xf]  ;;  %203 = vst [vmem:[%s1290_s29 + $0x2c] sm:$0xf] %v202_v11 }
  0x1e   : > { %205 = vst [vmem:[%s1290_s29 + $0x30] sm:$0xf] %v204_v12  ;;  %207 = vst [vmem:[%s1290_s29 + $0x34] sm:$0xf] %v206_v13  ;;  %v208_v14 = vld [vmem:[%s1283_s28 + $0xa8] sm:$0xf] }
  0x1f   : > { %v210_v15 = vld [vmem:[%s1283_s28 + $0xb4] sm:$0xf]  ;;  %v212_v16 = vld [vmem:[%s1283_s28 + $0xc0] sm:$0xf]  ;;  %209 = vst [vmem:[%s1290_s29 + $0x38] sm:$0xf] %v208_v14 }
  0x20   : > { %211 = vst [vmem:[%s1290_s29 + $0x3c] sm:$0xf] %v210_v15  ;;  %213 = vst [vmem:[%s1290_s29 + $0x40] sm:$0xf] %v212_v16  ;;  %v214_v17 = vld [vmem:[%s1283_s28 + $0xcc] sm:$0xf] }
  0x21   : > { %v216_v18 = vld [vmem:[%s1283_s28 + $0xd8] sm:$0xf]  ;;  %v218_v19 = vld [vmem:[%s1283_s28 + $0xe4] sm:$0xf]  ;;  %215 = vst [vmem:[%s1290_s29 + $0x44] sm:$0xf] %v214_v17 }
  0x22   : > { %217 = vst [vmem:[%s1290_s29 + $0x48] sm:$0xf] %v216_v18  ;;  %219 = vst [vmem:[%s1290_s29 + $0x4c] sm:$0xf] %v218_v19  ;;  %v220_v20 = vld [vmem:[%s1283_s28 + $0xf0] sm:$0xf] }
  0x23   : > { %v222_v21 = vld [vmem:[%s1283_s28 + $0xfc] sm:$0xf]  ;;  %v224_v22 = vld [vmem:[%s1283_s28 + $0x108] sm:$0xf]  ;;  %221 = vst [vmem:[%s1290_s29 + $0x50] sm:$0xf] %v220_v20 }
  0x24   : > { %223 = vst [vmem:[%s1290_s29 + $0x54] sm:$0xf] %v222_v21  ;;  %225 = vst [vmem:[%s1290_s29 + $0x58] sm:$0xf] %v224_v22  ;;  %v226_v23 = vld [vmem:[%s1283_s28 + $0x114] sm:$0xf] }
  0x25   : > { %v228_v24 = vld [vmem:[%s1283_s28 + $0x120] sm:$0xf]  ;;  %v230_v25 = vld [vmem:[%s1283_s28 + $0x12c] sm:$0xf]  ;;  %227 = vst [vmem:[%s1290_s29 + $0x5c] sm:$0xf] %v226_v23 }
  0x26   : > { %229 = vst [vmem:[%s1290_s29 + $0x60] sm:$0xf] %v228_v24  ;;  %231 = vst [vmem:[%s1290_s29 + $0x64] sm:$0xf] %v230_v25  ;;  %v232_v26 = vld [vmem:[%s1283_s28 + $0x138] sm:$0xf] }
  0x27   : > { %v234_v27 = vld [vmem:[%s1283_s28 + $0x144] sm:$0xf]  ;;  %v236_v28 = vld [vmem:[%s1283_s28 + $0x150] sm:$0xf]  ;;  %233 = vst [vmem:[%s1290_s29 + $0x68] sm:$0xf] %v232_v26 }
  0x28   : > { %235 = vst [vmem:[%s1290_s29 + $0x6c] sm:$0xf] %v234_v27  ;;  %237 = vst [vmem:[%s1290_s29 + $0x70] sm:$0xf] %v236_v28  ;;  %v238_v29 = vld [vmem:[%s1283_s28 + $0x15c] sm:$0xf] }
  0x29   : > { %v240_v30 = vld [vmem:[%s1283_s28 + $0x168] sm:$0xf]  ;;  %v242_v31 = vld [vmem:[%s1283_s28 + $0x174] sm:$0xf]  ;;  %239 = vst [vmem:[%s1290_s29 + $0x74] sm:$0xf] %v238_v29 }
  0x2a   : > { %241 = vst [vmem:[%s1290_s29 + $0x78] sm:$0xf] %v240_v30  ;;  %243 = vst [vmem:[%s1290_s29 + $0x7c] sm:$0xf] %v242_v31  ;;  %v244_v32 = vld [vmem:[%s1283_s28 + $0x180] sm:$0xf] }
  0x2b   : > { %v246_v33 = vld [vmem:[%s1283_s28 + $0x18c] sm:$0xf]  ;;  %v248_v34 = vld [vmem:[%s1283_s28 + $0x198] sm:$0xf]  ;;  %245 = vst [vmem:[%s1290_s29 + $0x80] sm:$0xf] %v244_v32 }
  0x2c   : > { %247 = vst [vmem:[%s1290_s29 + $0x84] sm:$0xf] %v246_v33  ;;  %249 = vst [vmem:[%s1290_s29 + $0x88] sm:$0xf] %v248_v34  ;;  %v250_v35 = vld [vmem:[%s1283_s28 + $0x1a4] sm:$0xf] }
  0x2d   : > { %v252_v36 = vld [vmem:[%s1283_s28 + $0x1b0] sm:$0xf]  ;;  %v254_v37 = vld [vmem:[%s1283_s28 + $0x1bc] sm:$0xf]  ;;  %251 = vst [vmem:[%s1290_s29 + $0x8c] sm:$0xf] %v250_v35 }
  0x2e   : > { %253 = vst [vmem:[%s1290_s29 + $0x90] sm:$0xf] %v252_v36  ;;  %255 = vst [vmem:[%s1290_s29 + $0x94] sm:$0xf] %v254_v37  ;;  %v256_v38 = vld [vmem:[%s1283_s28 + $0x1c8] sm:$0xf] }
  0x2f   : > { %v258_v39 = vld [vmem:[%s1283_s28 + $0x1d4] sm:$0xf]  ;;  %v260_v40 = vld [vmem:[%s1283_s28 + $0x1e0] sm:$0xf]  ;;  %257 = vst [vmem:[%s1290_s29 + $0x98] sm:$0xf] %v256_v38 }
  0x30   : > { %259 = vst [vmem:[%s1290_s29 + $0x9c] sm:$0xf] %v258_v39  ;;  %261 = vst [vmem:[%s1290_s29 + $0xa0] sm:$0xf] %v260_v40  ;;  %v262_v41 = vld [vmem:[%s1283_s28 + $0x1ec] sm:$0xf] }
  0x31   : > { %v264_v42 = vld [vmem:[%s1283_s28 + $0x1f8] sm:$0xf]  ;;  %v266_v43 = vld [vmem:[%s1283_s28 + $0x204] sm:$0xf]  ;;  %263 = vst [vmem:[%s1290_s29 + $0xa4] sm:$0xf] %v262_v41 }
  0x32   : > { %265 = vst [vmem:[%s1290_s29 + $0xa8] sm:$0xf] %v264_v42  ;;  %267 = vst [vmem:[%s1290_s29 + $0xac] sm:$0xf] %v266_v43  ;;  %v268_v44 = vld [vmem:[%s1283_s28 + $0x210] sm:$0xf] }
  0x33   : > { %v270_v45 = vld [vmem:[%s1283_s28 + $0x21c] sm:$0xf]  ;;  %v272_v46 = vld [vmem:[%s1283_s28 + $0x228] sm:$0xf]  ;;  %269 = vst [vmem:[%s1290_s29 + $0xb0] sm:$0xf] %v268_v44 }
  0x34   : > { %271 = vst [vmem:[%s1290_s29 + $0xb4] sm:$0xf] %v270_v45  ;;  %273 = vst [vmem:[%s1290_s29 + $0xb8] sm:$0xf] %v272_v46  ;;  %v274_v47 = vld [vmem:[%s1283_s28 + $0x234] sm:$0xf] }
  0x35   : > { %v276_v48 = vld [vmem:[%s1283_s28 + $0x240] sm:$0xf]  ;;  %v278_v49 = vld [vmem:[%s1283_s28 + $0x24c] sm:$0xf]  ;;  %275 = vst [vmem:[%s1290_s29 + $0xbc] sm:$0xf] %v274_v47 }
  0x36   : > { %277 = vst [vmem:[%s1290_s29 + $0xc0] sm:$0xf] %v276_v48  ;;  %279 = vst [vmem:[%s1290_s29 + $0xc4] sm:$0xf] %v278_v49  ;;  %v280_v50 = vld [vmem:[%s1283_s28 + $0x258] sm:$0xf] }
  0x37   : > { %v282_v51 = vld [vmem:[%s1283_s28 + $0x264] sm:$0xf]  ;;  %v284_v52 = vld [vmem:[%s1283_s28 + $0x270] sm:$0xf]  ;;  %281 = vst [vmem:[%s1290_s29 + $0xc8] sm:$0xf] %v280_v50 }
  0x38   : > { %283 = vst [vmem:[%s1290_s29 + $0xcc] sm:$0xf] %v282_v51  ;;  %285 = vst [vmem:[%s1290_s29 + $0xd0] sm:$0xf] %v284_v52  ;;  %v286_v53 = vld [vmem:[%s1283_s28 + $0x27c] sm:$0xf] }
  0x39   : > { %287 = vst [vmem:[%s1290_s29 + $0xd4] sm:$0xf] %v286_v53 }
  0x3a PF: > { %p1012_p8 = scmp.ge.s32.totalorder %s1212_s16, 1  ;;  %p423_p9 = scmp.lt.s32.totalorder %s1212_s16, 4 }
  0x3c   : > { %p424_p10 = pnand %p1012_p8, %p423_p9 }
  0x3d   : > { %s430_s30 = sand.u32 (!%p424_p10), 1, %s1196_s12   ;;  %v1214_v54 = vmov (!%p424_p10), 0   ;;  %v1164_v55 = vld [vmem:[%s1488_s0 + $0x4] ss:$16 sps:$4 sm:$0xff] (!%p424_p10)   ;;  %vm734_vm0 = vcmask (!%p424_p10), 392192   ;;  %v478_v24 = vld [vmem:[%s1488_s0 + $0x28] sm:$0xff] (!%p424_p10) }
  0x3e   : > { %427 = sbr.rel (%p424_p10) target bundleno = 345 (0x159), region = 69  ;;  %789 = vmatprep.subr.bf16.mxu1 (!%p424_p10), %v1214_v54  ;;  %v1170_v56 = vld [vmem:[%s1488_s0 + $0xc] ss:$16 sps:$4 sm:$0xff] (!%p424_p10)   ;;  %773 = vmatprep.mubr.bf16.mxu0 (!%p424_p10), %v1164_v55  ;;  %v477_v17 = vld [vmem:[%s1488_s0 + $0x20] sm:$0xff] (!%p424_p10)  ;;  %v1168_v25 = vld [vmem:[%s1488_s0 + $0x8] ss:$16 sps:$4 sm:$0xff] (!%p424_p10)   ;;  %v1021_v26 = vcombine.high (!%p424_p10), %v478_v24, %v478_v24  ;;  %v1020_v27 = vcombine.low (!%p424_p10), %v478_v24, %v478_v24 }
  0x3f   : > { %s1094_s4 = smul.u32 (!%p424_p10), 216, %s430_s30  ;;  %1049 = vmatprep.mubr.msk.bf16.mxu1 (!%p424_p10), %vm734_vm0, %v1170_v56  ;;  %v1162_v19 = vld [vmem:[%s1488_s0] ss:$16 sps:$4 sm:$0xff] (!%p424_p10)   ;;  %v1019_v20 = vcombine.high (!%p424_p10), %v477_v17, %v477_v17  ;;  %v1018_v23 = vcombine.low (!%p424_p10), %v477_v17, %v477_v17  ;;  %p468_p11 = scmp.lt.s32.totalorder (!%p424_p10), %s1204_s14, 2 }
  0x41   : > { %s1407_s9 = scalar_lea.vmem (!%p424_p10), [#allocation2], %s1094_s4  ;;  %s1095_s4 = smul.u32 (!%p424_p10), 12, %s430_s30 }
  0x42   : > { %v1137_v57 = vld [vmem:[%s1407_s9 + $0x80] sm:$0xff] (!%p424_p10)   ;;  %v1140_v60 = vld [vmem:[%s1407_s9 + $0x88] sm:$0xff] (!%p424_p10)   ;;  %v1143_v63 = vld [vmem:[%s1407_s9 + $0x90] sm:$0xff] (!%p424_p10)  }
  0x43   : > { %v1138_v58 = vld [vmem:[%s1407_s9 + $0x40] sm:$0xff] (!%p424_p10)   ;;  %790 = vmatpush1.bf16.msra.mxu1 (!%p424_p10), %v1137_v57  ;;  %v1141_v61 = vld [vmem:[%s1407_s9 + $0x48] sm:$0xff] (!%p424_p10)   ;;  %v1144_v0 = vld [vmem:[%s1407_s9 + $0x50] sm:$0xff] (!%p424_p10)   ;;  %s460_s5 = scalar_lea.vmem (!%p424_p10), [#allocation3], %s1095_s4 }
  0x44   : > { %v1139_v59 = vld [vmem:[%s1407_s9] sm:$0xff] (!%p424_p10)   ;;  %1065 = vmatprep.subr.bf16.mxu0 (!%p424_p10), %v1138_v58  ;;  %791 = vmatprep.subr.bf16.mxu1 (!%p424_p10), %v1214_v54  ;;  %v1142_v62 = vld [vmem:[%s1407_s9 + $0x8] sm:$0xff] (!%p424_p10)   ;;  %v1145_v1 = vld [vmem:[%s1407_s9 + $0x10] sm:$0xff] (!%p424_p10)  }
  0x45   : > { %1066 = vmatpush3.bf16.msra.mxu0 %v1139_v59  ;;  %v1146_v2 = vld [vmem:[%s1407_s9 + $0x98] sm:$0xff]   ;;  %v1150_v5 = vld [vmem:[%s1407_s9 + $0x60] sm:$0xff]   ;;  %v1153_v8 = vld [vmem:[%s1407_s9 + $0x68] sm:$0xff]   ;;  %s469_s26 = scalar_select %p468_p11, %s1204_s14, 2 }
  0x46   : > { %1067 = vmatprep.subr.bf16.mxu0 %v1141_v61  ;;  %v1147_v3 = vld [vmem:[%s1407_s9 + $0x58] sm:$0xff]   ;;  %v1149_v6 = vld [vmem:[%s1407_s9 + $0xa0] sm:$0xff]   ;;  %v1152_v9 = vld [vmem:[%s1407_s9 + $0xa8] sm:$0xff]   ;;  %s1054_s12 = sshll.u32 (%p1270_p6), %s1204_s14, 2 }
  0x47   : > { %792 = vmatpush1.bf16.msra.mxu1 %v1140_v60  ;;  %v1148_v4 = vld [vmem:[%s1407_s9 + $0x18] sm:$0xff]   ;;  %v1151_v7 = vld [vmem:[%s1407_s9 + $0x20] sm:$0xff]   ;;  %v1154_v10 = vld [vmem:[%s1407_s9 + $0x28] sm:$0xff]   ;;  %s470_s29 = scalar_lea.vmem %s1490_s2, %s469_s26  ;;  %s867_s7 = scalar_lea.vmem (%p1270_p6), %s1491_s3, %s1054_s12 }
  0x48   : > { %793 = vmatprep.subr.bf16.mxu1 %v1214_v54  ;;  %v1156_v11 = vld [vmem:[%s1407_s9 + $0x70] sm:$0xff]   ;;  %v1159_v14 = vld [vmem:[%s1407_s9 + $0x78] sm:$0xff]   ;;  %v1161_v18 = vld [vmem:[%s1407_s9 + $0xc0] sm:$0xff]  }
  0x49   : > { %1068 = vmatpush3.bf16.msra.mxu0 %v1142_v62  ;;  %v1155_v12 = vld [vmem:[%s1407_s9 + $0xb0] sm:$0xff]   ;;  %v1158_v15 = vld [vmem:[%s1407_s9 + $0xb8] sm:$0xff]   ;;  %v1165_v21 = vld [vmem:[%s1407_s9 + $0xc8] sm:$0xff]  }
  0x4a   : > { %1069 = vmatprep.subr.bf16.mxu0 %v1144_v0  ;;  %v1157_v13 = vld [vmem:[%s1407_s9 + $0x30] sm:$0xff]   ;;  %v1160_v16 = vld [vmem:[%s1407_s9 + $0x38] sm:$0xff]   ;;  %v1013_v34 = vld [vmem:[%s470_s29] ss:$0 sm:$0xff] }
  0x4b   : > { %794 = vmatpush1.bf16.msra.mxu1 %v1143_v63  ;;  %v1166_v22 = vld [vmem:[%s1407_s9 + $0xd0] sm:$0xff]  }
  0x4c   : > { %795 = vmatprep.subr.bf16.mxu1 %v1214_v54 }
  0x4d   : > { %1070 = vmatpush3.bf16.msra.mxu0 %v1145_v1 }
  0x4e   : > { %1071 = vmatprep.subr.bf16.mxu0 %v1147_v3 }
  0x4f   : > { %796 = vmatpush1.bf16.msra.mxu1 %v1146_v2 }
  0x50   : > { %797 = vmatprep.subr.bf16.mxu1 %v1214_v54 }
  0x51   : > { %1072 = vmatpush3.bf16.msra.mxu0 %v1148_v4 }
  0x52   : > { %1073 = vmatprep.subr.bf16.mxu0 %v1150_v5 }
  0x53   : > { %798 = vmatpush1.bf16.msra.mxu1 %v1149_v6 }
  0x54   : > { %799 = vmatprep.subr.bf16.mxu1 %v1214_v54 }
  0x55   : > { %1074 = vmatpush3.bf16.msra.mxu0 %v1151_v7 }
  0x56   : > { %1075 = vmatprep.subr.bf16.mxu0 %v1153_v8 }
  0x57   : > { %800 = vmatpush1.bf16.msra.mxu1 %v1152_v9 }
  0x58   : > { %801 = vmatprep.subr.bf16.mxu1 %v1214_v54 }
  0x59   : > { %1076 = vmatpush3.bf16.msra.mxu0 %v1154_v10 }
  0x5a   : > { %1077 = vmatprep.subr.bf16.mxu0 %v1156_v11 }
  0x5b   : > { %802 = vmatpush1.bf16.msra.mxu1 %v1155_v12 }
  0x5c   : > { %803 = vmatprep.subr.bf16.mxu1 %v1214_v54 }
  0x5d   : > { %1078 = vmatpush3.bf16.msra.mxu0 %v1157_v13 }
  0x5e   : > { %1079 = vmatprep.subr.bf16.mxu0 %v1159_v14 }
  0x5f   : > { %804 = vmatpush1.bf16.msra.mxu1 %v1158_v15 }
  0x60   : > { %805 = vmatprep.subr.bf16.mxu1 %v1214_v54 }
  0x61   : > { %1080 = vmatpush3.bf16.msra.mxu0 %v1160_v16 }
  0x63   : > { %806 = vmatpush1.bf16.msra.mxu1 %v1161_v18 }
  0x64   : > { %774 = vmatmul.mubr.bf16.vlgmr.msra.gmra.mrb[0].mxu0 %v1162_v19  ;;  %807 = vmatprep.subr.bf16.mxu1 %v1214_v54 }
  0x65   : > { %781 = vmatprep.mubr.bf16.mxu0 %v1019_v20 }
  0x67   : > { %808 = vmatpush1.bf16.msra.mxu1 %v1165_v21 }
  0x68   : > { %809 = vmatprep.subr.bf16.mxu1 %v1214_v54 }
  0x6b   : > { %810 = vmatpush1.bf16.msra.mxu1 %v1166_v22 }
  0x6c   : > { %782 = vmatmul.mubr.bf16.gmra.mrb[4].mxu0 %v1018_v23 }
  0x6e   : > { %822 = vmatmul.mubr.bf16.vlgmr.msra.gmra.mrb[0].mxu1 %v1168_v25 }
  0x6f   : > { %1050 = vmatprep.mubr.msk.bf16.mxu1 %vm734_vm0, %v1021_v26 }
  0x76   : > { %830 = vmatmul.mubr.bf16.gmra.mrb[4].mxu1 %v1020_v27 }
 0x137   : > { %v1081_v28 = vpop.f32.mrb[0].mxu0 }
 0x138   : > { %v1082_v29 = vpop.f32.mrb[1].mxu0 }
 0x139   : > { %v1083_v30 = vadd.f32 %v1082_v29, %v1081_v28  ;;  %v1084_v31 = vpop.f32.mrb[2].mxu0 }
 0x13a   : > { %v1085_v32 = vpop.f32.mrb[3].mxu0 }
 0x13b   : > { %v1086_v33 = vadd.f32 %v1085_v32, %v1084_v31  ;;  %v776_v35 = vadd.f32 %v1083_v30, %v1013_v34 }
 0x13d   : > { %v779_v43 = vadd.f32 %v1086_v33, %v1013_v34 }
 0x13f   : > { %v1087_v36 = vpop.f32.mrb[4].mxu0 }
 0x140   : > { %v1088_v37 = vpop.f32.mrb[5].mxu0 }
 0x141   : > { %v823_v38 = vpop.f32.mrb[0].mxu1  ;;  %v1089_v39 = vadd.f32 %v1088_v37, %v1087_v36  ;;  %v1090_v40 = vpop.f32.mrb[6].mxu0 }
 0x142   : > { %v824_v41 = vadd.f32 %v823_v38, %v776_v35  ;;  %v825_v42 = vpop.f32.mrb[1].mxu1  ;;  %v1091_v44 = vpop.f32.mrb[7].mxu0 }
 0x143   : > { %v826_v45 = vpop.f32.mrb[2].mxu1  ;;  %v784_v50 = vadd.f32 %v1089_v39, %v1013_v34 }
 0x144   : > { %v827_v46 = vadd.f32 %v826_v45, %v779_v43  ;;  %v828_v47 = vpop.f32.mrb[3].mxu1  ;;  %v837_v48 = vmax.f32 %v824_v41, 0.0 }
 0x146   : > { %v838_v49 = vmax.f32 %v827_v46, 0.0 }
 0x148   : > { %v1063_v51 = vpack.c.bf16 %v838_v49, %v837_v48 }
 0x149   : > { %v831_v52 = vpop.f32.mrb[4].mxu1 }
 0x14a   : > { %v832_v53 = vadd.f32 %v831_v52, %v784_v50  ;;  %1064 = vst [vmem:[%s460_s5] sm:$0xff] %v1063_v51   ;;  %v833_v54 = vpop.f32.mrb[5].mxu1  ;;  %862 = sbr.rel (!%p1270_p6) target bundleno = 345 (0x159), region = 77 }
 0x14b   : > { %v834_v55 = vpop.f32.mrb[6].mxu1 }
 0x14c   : > { %v839_v56 = vmax.f32 %v832_v53, 0.0  ;;  %v835_v57 = vpop.f32.mrb[7].mxu1 }
 0x14e   : > { %v1059_v58 = vpack.c.bf16 %v839_v56, %v839_v56 }
 0x150   : > { %855 = vst [vmem:[%s460_s5 + $0x8] sm:$0xf] %v1059_v58 }
 0x151   : > { %v883_v59 = vld [vmem:[%s460_s5] sm:$0xf]  ;;  %v885_v60 = vld [vmem:[%s460_s5 + $0x4] sm:$0xf] }
 0x152   : > { %884 = vst [vmem:[%s867_s7] sm:$0xf] %v883_v59  ;;  %886 = vst [vmem:[%s867_s7 + $0xc] sm:$0xf] %v885_v60 }
 0x157   : > { %v887_v61 = vld [vmem:[%s460_s5 + $0x8] sm:$0xf] }
 0x158   : > { %888 = vst [vmem:[%s867_s7 + $0x18] sm:$0xf] %v887_v61 }
 0x159 PF: > { %s13_s16 = sadd.s32 1, %s1212_s16   ;;  %s1493_s12 = smov %s1200_s13 }
 0x15a   : > { %p10_p12 = scmp.ge.s32.totalorder %s13_s16, 5   ;;  %s1494_s13 = smov %s1275_s22 }
 0x15b   : > { %s1495_s14 = smov %s1208_s15  ;;  %s1496_s15 = smov %s1498_s17 }
 0x15c   :  { %12 = sbr.rel (!%p10_p12) target bundleno = 3 (0x3), region = 155 }

// kernel: squeezenet_forward.30
= control target key start
LH: loop header
LB: loop body
LE: loop exit
PB: predicated region body
PF: predicated region fallthrough
CT: control target
= control target key end

     0   :  { %vm359_vm0 = vcmask 388096   ;;  %s612_s1 = inlined_call_operand.vmem [shape: bf16[384,48], index: 1, kind: input, shape index: {}]   ;;  %s613_s0 = inlined_call_operand.vmem [shape: bf16[18,384], index: 0, kind: input, shape index: {}]   ;;  %s614_s2 = inlined_call_operand.vmem [shape: f32[1,48], index: 2, kind: input, shape index: {}]   ;;  %s615_s3 = inlined_call_operand.vmem [shape: bf16[18,48], index: 3, kind: output, shape index: {}]  }
   0x1   :  { %v462_v0 = vld [vmem:[%s612_s1 + $0x40] sm:$0xff]   ;;  %v464_v2 = vld [vmem:[%s612_s1 + $0x48] sm:$0xff]   ;;  %v467_v5 = vld [vmem:[%s612_s1 + $0x50] sm:$0xff]  }
   0x2   :  { %v463_v1 = vld [vmem:[%s612_s1] sm:$0xff]   ;;  %404 = vmatprep.subr.bf16.mxu0 %v462_v0  ;;  %v466_v4 = vld [vmem:[%s612_s1 + $0x8] sm:$0xff]   ;;  %v469_v7 = vld [vmem:[%s612_s1 + $0x10] sm:$0xff]  }
   0x3   :  { %405 = vmatpush3.bf16.msra.mxu0 %v463_v1  ;;  %v465_v3 = vld [vmem:[%s612_s1 + $0x80] sm:$0xff]   ;;  %v468_v6 = vld [vmem:[%s612_s1 + $0x88] sm:$0xff]   ;;  %v470_v8 = vld [vmem:[%s612_s1 + $0x58] sm:$0xff]  }
   0x4   :  { %406 = vmatprep.subr.bf16.mxu0 %v464_v2  ;;  %442 = vmatprep.subr.bf16.mxu1 %v465_v3  ;;  %v471_v9 = vld [vmem:[%s612_s1 + $0x90] sm:$0xff]   ;;  %v472_v10 = vld [vmem:[%s612_s1 + $0x18] sm:$0xff]   ;;  %v473_v11 = vld [vmem:[%s612_s1 + $0x60] sm:$0xff]  }
   0x5   :  { %443 = vmatpush3.bf16.msra.mxu1 %v465_v3  ;;  %v474_v12 = vld [vmem:[%s612_s1 + $0x98] sm:$0xff]   ;;  %v475_v13 = vld [vmem:[%s612_s1 + $0x20] sm:$0xff]   ;;  %v476_v15 = vld [vmem:[%s612_s1 + $0x68] sm:$0xff]  }
   0x6   :  { %444 = vmatprep.subr.bf16.mxu1 %v468_v6  ;;  %v477_v14 = vld [vmem:[%s612_s1 + $0xa0] sm:$0xff]   ;;  %v478_v16 = vld [vmem:[%s612_s1 + $0x28] sm:$0xff]   ;;  %v479_v18 = vld [vmem:[%s612_s1 + $0x70] sm:$0xff]  }
   0x7   :  { %407 = vmatpush3.bf16.msra.mxu0 %v466_v4  ;;  %v480_v17 = vld [vmem:[%s612_s1 + $0xa8] sm:$0xff]   ;;  %v481_v19 = vld [vmem:[%s612_s1 + $0x30] sm:$0xff]   ;;  %v482_v20 = vld [vmem:[%s612_s1 + $0x78] sm:$0xff]  }
   0x8   :  { %408 = vmatprep.subr.bf16.mxu0 %v467_v5  ;;  %v483_v21 = vld [vmem:[%s612_s1 + $0xb0] sm:$0xff]   ;;  %v484_v24 = vld [vmem:[%s612_s1 + $0x38] sm:$0xff]   ;;  %v485_v27 = vld [vmem:[%s613_s0] ss:$12 sps:$4 sm:$0xff]  }
   0x9   :  { %445 = vmatpush3.bf16.msra.mxu1 %v468_v6  ;;  %v487_v22 = vld [vmem:[%s613_s0 + $0x4] ss:$12 sps:$4 sm:$0xff]   ;;  %v489_v23 = vld [vmem:[%s613_s0 + $0x8] ss:$12 sps:$4 sm:$0xff]   ;;  %v488_v25 = vld [vmem:[%s612_s1 + $0xb8] sm:$0xff]  }
   0xa   :  { %446 = vmatprep.subr.bf16.mxu1 %v471_v9  ;;  %279 = vmatprep.mubr.bf16.mxu0 %v487_v22  ;;  %v19_v26 = vld [vmem:[%s613_s0 + $0x18] sm:$0xff]  ;;  %v490_v29 = vld [vmem:[%s613_s0 + $0x20] ss:$0 sps:$4 sm:$0xff]  }
   0xb   :  { %409 = vmatpush3.bf16.msra.mxu0 %v469_v7  ;;  %458 = vmatprep.mubr.bf16.mxu1 %v489_v23  ;;  %v372_v28 = vcombine.high %v19_v26, %v19_v26  ;;  %v371_v30 = vcombine.low %v19_v26, %v19_v26  ;;  %v367_v33 = vld [vmem:[%s614_s2] ss:$0 sm:$0xff] }
   0xc   :  { %410 = vmatprep.subr.bf16.mxu0 %v470_v8 }
   0xd   :  { %447 = vmatpush3.bf16.msra.mxu1 %v471_v9 }
   0xe   :  { %448 = vmatprep.subr.bf16.mxu1 %v474_v12 }
   0xf   :  { %411 = vmatpush3.bf16.msra.mxu0 %v472_v10 }
  0x10   :  { %412 = vmatprep.subr.bf16.mxu0 %v473_v11 }
  0x11   :  { %449 = vmatpush3.bf16.msra.mxu1 %v474_v12 }
  0x12   :  { %450 = vmatprep.subr.bf16.mxu1 %v477_v14 }
  0x13   :  { %413 = vmatpush3.bf16.msra.mxu0 %v475_v13 }
  0x14   :  { %414 = vmatprep.subr.bf16.mxu0 %v476_v15 }
  0x15   :  { %451 = vmatpush3.bf16.msra.mxu1 %v477_v14 }
  0x16   :  { %452 = vmatprep.subr.bf16.mxu1 %v480_v17 }
  0x17   :  { %415 = vmatpush3.bf16.msra.mxu0 %v478_v16 }
  0x18   :  { %416 = vmatprep.subr.bf16.mxu0 %v479_v18 }
  0x19   :  { %453 = vmatpush3.bf16.msra.mxu1 %v480_v17 }
  0x1a   :  { %454 = vmatprep.subr.bf16.mxu1 %v483_v21 }
  0x1b   :  { %417 = vmatpush3.bf16.msra.mxu0 %v481_v19 }
  0x1c   :  { %418 = vmatprep.subr.bf16.mxu0 %v482_v20 }
  0x1d   :  { %455 = vmatpush3.bf16.msra.mxu1 %v483_v21 }
  0x1e   :  { %456 = vmatprep.subr.bf16.mxu1 %v488_v25 }
  0x1f   :  { %419 = vmatpush3.bf16.msra.mxu0 %v484_v24 }
  0x21   :  { %457 = vmatpush3.bf16.msra.mxu1 %v488_v25 }
  0x22   :  { %280 = vmatmul.mubr.bf16.vlgmr.msra.gmra.mrb[0].mxu0 %v485_v27 }
  0x23   :  { %287 = vmatprep.mubr.bf16.mxu0 %v372_v28 }
  0x24   :  { %459 = vmatmul.mubr.bf16.vlgmr.msra.gmra.mrb[0].mxu1 %v490_v29 }
  0x2a   :  { %288 = vmatmul.mubr.bf16.gmra.mrb[4].mxu0 %v371_v30 }
  0xf5   :  { %v420_v31 = vpop.f32.mrb[0].mxu0 }
  0xf6   :  { %v421_v32 = vpop.f32.mrb[1].mxu0 }
  0xf7   :  { %v422_v34 = vadd.f32 %v421_v32, %v420_v31  ;;  %v423_v35 = vpop.f32.mrb[2].mxu0  ;;  %v460_v37 = vpop.f32.mrb[0].mxu1 }
  0xf8   :  { %v424_v36 = vpop.f32.mrb[3].mxu0  ;;  %v329_v40 = vpop.f32.mrb[1].mxu1 }
  0xf9   :  { %v425_v38 = vadd.f32 %v424_v36, %v423_v35  ;;  %v282_v39 = vadd.f32 %v422_v34, %v367_v33  ;;  %v461_v41 = vpop.f32.mrb[2].mxu1 }
  0xfa   :  { %v332_v44 = vpop.f32.mrb[3].mxu1 }
  0xfb   :  { %v330_v42 = vadd.f32 %v329_v40, %v282_v39  ;;  %v285_v43 = vadd.f32 %v425_v38, %v367_v33 }
  0xfd   :  { %v343_v45 = vmax.f32 %v330_v42, 0.0  ;;  %v333_v46 = vadd.f32 %v332_v44, %v285_v43  ;;  %v426_v47 = vpop.f32.mrb[4].mxu0 }
  0xfe   :  { %v427_v48 = vpop.f32.mrb[5].mxu0 }
  0xff   :  { %v401_v49 = vpack.c.bf16 %v343_v45, %v343_v45  ;;  %v344_v50 = vmax.f32 %v333_v46, 0.0  ;;  %v428_v51 = vadd.f32 %v427_v48, %v426_v47  ;;  %v429_v52 = vpop.f32.mrb[6].mxu0 }
 0x100   :  { %v430_v53 = vpop.f32.mrb[7].mxu0 }
 0x101   :  { %360 = vst.msk [vmem:[%s615_s3] sm:$0xf] %vm359_vm0, %v401_v49  ;;  %v402_v54 = vpack.c.bf16 %v344_v50, %v344_v50  ;;  %v290_v55 = vadd.f32 %v428_v51, %v367_v33 }
 0x103   :  { %361 = vst.msk [vmem:[%s615_s3 + $0x4] sm:$0xf] %vm359_vm0, %v402_v54  ;;  %v338_v56 = vadd.f32 %v460_v37, %v290_v55 }
 0x105   :  { %v345_v57 = vmax.f32 %v338_v56, 0.0 }
 0x107   :  { %v403_v58 = vpack.c.bf16 %v345_v57, %v345_v57 }
 0x109   :  { %362 = vst.msk [vmem:[%s615_s3 + $0x8] sm:$0xf] %vm359_vm0, %v403_v58 }

// kernel: squeezenet_forward.32
= control target key start
LH: loop header
LB: loop body
LE: loop exit
PB: predicated region body
PF: predicated region fallthrough
CT: control target
= control target key end

     0   :  { %vm359_vm0 = vcmask 519168   ;;  %s612_s1 = inlined_call_operand.vmem [shape: bf16[384,64], index: 1, kind: input, shape index: {}]   ;;  %s613_s0 = inlined_call_operand.vmem [shape: bf16[18,384], index: 0, kind: input, shape index: {}]   ;;  %s614_s2 = inlined_call_operand.vmem [shape: f32[1,64], index: 2, kind: input, shape index: {}]   ;;  %s615_s3 = inlined_call_operand.vmem [shape: bf16[18,64], index: 3, kind: output, shape index: {}]  }
   0x1   :  { %v462_v0 = vld [vmem:[%s612_s1 + $0x40] sm:$0xff]   ;;  %v464_v2 = vld [vmem:[%s612_s1 + $0x48] sm:$0xff]   ;;  %v467_v5 = vld [vmem:[%s612_s1 + $0x50] sm:$0xff]  }
   0x2   :  { %v463_v1 = vld [vmem:[%s612_s1] sm:$0xff]   ;;  %404 = vmatprep.subr.bf16.mxu0 %v462_v0  ;;  %v466_v4 = vld [vmem:[%s612_s1 + $0x8] sm:$0xff]   ;;  %v469_v7 = vld [vmem:[%s612_s1 + $0x10] sm:$0xff]  }
   0x3   :  { %405 = vmatpush3.bf16.msra.mxu0 %v463_v1  ;;  %v465_v3 = vld [vmem:[%s612_s1 + $0x80] sm:$0xff]   ;;  %v468_v6 = vld [vmem:[%s612_s1 + $0x88] sm:$0xff]   ;;  %v470_v8 = vld [vmem:[%s612_s1 + $0x58] sm:$0xff]  }
   0x4   :  { %406 = vmatprep.subr.bf16.mxu0 %v464_v2  ;;  %442 = vmatprep.subr.bf16.mxu1 %v465_v3  ;;  %v471_v9 = vld [vmem:[%s612_s1 + $0x90] sm:$0xff]   ;;  %v472_v10 = vld [vmem:[%s612_s1 + $0x18] sm:$0xff]   ;;  %v473_v11 = vld [vmem:[%s612_s1 + $0x60] sm:$0xff]  }
   0x5   :  { %443 = vmatpush3.bf16.msra.mxu1 %v465_v3  ;;  %v474_v12 = vld [vmem:[%s612_s1 + $0x98] sm:$0xff]   ;;  %v475_v13 = vld [vmem:[%s612_s1 + $0x20] sm:$0xff]   ;;  %v476_v15 = vld [vmem:[%s612_s1 + $0x68] sm:$0xff]  }
   0x6   :  { %444 = vmatprep.subr.bf16.mxu1 %v468_v6  ;;  %v477_v14 = vld [vmem:[%s612_s1 + $0xa0] sm:$0xff]   ;;  %v478_v16 = vld [vmem:[%s612_s1 + $0x28] sm:$0xff]   ;;  %v479_v18 = vld [vmem:[%s612_s1 + $0x70] sm:$0xff]  }
   0x7   :  { %407 = vmatpush3.bf16.msra.mxu0 %v466_v4  ;;  %v480_v17 = vld [vmem:[%s612_s1 + $0xa8] sm:$0xff]   ;;  %v481_v19 = vld [vmem:[%s612_s1 + $0x30] sm:$0xff]   ;;  %v482_v20 = vld [vmem:[%s612_s1 + $0x78] sm:$0xff]  }
   0x8   :  { %408 = vmatprep.subr.bf16.mxu0 %v467_v5  ;;  %v483_v21 = vld [vmem:[%s612_s1 + $0xb0] sm:$0xff]   ;;  %v484_v24 = vld [vmem:[%s612_s1 + $0x38] sm:$0xff]   ;;  %v485_v27 = vld [vmem:[%s613_s0] ss:$12 sps:$4 sm:$0xff]  }
   0x9   :  { %445 = vmatpush3.bf16.msra.mxu1 %v468_v6  ;;  %v487_v22 = vld [vmem:[%s613_s0 + $0x4] ss:$12 sps:$4 sm:$0xff]   ;;  %v489_v23 = vld [vmem:[%s613_s0 + $0x8] ss:$12 sps:$4 sm:$0xff]   ;;  %v488_v25 = vld [vmem:[%s612_s1 + $0xb8] sm:$0xff]  }
   0xa   :  { %446 = vmatprep.subr.bf16.mxu1 %v471_v9  ;;  %279 = vmatprep.mubr.bf16.mxu0 %v487_v22  ;;  %v19_v26 = vld [vmem:[%s613_s0 + $0x18] sm:$0xff]  ;;  %v490_v29 = vld [vmem:[%s613_s0 + $0x20] ss:$0 sps:$4 sm:$0xff]  }
   0xb   :  { %409 = vmatpush3.bf16.msra.mxu0 %v469_v7  ;;  %458 = vmatprep.mubr.bf16.mxu1 %v489_v23  ;;  %v372_v28 = vcombine.high %v19_v26, %v19_v26  ;;  %v371_v30 = vcombine.low %v19_v26, %v19_v26  ;;  %v367_v33 = vld [vmem:[%s614_s2] ss:$0 sm:$0xff] }
   0xc   :  { %410 = vmatprep.subr.bf16.mxu0 %v470_v8 }
   0xd   :  { %447 = vmatpush3.bf16.msra.mxu1 %v471_v9 }
   0xe   :  { %448 = vmatprep.subr.bf16.mxu1 %v474_v12 }
   0xf   :  { %411 = vmatpush3.bf16.msra.mxu0 %v472_v10 }
  0x10   :  { %412 = vmatprep.subr.bf16.mxu0 %v473_v11 }
  0x11   :  { %449 = vmatpush3.bf16.msra.mxu1 %v474_v12 }
  0x12   :  { %450 = vmatprep.subr.bf16.mxu1 %v477_v14 }
  0x13   :  { %413 = vmatpush3.bf16.msra.mxu0 %v475_v13 }
  0x14   :  { %414 = vmatprep.subr.bf16.mxu0 %v476_v15 }
  0x15   :  { %451 = vmatpush3.bf16.msra.mxu1 %v477_v14 }
  0x16   :  { %452 = vmatprep.subr.bf16.mxu1 %v480_v17 }
  0x17   :  { %415 = vmatpush3.bf16.msra.mxu0 %v478_v16 }
  0x18   :  { %416 = vmatprep.subr.bf16.mxu0 %v479_v18 }
  0x19   :  { %453 = vmatpush3.bf16.msra.mxu1 %v480_v17 }
  0x1a   :  { %454 = vmatprep.subr.bf16.mxu1 %v483_v21 }
  0x1b   :  { %417 = vmatpush3.bf16.msra.mxu0 %v481_v19 }
  0x1c   :  { %418 = vmatprep.subr.bf16.mxu0 %v482_v20 }
  0x1d   :  { %455 = vmatpush3.bf16.msra.mxu1 %v483_v21 }
  0x1e   :  { %456 = vmatprep.subr.bf16.mxu1 %v488_v25 }
  0x1f   :  { %419 = vmatpush3.bf16.msra.mxu0 %v484_v24 }
  0x21   :  { %457 = vmatpush3.bf16.msra.mxu1 %v488_v25 }
  0x22   :  { %280 = vmatmul.mubr.bf16.vlgmr.msra.gmra.mrb[0].mxu0 %v485_v27 }
  0x23   :  { %287 = vmatprep.mubr.bf16.mxu0 %v372_v28 }
  0x24   :  { %459 = vmatmul.mubr.bf16.vlgmr.msra.gmra.mrb[0].mxu1 %v490_v29 }
  0x2a   :  { %288 = vmatmul.mubr.bf16.gmra.mrb[4].mxu0 %v371_v30 }
  0xf5   :  { %v420_v31 = vpop.f32.mrb[0].mxu0 }
  0xf6   :  { %v421_v32 = vpop.f32.mrb[1].mxu0 }
  0xf7   :  { %v422_v34 = vadd.f32 %v421_v32, %v420_v31  ;;  %v423_v35 = vpop.f32.mrb[2].mxu0  ;;  %v460_v37 = vpop.f32.mrb[0].mxu1 }
  0xf8   :  { %v424_v36 = vpop.f32.mrb[3].mxu0  ;;  %v329_v40 = vpop.f32.mrb[1].mxu1 }
  0xf9   :  { %v425_v38 = vadd.f32 %v424_v36, %v423_v35  ;;  %v282_v39 = vadd.f32 %v422_v34, %v367_v33  ;;  %v461_v41 = vpop.f32.mrb[2].mxu1 }
  0xfa   :  { %v332_v44 = vpop.f32.mrb[3].mxu1 }
  0xfb   :  { %v330_v42 = vadd.f32 %v329_v40, %v282_v39  ;;  %v285_v43 = vadd.f32 %v425_v38, %v367_v33 }
  0xfd   :  { %v343_v45 = vmax.f32 %v330_v42, 0.0  ;;  %v333_v46 = vadd.f32 %v332_v44, %v285_v43  ;;  %v426_v47 = vpop.f32.mrb[4].mxu0 }
  0xfe   :  { %v427_v48 = vpop.f32.mrb[5].mxu0 }
  0xff   :  { %v401_v49 = vpack.c.bf16 %v343_v45, %v343_v45  ;;  %v344_v50 = vmax.f32 %v333_v46, 0.0  ;;  %v428_v51 = vadd.f32 %v427_v48, %v426_v47  ;;  %v429_v52 = vpop.f32.mrb[6].mxu0 }
 0x100   :  { %v430_v53 = vpop.f32.mrb[7].mxu0 }
 0x101   :  { %360 = vst.msk [vmem:[%s615_s3] sm:$0xf] %vm359_vm0, %v401_v49  ;;  %v402_v54 = vpack.c.bf16 %v344_v50, %v344_v50  ;;  %v290_v55 = vadd.f32 %v428_v51, %v367_v33 }
 0x103   :  { %361 = vst.msk [vmem:[%s615_s3 + $0x4] sm:$0xf] %vm359_vm0, %v402_v54  ;;  %v338_v56 = vadd.f32 %v460_v37, %v290_v55 }
 0x105   :  { %v345_v57 = vmax.f32 %v338_v56, 0.0 }
 0x107   :  { %v403_v58 = vpack.c.bf16 %v345_v57, %v345_v57 }
 0x109   :  { %362 = vst.msk [vmem:[%s615_s3 + $0x8] sm:$0xf] %vm359_vm0, %v403_v58 }

// kernel: squeezenet_forward.33
= control target key start
LH: loop header
LB: loop body
LE: loop exit
PB: predicated region body
PF: predicated region fallthrough
CT: control target
= control target key end

     0   :  { %s1506_s12 = smov 0   ;;  %s1508_s13 = smov 0   ;;  %s1797_s0 = inlined_call_operand.vmem [shape: bf16[18,576], index: 0, kind: input, shape index: {}]   ;;  %s1798_s1 = inlined_call_operand.vmem [shape: bf16[576,512], index: 1, kind: input, shape index: {}]   ;;  %s1799_s2 = inlined_call_operand.vmem [shape: f32[1,512], index: 2, kind: input, shape index: {}]   ;;  %s1800_s3 = inlined_call_operand.vmem [shape: bf16[18,512], index: 3, kind: output, shape index: {}]  }
   0x1   :  { %s1510_s14 = smov 0   ;;  %s1512_s15 = smov 0  }
   0x2   :  { %s1514_s16 = smov 0  }
   0x3 LB: > { %s22_s17 = sadd.s32 1, %s1480_s15  ;;  %s1211_s18 = sadd.s32 4294967295, %s1484_s16   ;;  %s1484_s16 = sphi %s1514_s16, %s13_s16   ;;  %s1480_s15 = sphi %s1512_s15, %s1805_s15   ;;  %s1476_s14 = sphi %s1510_s14, %s1804_s14   ;;  %s1472_s13 = sphi %s1508_s13, %s1803_s13   ;;  %s1468_s12 = sphi %s1506_s12, %s1802_s12  }
   0x4   : > { %p23_p0 = scmp.ge.s32.totalorder %s22_s17, 4  ;;  %p65_p1 = scmp.ne.s32.totalorder %s1472_s13, %s1468_s12 }
   0x5   : > { %p66_p2 = scmp.eq.s32.totalorder %s1484_s16, 0  ;;  %p123_p4 = scmp.eq.s32.totalorder %s1211_s18, 3 }
   0x6   : > { %s1807_s17 = smov (%p23_p0, %s22_s17), 0  ;;  %s58_s20 = sadd.s32 1, %s1472_s13 }
   0x7   : > { %p67_p3 = por %p66_p2, %p65_p1  ;;  %s55_s19 = ssub.s32 %s1480_s15, %s1807_s17 }
   0x8   : > { %p56_p5 = scmp.eq.s32.totalorder %s55_s19, 0  ;;  %p1541_p6 = por %p123_p4, %p65_p1 }
   0x9   : > { %p1215_p7 = scmp.ge.s32.totalorder %s1484_s16, 4 }
   0xa   : > { %s1546_s22 = scalar_select %p56_p5, %s1472_s13, %s58_s20  }
   0xb   : > { %155 = sbr.rel (%p1215_p7) target bundleno = 70 (0x46), region = 20 }
  0x12   : > { %158 = sbr.rel (!%p67_p3) target bundleno = 70 (0x46), region = 24  ;;  %s160_s23 = sand.u32 (%p67_p3), 1, %s1472_s13  }
  0x13   : > { %s1216_s24 = sshll.u32 (%p67_p3), %s1480_s15, 2  ;;  %s1355_s25 = smul.u32 (%p67_p3), 288, %s160_s23 }
  0x14   : > { %s1554_s28 = scalar_lea.vmem (%p67_p3), %s1798_s1, %s1216_s24 }
  0x15   : > { %v180_v0 = vld [vmem:[%s1554_s28] sm:$0xf] (%p67_p3)  ;;  %v182_v1 = vld [vmem:[%s1554_s28 + $0x10] sm:$0xf] (%p67_p3)  ;;  %s1561_s29 = scalar_lea.vmem (%p67_p3), [#allocation2], %s1355_s25 }
  0x16   : > { %v184_v2 = vld [vmem:[%s1554_s28 + $0x20] sm:$0xf] (%p67_p3)  ;;  %v186_v3 = vld [vmem:[%s1554_s28 + $0x30] sm:$0xf] (%p67_p3)  ;;  %181 = vst [vmem:[%s1561_s29] sm:$0xf] (%p67_p3), %v180_v0 }
  0x17   : > { %v188_v4 = vld [vmem:[%s1554_s28 + $0x40] sm:$0xf] (%p67_p3)  ;;  %183 = vst [vmem:[%s1561_s29 + $0x4] sm:$0xf] (%p67_p3), %v182_v1  ;;  %185 = vst [vmem:[%s1561_s29 + $0x8] sm:$0xf] (%p67_p3), %v184_v2 }
  0x18   : > { %187 = vst [vmem:[%s1561_s29 + $0xc] sm:$0xf] (%p67_p3), %v186_v3  ;;  %189 = vst [vmem:[%s1561_s29 + $0x10] sm:$0xf] (%p67_p3), %v188_v4  ;;  %v190_v5 = vld [vmem:[%s1554_s28 + $0x50] sm:$0xf] (%p67_p3) }
  0x19   : > { %v192_v6 = vld [vmem:[%s1554_s28 + $0x60] sm:$0xf]  ;;  %v194_v7 = vld [vmem:[%s1554_s28 + $0x70] sm:$0xf]  ;;  %191 = vst [vmem:[%s1561_s29 + $0x14] sm:$0xf] %v190_v5 }
  0x1a   : > { %193 = vst [vmem:[%s1561_s29 + $0x18] sm:$0xf] %v192_v6  ;;  %195 = vst [vmem:[%s1561_s29 + $0x1c] sm:$0xf] %v194_v7  ;;  %v196_v8 = vld [vmem:[%s1554_s28 + $0x80] sm:$0xf] }
  0x1b   : > { %v198_v9 = vld [vmem:[%s1554_s28 + $0x90] sm:$0xf]  ;;  %v200_v10 = vld [vmem:[%s1554_s28 + $0xa0] sm:$0xf]  ;;  %197 = vst [vmem:[%s1561_s29 + $0x20] sm:$0xf] %v196_v8 }
  0x1c   : > { %199 = vst [vmem:[%s1561_s29 + $0x24] sm:$0xf] %v198_v9  ;;  %201 = vst [vmem:[%s1561_s29 + $0x28] sm:$0xf] %v200_v10  ;;  %v202_v11 = vld [vmem:[%s1554_s28 + $0xb0] sm:$0xf] }
  0x1d   : > { %v204_v12 = vld [vmem:[%s1554_s28 + $0xc0] sm:$0xf]  ;;  %v206_v13 = vld [vmem:[%s1554_s28 + $0xd0] sm:$0xf]  ;;  %203 = vst [vmem:[%s1561_s29 + $0x2c] sm:$0xf] %v202_v11 }
  0x1e   : > { %205 = vst [vmem:[%s1561_s29 + $0x30] sm:$0xf] %v204_v12  ;;  %207 = vst [vmem:[%s1561_s29 + $0x34] sm:$0xf] %v206_v13  ;;  %v208_v14 = vld [vmem:[%s1554_s28 + $0xe0] sm:$0xf] }
  0x1f   : > { %v210_v15 = vld [vmem:[%s1554_s28 + $0xf0] sm:$0xf]  ;;  %v212_v16 = vld [vmem:[%s1554_s28 + $0x100] sm:$0xf]  ;;  %209 = vst [vmem:[%s1561_s29 + $0x38] sm:$0xf] %v208_v14 }
  0x20   : > { %211 = vst [vmem:[%s1561_s29 + $0x3c] sm:$0xf] %v210_v15  ;;  %213 = vst [vmem:[%s1561_s29 + $0x40] sm:$0xf] %v212_v16  ;;  %v214_v17 = vld [vmem:[%s1554_s28 + $0x110] sm:$0xf] }
  0x21   : > { %v216_v18 = vld [vmem:[%s1554_s28 + $0x120] sm:$0xf]  ;;  %v218_v19 = vld [vmem:[%s1554_s28 + $0x130] sm:$0xf]  ;;  %215 = vst [vmem:[%s1561_s29 + $0x44] sm:$0xf] %v214_v17 }
  0x22   : > { %217 = vst [vmem:[%s1561_s29 + $0x48] sm:$0xf] %v216_v18  ;;  %219 = vst [vmem:[%s1561_s29 + $0x4c] sm:$0xf] %v218_v19  ;;  %v220_v20 = vld [vmem:[%s1554_s28 + $0x140] sm:$0xf] }
  0x23   : > { %v222_v21 = vld [vmem:[%s1554_s28 + $0x150] sm:$0xf]  ;;  %v224_v22 = vld [vmem:[%s1554_s28 + $0x160] sm:$0xf]  ;;  %221 = vst [vmem:[%s1561_s29 + $0x50] sm:$0xf] %v220_v20 }
  0x24   : > { %223 = vst [vmem:[%s1561_s29 + $0x54] sm:$0xf] %v222_v21  ;;  %225 = vst [vmem:[%s1561_s29 + $0x58] sm:$0xf] %v224_v22  ;;  %v226_v23 = vld [vmem:[%s1554_s28 + $0x170] sm:$0xf] }
  0x25   : > { %v228_v24 = vld [vmem:[%s1554_s28 + $0x180] sm:$0xf]  ;;  %v230_v25 = vld [vmem:[%s1554_s28 + $0x190] sm:$0xf]  ;;  %227 = vst [vmem:[%s1561_s29 + $0x5c] sm:$0xf] %v226_v23 }
  0x26   : > { %229 = vst [vmem:[%s1561_s29 + $0x60] sm:$0xf] %v228_v24  ;;  %231 = vst [vmem:[%s1561_s29 + $0x64] sm:$0xf] %v230_v25  ;;  %v232_v26 = vld [vmem:[%s1554_s28 + $0x1a0] sm:$0xf] }
  0x27   : > { %v234_v27 = vld [vmem:[%s1554_s28 + $0x1b0] sm:$0xf]  ;;  %v236_v28 = vld [vmem:[%s1554_s28 + $0x1c0] sm:$0xf]  ;;  %233 = vst [vmem:[%s1561_s29 + $0x68] sm:$0xf] %v232_v26 }
  0x28   : > { %235 = vst [vmem:[%s1561_s29 + $0x6c] sm:$0xf] %v234_v27  ;;  %237 = vst [vmem:[%s1561_s29 + $0x70] sm:$0xf] %v236_v28  ;;  %v238_v29 = vld [vmem:[%s1554_s28 + $0x1d0] sm:$0xf] }
  0x29   : > { %v240_v30 = vld [vmem:[%s1554_s28 + $0x1e0] sm:$0xf]  ;;  %v242_v31 = vld [vmem:[%s1554_s28 + $0x1f0] sm:$0xf]  ;;  %239 = vst [vmem:[%s1561_s29 + $0x74] sm:$0xf] %v238_v29 }
  0x2a   : > { %241 = vst [vmem:[%s1561_s29 + $0x78] sm:$0xf] %v240_v30  ;;  %243 = vst [vmem:[%s1561_s29 + $0x7c] sm:$0xf] %v242_v31  ;;  %v244_v32 = vld [vmem:[%s1554_s28 + $0x200] sm:$0xf] }
  0x2b   : > { %v246_v33 = vld [vmem:[%s1554_s28 + $0x210] sm:$0xf]  ;;  %v248_v34 = vld [vmem:[%s1554_s28 + $0x220] sm:$0xf]  ;;  %245 = vst [vmem:[%s1561_s29 + $0x80] sm:$0xf] %v244_v32 }
  0x2c   : > { %247 = vst [vmem:[%s1561_s29 + $0x84] sm:$0xf] %v246_v33  ;;  %249 = vst [vmem:[%s1561_s29 + $0x88] sm:$0xf] %v248_v34  ;;  %v250_v35 = vld [vmem:[%s1554_s28 + $0x230] sm:$0xf] }
  0x2d   : > { %v252_v36 = vld [vmem:[%s1554_s28 + $0x240] sm:$0xf]  ;;  %v254_v37 = vld [vmem:[%s1554_s28 + $0x250] sm:$0xf]  ;;  %251 = vst [vmem:[%s1561_s29 + $0x8c] sm:$0xf] %v250_v35 }
  0x2e   : > { %253 = vst [vmem:[%s1561_s29 + $0x90] sm:$0xf] %v252_v36  ;;  %255 = vst [vmem:[%s1561_s29 + $0x94] sm:$0xf] %v254_v37  ;;  %v256_v38 = vld [vmem:[%s1554_s28 + $0x260] sm:$0xf] }
  0x2f   : > { %v258_v39 = vld [vmem:[%s1554_s28 + $0x270] sm:$0xf]  ;;  %v260_v40 = vld [vmem:[%s1554_s28 + $0x280] sm:$0xf]  ;;  %257 = vst [vmem:[%s1561_s29 + $0x98] sm:$0xf] %v256_v38 }
  0x30   : > { %259 = vst [vmem:[%s1561_s29 + $0x9c] sm:$0xf] %v258_v39  ;;  %261 = vst [vmem:[%s1561_s29 + $0xa0] sm:$0xf] %v260_v40  ;;  %v262_v41 = vld [vmem:[%s1554_s28 + $0x290] sm:$0xf] }
  0x31   : > { %v264_v42 = vld [vmem:[%s1554_s28 + $0x2a0] sm:$0xf]  ;;  %v266_v43 = vld [vmem:[%s1554_s28 + $0x2b0] sm:$0xf]  ;;  %263 = vst [vmem:[%s1561_s29 + $0xa4] sm:$0xf] %v262_v41 }
  0x32   : > { %265 = vst [vmem:[%s1561_s29 + $0xa8] sm:$0xf] %v264_v42  ;;  %267 = vst [vmem:[%s1561_s29 + $0xac] sm:$0xf] %v266_v43  ;;  %v268_v44 = vld [vmem:[%s1554_s28 + $0x2c0] sm:$0xf] }
  0x33   : > { %v270_v45 = vld [vmem:[%s1554_s28 + $0x2d0] sm:$0xf]  ;;  %v272_v46 = vld [vmem:[%s1554_s28 + $0x2e0] sm:$0xf]  ;;  %269 = vst [vmem:[%s1561_s29 + $0xb0] sm:$0xf] %v268_v44 }
  0x34   : > { %271 = vst [vmem:[%s1561_s29 + $0xb4] sm:$0xf] %v270_v45  ;;  %273 = vst [vmem:[%s1561_s29 + $0xb8] sm:$0xf] %v272_v46  ;;  %v274_v47 = vld [vmem:[%s1554_s28 + $0x2f0] sm:$0xf] }
  0x35   : > { %v276_v48 = vld [vmem:[%s1554_s28 + $0x300] sm:$0xf]  ;;  %v278_v49 = vld [vmem:[%s1554_s28 + $0x310] sm:$0xf]  ;;  %275 = vst [vmem:[%s1561_s29 + $0xbc] sm:$0xf] %v274_v47 }
  0x36   : > { %277 = vst [vmem:[%s1561_s29 + $0xc0] sm:$0xf] %v276_v48  ;;  %279 = vst [vmem:[%s1561_s29 + $0xc4] sm:$0xf] %v278_v49  ;;  %v280_v50 = vld [vmem:[%s1554_s28 + $0x320] sm:$0xf] }
  0x37   : > { %v282_v51 = vld [vmem:[%s1554_s28 + $0x330] sm:$0xf]  ;;  %v284_v52 = vld [vmem:[%s1554_s28 + $0x340] sm:$0xf]  ;;  %281 = vst [vmem:[%s1561_s29 + $0xc8] sm:$0xf] %v280_v50 }
  0x38   : > { %283 = vst [vmem:[%s1561_s29 + $0xcc] sm:$0xf] %v282_v51  ;;  %285 = vst [vmem:[%s1561_s29 + $0xd0] sm:$0xf] %v284_v52  ;;  %v286_v53 = vld [vmem:[%s1554_s28 + $0x350] sm:$0xf] }
  0x39   : > { %v288_v54 = vld [vmem:[%s1554_s28 + $0x360] sm:$0xf]  ;;  %v290_v55 = vld [vmem:[%s1554_s28 + $0x370] sm:$0xf]  ;;  %287 = vst [vmem:[%s1561_s29 + $0xd4] sm:$0xf] %v286_v53 }
  0x3a   : > { %289 = vst [vmem:[%s1561_s29 + $0xd8] sm:$0xf] %v288_v54  ;;  %291 = vst [vmem:[%s1561_s29 + $0xdc] sm:$0xf] %v290_v55  ;;  %v292_v56 = vld [vmem:[%s1554_s28 + $0x380] sm:$0xf] }
  0x3b   : > { %v294_v57 = vld [vmem:[%s1554_s28 + $0x390] sm:$0xf]  ;;  %v296_v58 = vld [vmem:[%s1554_s28 + $0x3a0] sm:$0xf]  ;;  %293 = vst [vmem:[%s1561_s29 + $0xe0] sm:$0xf] %v292_v56 }
  0x3c   : > { %295 = vst [vmem:[%s1561_s29 + $0xe4] sm:$0xf] %v294_v57  ;;  %297 = vst [vmem:[%s1561_s29 + $0xe8] sm:$0xf] %v296_v58  ;;  %v298_v59 = vld [vmem:[%s1554_s28 + $0x3b0] sm:$0xf] }
  0x3d   : > { %v300_v60 = vld [vmem:[%s1554_s28 + $0x3c0] sm:$0xf]  ;;  %v302_v61 = vld [vmem:[%s1554_s28 + $0x3d0] sm:$0xf]  ;;  %299 = vst [vmem:[%s1561_s29 + $0xec] sm:$0xf] %v298_v59 }
  0x3e   : > { %301 = vst [vmem:[%s1561_s29 + $0xf0] sm:$0xf] %v300_v60  ;;  %303 = vst [vmem:[%s1561_s29 + $0xf4] sm:$0xf] %v302_v61  ;;  %v304_v62 = vld [vmem:[%s1554_s28 + $0x3e0] sm:$0xf] }
  0x3f   : > { %v306_v63 = vld [vmem:[%s1554_s28 + $0x3f0] sm:$0xf]  ;;  %v308_v0 = vld [vmem:[%s1554_s28 + $0x400] sm:$0xf]  ;;  %305 = vst [vmem:[%s1561_s29 + $0xf8] sm:$0xf] %v304_v62 }
  0x40   : > { %307 = vst [vmem:[%s1561_s29 + $0xfc] sm:$0xf] %v306_v63  ;;  %309 = vst [vmem:[%s1561_s29 + $0x100] sm:$0xf] %v308_v0  ;;  %v310_v1 = vld [vmem:[%s1554_s28 + $0x410] sm:$0xf] }
  0x41   : > { %v312_v2 = vld [vmem:[%s1554_s28 + $0x420] sm:$0xf]  ;;  %v314_v3 = vld [vmem:[%s1554_s28 + $0x430] sm:$0xf]  ;;  %311 = vst [vmem:[%s1561_s29 + $0x104] sm:$0xf] %v310_v1 }
  0x42   : > { %313 = vst [vmem:[%s1561_s29 + $0x108] sm:$0xf] %v312_v2  ;;  %315 = vst [vmem:[%s1561_s29 + $0x10c] sm:$0xf] %v314_v3  ;;  %v316_v4 = vld [vmem:[%s1554_s28 + $0x440] sm:$0xf] }
  0x43   : > { %v318_v5 = vld [vmem:[%s1554_s28 + $0x450] sm:$0xf]  ;;  %v320_v6 = vld [vmem:[%s1554_s28 + $0x460] sm:$0xf]  ;;  %317 = vst [vmem:[%s1561_s29 + $0x110] sm:$0xf] %v316_v4 }
  0x44   : > { %319 = vst [vmem:[%s1561_s29 + $0x114] sm:$0xf] %v318_v5  ;;  %321 = vst [vmem:[%s1561_s29 + $0x118] sm:$0xf] %v320_v6  ;;  %v322_v7 = vld [vmem:[%s1554_s28 + $0x470] sm:$0xf] }
  0x45   : > { %323 = vst [vmem:[%s1561_s29 + $0x11c] sm:$0xf] %v322_v7 }
  0x46 PF: > { %p1217_p8 = scmp.ge.s32.totalorder %s1484_s16, 1  ;;  %p495_p9 = scmp.lt.s32.totalorder %s1484_s16, 5 }
  0x48   : > { %p496_p10 = pnand %p1217_p8, %p495_p9 }
  0x49   : > { %s502_s30 = sand.u32 (!%p496_p10), 1, %s1468_s12   ;;  %v1431_v8 = vld [vmem:[%s1797_s0 + $0x4] ss:$20 sps:$4 sm:$0xff] (!%p496_p10)   ;;  %v1436_v9 = vld [vmem:[%s1797_s0 + $0xc] ss:$20 sps:$4 sm:$0xff] (!%p496_p10)   ;;  %v552_v41 = vld [vmem:[%s1797_s0 + $0x30] sm:$0xff] (!%p496_p10) }
  0x4a   : > { %499 = sbr.rel (%p496_p10) target bundleno = 357 (0x165), region = 69  ;;  %930 = vmatprep.mubr.bf16.mxu0 (!%p496_p10), %v1431_v8  ;;  %978 = vmatprep.mubr.bf16.mxu1 (!%p496_p10), %v1436_v9  ;;  %v551_v37 = vld [vmem:[%s1797_s0 + $0x28] sm:$0xff] (!%p496_p10)  ;;  %v1429_v40 = vld [vmem:[%s1797_s0] ss:$20 sps:$4 sm:$0xff] (!%p496_p10)   ;;  %v1227_v49 = vcombine.high (!%p496_p10), %v552_v41, %v552_v41  ;;  %v1444_v52 = vld [vmem:[%s1797_s0 + $0x10] ss:$20 sps:$4 sm:$0xff] (!%p496_p10)   ;;  %v1226_v53 = vcombine.low (!%p496_p10), %v552_v41, %v552_v41 }
  0x4b   : > { %s1356_s4 = smul.u32 (!%p496_p10), 288, %s502_s30  ;;  %v1434_v44 = vld [vmem:[%s1797_s0 + $0x8] ss:$20 sps:$4 sm:$0xff] (!%p496_p10)   ;;  %v1225_v46 = vcombine.high (!%p496_p10), %v551_v37, %v551_v37  ;;  %v1224_v51 = vcombine.low (!%p496_p10), %v551_v37, %v551_v37  ;;  %vm891_vm0 = vcmask (!%p496_p10), 523264   ;;  %v1445_v55 = vld [vmem:[%s1797_s0 + $0x38] ss:$0 sps:$4 sm:$0xff] (!%p496_p10)  }
  0x4c   : > { %p540_p11 = scmp.lt.s32.totalorder (!%p496_p10), %s1476_s14, 3  ;;  %s1357_s8 = smul.u32 (!%p496_p10), 12, %s502_s30 }
  0x4d   : > { %s1713_s9 = scalar_lea.vmem (!%p496_p10), [#allocation2], %s1356_s4 }
  0x4e   : > { %v1398_v10 = vld [vmem:[%s1713_s9 + $0x40] sm:$0xff] (!%p496_p10)   ;;  %v1402_v14 = vld [vmem:[%s1713_s9 + $0x48] sm:$0xff] (!%p496_p10)   ;;  %v1406_v18 = vld [vmem:[%s1713_s9 + $0x50] sm:$0xff] (!%p496_p10)  }
  0x4f   : > { %v1399_v11 = vld [vmem:[%s1713_s9] sm:$0xff] (!%p496_p10)   ;;  %1281 = vmatprep.subr.bf16.mxu0 (!%p496_p10), %v1398_v10  ;;  %v1403_v15 = vld [vmem:[%s1713_s9 + $0x8] sm:$0xff] (!%p496_p10)   ;;  %v1407_v19 = vld [vmem:[%s1713_s9 + $0x10] sm:$0xff] (!%p496_p10)  }
  0x50   : > { %v1400_v12 = vld [vmem:[%s1713_s9 + $0xc0] sm:$0xff] (!%p496_p10)   ;;  %1282 = vmatpush3.bf16.msra.mxu0 (!%p496_p10), %v1399_v11  ;;  %v1404_v16 = vld [vmem:[%s1713_s9 + $0xc8] sm:$0xff] (!%p496_p10)   ;;  %v1408_v20 = vld [vmem:[%s1713_s9 + $0xd0] sm:$0xff] (!%p496_p10)  }
  0x51   : > { %v1401_v13 = vld [vmem:[%s1713_s9 + $0x80] sm:$0xff]   ;;  %1309 = vmatprep.subr.bf16.mxu1 %v1400_v12  ;;  %1283 = vmatprep.subr.bf16.mxu0 %v1402_v14  ;;  %v1405_v17 = vld [vmem:[%s1713_s9 + $0x88] sm:$0xff]   ;;  %v1409_v21 = vld [vmem:[%s1713_s9 + $0x90] sm:$0xff]   ;;  %s541_s4 = scalar_select %p540_p11, %s1476_s14, 3 }
  0x52   : > { %1310 = vmatpush3.bf16.msra.mxu1 %v1401_v13  ;;  %v1410_v22 = vld [vmem:[%s1713_s9 + $0x58] sm:$0xff]   ;;  %v1414_v26 = vld [vmem:[%s1713_s9 + $0x60] sm:$0xff]   ;;  %v1418_v30 = vld [vmem:[%s1713_s9 + $0x68] sm:$0xff]   ;;  %s1270_s12 = sshll.u32 (%p1541_p6), %s1476_s14, 2 }
  0x53   : > { %1311 = vmatprep.subr.bf16.mxu1 %v1404_v16  ;;  %v1411_v23 = vld [vmem:[%s1713_s9 + $0x18] sm:$0xff]   ;;  %v1415_v27 = vld [vmem:[%s1713_s9 + $0x20] sm:$0xff]   ;;  %v1419_v31 = vld [vmem:[%s1713_s9 + $0x28] sm:$0xff]   ;;  %s542_s7 = scalar_lea.vmem %s1799_s2, %s541_s4  ;;  %s1072_s11 = scalar_lea.vmem (%p1541_p6), %s1800_s3, %s1270_s12 }
  0x54   : > { %1284 = vmatpush3.bf16.msra.mxu0 %v1403_v15  ;;  %v1412_v24 = vld [vmem:[%s1713_s9 + $0xd8] sm:$0xff]   ;;  %v1416_v28 = vld [vmem:[%s1713_s9 + $0xe0] sm:$0xff]   ;;  %v1420_v32 = vld [vmem:[%s1713_s9 + $0xe8] sm:$0xff]  }
  0x55   : > { %1285 = vmatprep.subr.bf16.mxu0 %v1406_v18  ;;  %v1413_v25 = vld [vmem:[%s1713_s9 + $0x98] sm:$0xff]   ;;  %v1417_v29 = vld [vmem:[%s1713_s9 + $0xa0] sm:$0xff]   ;;  %v1421_v33 = vld [vmem:[%s1713_s9 + $0xa8] sm:$0xff]  }
  0x56   : > { %1312 = vmatpush3.bf16.msra.mxu1 %v1405_v17  ;;  %v1422_v34 = vld [vmem:[%s1713_s9 + $0x70] sm:$0xff]   ;;  %v1426_v39 = vld [vmem:[%s1713_s9 + $0x78] sm:$0xff]   ;;  %v1433_v47 = vld [vmem:[%s1713_s9 + $0x100] sm:$0xff]  }
  0x57   : > { %1313 = vmatprep.subr.bf16.mxu1 %v1408_v20  ;;  %v1423_v35 = vld [vmem:[%s1713_s9 + $0x30] sm:$0xff]   ;;  %v1427_v42 = vld [vmem:[%s1713_s9 + $0x38] sm:$0xff]   ;;  %v1437_v48 = vld [vmem:[%s1713_s9 + $0x108] sm:$0xff]  }
  0x58   : > { %1286 = vmatpush3.bf16.msra.mxu0 %v1407_v19  ;;  %v1424_v36 = vld [vmem:[%s1713_s9 + $0xf0] sm:$0xff]   ;;  %v1428_v43 = vld [vmem:[%s1713_s9 + $0xf8] sm:$0xff]   ;;  %v1218_v57 = vld [vmem:[%s542_s7] ss:$0 sm:$0xff] }
  0x59   : > { %1287 = vmatprep.subr.bf16.mxu0 %v1410_v22  ;;  %v1425_v38 = vld [vmem:[%s1713_s9 + $0xb0] sm:$0xff]   ;;  %v1432_v45 = vld [vmem:[%s1713_s9 + $0xb8] sm:$0xff]  }
  0x5a   : > { %1314 = vmatpush3.bf16.msra.mxu1 %v1409_v21  ;;  %v1440_v50 = vld [vmem:[%s1713_s9 + $0x110] sm:$0xff]   ;;  %v1443_v54 = vld [vmem:[%s1713_s9 + $0x118] sm:$0xff]   ;;  %s532_s9 = scalar_lea.vmem [#allocation3], %s1357_s8 }
  0x5b   : > { %1315 = vmatprep.subr.bf16.mxu1 %v1412_v24 }
  0x5c   : > { %1288 = vmatpush3.bf16.msra.mxu0 %v1411_v23 }
  0x5d   : > { %1289 = vmatprep.subr.bf16.mxu0 %v1414_v26 }
  0x5e   : > { %1316 = vmatpush3.bf16.msra.mxu1 %v1413_v25 }
  0x5f   : > { %1317 = vmatprep.subr.bf16.mxu1 %v1416_v28 }
  0x60   : > { %1290 = vmatpush3.bf16.msra.mxu0 %v1415_v27 }
  0x61   : > { %1291 = vmatprep.subr.bf16.mxu0 %v1418_v30 }
  0x62   : > { %1318 = vmatpush3.bf16.msra.mxu1 %v1417_v29 }
  0x63   : > { %1319 = vmatprep.subr.bf16.mxu1 %v1420_v32 }
  0x64   : > { %1292 = vmatpush3.bf16.msra.mxu0 %v1419_v31 }
  0x65   : > { %1293 = vmatprep.subr.bf16.mxu0 %v1422_v34 }
  0x66   : > { %1320 = vmatpush3.bf16.msra.mxu1 %v1421_v33 }
  0x67   : > { %1321 = vmatprep.subr.bf16.mxu1 %v1424_v36 }
  0x68   : > { %1294 = vmatpush3.bf16.msra.mxu0 %v1423_v35 }
  0x69   : > { %1295 = vmatprep.subr.bf16.mxu0 %v1426_v39 }
  0x6a   : > { %1322 = vmatpush3.bf16.msra.mxu1 %v1425_v38 }
  0x6b   : > { %1323 = vmatprep.subr.bf16.mxu1 %v1428_v43 }
  0x6c   : > { %1296 = vmatpush3.bf16.msra.mxu0 %v1427_v42 }
  0x6d   : > { %1343 = vmatprep.subr.bf16.mxu0 %v1433_v47 }
  0x6e   : > { %1324 = vmatpush3.bf16.msra.mxu1 %v1432_v45 }
  0x6f   : > { %931 = vmatmul.mubr.bf16.vlgmr.msra.gmra.mrb[0].mxu0 %v1429_v40 }
  0x70   : > { %1344 = vmatpush3.bf16.msra.mxu0 %v1433_v47  ;;  %938 = vmatprep.mubr.bf16.mxu0 %v1225_v46 }
  0x71   : > { %979 = vmatmul.mubr.bf16.vlgmr.msra.gmra.mrb[0].mxu1 %v1434_v44  ;;  %1345 = vmatprep.subr.bf16.mxu0 %v1437_v48 }
  0x72   : > { %986 = vmatprep.mubr.bf16.mxu1 %v1227_v49 }
  0x74   : > { %1346 = vmatpush3.bf16.msra.mxu0 %v1437_v48 }
  0x75   : > { %1347 = vmatprep.subr.bf16.mxu0 %v1440_v50 }
  0x77   : > { %939 = vmatmul.mubr.bf16.gmra.mrb[4].mxu0 %v1224_v51 }
  0x78   : > { %1348 = vmatpush3.bf16.msra.mxu0 %v1440_v50  ;;  %1351 = vmatprep.mubr.msk.bf16.mxu0 %vm891_vm0, %v1444_v52 }
  0x79   : > { %987 = vmatmul.mubr.bf16.gmra.mrb[4].mxu1 %v1226_v53  ;;  %1349 = vmatprep.subr.bf16.mxu0 %v1443_v54 }
  0x7c   : > { %1350 = vmatpush3.bf16.msra.mxu0 %v1443_v54 }
  0x7f   : > { %1352 = vmatmul.mubr.msk.bf16.vlgmr.msra.gmra.mrb[8].mxu0 %vm891_vm0, %v1445_v55 }
 0x142   : > { %v1297_v56 = vpop.f32.mrb[0].mxu0 }
 0x143   : > { %v1298_v58 = vpop.f32.mrb[1].mxu0 }
 0x144   : > { %v1299_v59 = vadd.f32 %v1298_v58, %v1297_v56  ;;  %v1300_v60 = vpop.f32.mrb[2].mxu0  ;;  %v1325_v61 = vpop.f32.mrb[0].mxu1 }
 0x145   : > { %v1301_v62 = vpop.f32.mrb[3].mxu0  ;;  %v1326_v63 = vpop.f32.mrb[1].mxu1 }
 0x146   : > { %v933_v0 = vadd.f32 %v1299_v59, %v1218_v57  ;;  %v1302_v1 = vadd.f32 %v1301_v62, %v1300_v60  ;;  %v1327_v2 = vadd.f32 %v1326_v63, %v1325_v61  ;;  %v1328_v3 = vpop.f32.mrb[2].mxu1 }
 0x147   : > { %v1329_v4 = vpop.f32.mrb[3].mxu1 }
 0x148   : > { %v936_v5 = vadd.f32 %v1302_v1, %v1218_v57  ;;  %v1330_v6 = vadd.f32 %v1329_v4, %v1328_v3  ;;  %v981_v7 = vadd.f32 %v1327_v2, %v933_v0 }
 0x14a   : > { %v1303_v8 = vpop.f32.mrb[4].mxu0  ;;  %v984_v9 = vadd.f32 %v1330_v6, %v936_v5 }
 0x14b   : > { %v1304_v10 = vpop.f32.mrb[5].mxu0 }
 0x14c   : > { %v1305_v11 = vadd.f32 %v1304_v10, %v1303_v8  ;;  %v1306_v12 = vpop.f32.mrb[6].mxu0  ;;  %v1331_v13 = vpop.f32.mrb[4].mxu1 }
 0x14d   : > { %v1307_v14 = vpop.f32.mrb[7].mxu0  ;;  %v1332_v15 = vpop.f32.mrb[5].mxu1 }
 0x14e   : > { %v941_v16 = vadd.f32 %v1305_v11, %v1218_v57  ;;  %v1333_v17 = vadd.f32 %v1332_v15, %v1331_v13  ;;  %v1334_v18 = vpop.f32.mrb[6].mxu1 }
 0x14f   : > { %v1335_v19 = vpop.f32.mrb[7].mxu1 }
 0x150   : > { %v989_v20 = vadd.f32 %v1333_v17, %v941_v16 }
 0x152   : > { %v1353_v21 = vpop.f32.mrb[8].mxu0 }
 0x153   : > { %v1037_v22 = vadd.f32 %v1353_v21, %v989_v20  ;;  %v1028_v23 = vpop.f32.mrb[9].mxu0 }
 0x154   : > { %v1029_v24 = vadd.f32 %v1028_v23, %v981_v7  ;;  %v1354_v25 = vpop.f32.mrb[10].mxu0 }
 0x155   : > { %v1044_v26 = vmax.f32 %v1037_v22, 0.0  ;;  %v1031_v27 = vpop.f32.mrb[11].mxu0 }
 0x156   : > { %v1032_v28 = vadd.f32 %v1031_v27, %v984_v9  ;;  %v1042_v30 = vmax.f32 %v1029_v24, 0.0  ;;  %1067 = sbr.rel (!%p1541_p6) target bundleno = 357 (0x165), region = 77 }
 0x157   : > { %v1275_v29 = vpack.c.bf16 %v1044_v26, %v1044_v26 }
 0x158   : > { %v1043_v31 = vmax.f32 %v1032_v28, 0.0 }
 0x159   : > { %1060 = vst [vmem:[%s532_s9 + $0x8] sm:$0xf] %v1275_v29 }
 0x15a   : > { %v1279_v32 = vpack.c.bf16 %v1043_v31, %v1042_v30 }
 0x15c   : > { %1280 = vst [vmem:[%s532_s9] sm:$0xff] %v1279_v32  }
 0x160   : > { %v1092_v35 = vld [vmem:[%s532_s9 + $0x8] sm:$0xf] }
 0x161   : > { %1093 = vst [vmem:[%s1072_s11 + $0x20] sm:$0xf] %v1092_v35 }
 0x163   : > { %v1088_v33 = vld [vmem:[%s532_s9] sm:$0xf]  ;;  %v1090_v34 = vld [vmem:[%s532_s9 + $0x4] sm:$0xf] }
 0x164   : > { %1089 = vst [vmem:[%s1072_s11] sm:$0xf] %v1088_v33  ;;  %1091 = vst [vmem:[%s1072_s11 + $0x10] sm:$0xf] %v1090_v34 }
 0x165 PF: > { %s13_s16 = sadd.s32 1, %s1484_s16   ;;  %s1802_s12 = smov %s1472_s13 }
 0x166   : > { %p10_p12 = scmp.ge.s32.totalorder %s13_s16, 6   ;;  %s1803_s13 = smov %s1546_s22 }
 0x167   : > { %s1804_s14 = smov %s1480_s15  ;;  %s1805_s15 = smov %s1807_s17 }
 0x168   :  { %12 = sbr.rel (!%p10_p12) target bundleno = 3 (0x3), region = 155 }

// kernel: squeezenet_forward.36
= control target key start
LH: loop header
LB: loop body
LE: loop exit
PB: predicated region body
PF: predicated region fallthrough
CT: control target
= control target key end

     0   :  { %v101_v31 = vlaneseq  ;;  %v596_v33 = vmov 1966171168   ;;  %vm437_vm0 = vcmask 516096   ;;  %s730_s0 = inlined_call_operand.vmem [shape: bf16[2,1,1,9,64], index: 0, kind: input, shape index: {}, may-alias: {0,4}]   ;;  %s731_s1 = inlined_call_operand.vmem [shape: bf16[2,512], index: 1, kind: input, shape index: {}]   ;;  %s732_s2 = inlined_call_operand.vmem [shape: bf16[512,64], index: 2, kind: input, shape index: {}]   ;;  %s733_s3 = inlined_call_operand.vmem [shape: f32[1,64], index: 3, kind: input, shape index: {}]   ;;  %s734_s4 = inlined_call_operand.vmem [shape: bf16[2,1,1,9,64], index: 4, kind: output, shape index: {}, may-alias: {0,4}]  }
   0x1   :  { %v560_v0 = vld [vmem:[%s732_s2 + $0x40] sm:$0xff]   ;;  %v564_v4 = vld [vmem:[%s732_s2 + $0x48] sm:$0xff]   ;;  %v568_v8 = vld [vmem:[%s732_s2 + $0x50] sm:$0xff]   ;;  %v99_v34 = vunpack.c.l.s4 %v596_v33 }
   0x2   :  { %v561_v1 = vld [vmem:[%s732_s2 + $0xc0] sm:$0xff]   ;;  %515 = vmatprep.subr.bf16.mxu0 %v560_v0  ;;  %v565_v5 = vld [vmem:[%s732_s2 + $0xc8] sm:$0xff]   ;;  %v569_v9 = vld [vmem:[%s732_s2 + $0xd0] sm:$0xff]   ;;  %v102_v35 = vshrl.u32 %v101_v31, 7 }
   0x3   :  { %v562_v2 = vld [vmem:[%s732_s2] sm:$0xff]   ;;  %537 = vmatprep.subr.bf16.mxu1 %v561_v1  ;;  %v566_v6 = vld [vmem:[%s732_s2 + $0x8] sm:$0xff]   ;;  %v570_v10 = vld [vmem:[%s732_s2 + $0x10] sm:$0xff]   ;;  %v100_v38 = vunpack.c.0.s8 %v99_v34 }
   0x4   :  { %v563_v3 = vld [vmem:[%s732_s2 + $0x80] sm:$0xff]   ;;  %516 = vmatpush3.bf16.msra.mxu0 %v562_v2  ;;  %v567_v7 = vld [vmem:[%s732_s2 + $0x88] sm:$0xff]   ;;  %v571_v11 = vld [vmem:[%s732_s2 + $0x90] sm:$0xff]  }
   0x5   :  { %538 = vmatpush3.bf16.msra.mxu1 %v563_v3  ;;  %517 = vmatprep.subr.bf16.mxu0 %v564_v4  ;;  %v572_v12 = vld [vmem:[%s732_s2 + $0x58] sm:$0xff]   ;;  %v576_v16 = vld [vmem:[%s732_s2 + $0x60] sm:$0xff]   ;;  %v580_v20 = vld [vmem:[%s732_s2 + $0x68] sm:$0xff]   ;;  %v103_v39 = vsub.s32 %v100_v38, %v102_v35 }
   0x6   :  { %539 = vmatprep.subr.bf16.mxu1 %v565_v5  ;;  %v573_v13 = vld [vmem:[%s732_s2 + $0xd8] sm:$0xff]   ;;  %v577_v17 = vld [vmem:[%s732_s2 + $0xe0] sm:$0xff]   ;;  %v581_v21 = vld [vmem:[%s732_s2 + $0xe8] sm:$0xff]  }
   0x7   :  { %v574_v14 = vld [vmem:[%s732_s2 + $0x18] sm:$0xff]   ;;  %v578_v18 = vld [vmem:[%s732_s2 + $0x20] sm:$0xff]   ;;  %v582_v22 = vld [vmem:[%s732_s2 + $0x28] sm:$0xff]  }
   0x8   :  { %518 = vmatpush3.bf16.msra.mxu0 %v566_v6  ;;  %v575_v15 = vld [vmem:[%s732_s2 + $0x98] sm:$0xff]   ;;  %v579_v19 = vld [vmem:[%s732_s2 + $0xa0] sm:$0xff]   ;;  %v583_v23 = vld [vmem:[%s732_s2 + $0xa8] sm:$0xff]  }
   0x9   :  { %540 = vmatpush3.bf16.msra.mxu1 %v567_v7  ;;  %519 = vmatprep.subr.bf16.mxu0 %v568_v8  ;;  %v584_v24 = vld [vmem:[%s732_s2 + $0x70] sm:$0xff]   ;;  %v588_v28 = vld [vmem:[%s732_s2 + $0x78] sm:$0xff]   ;;  %v594_v36 = vld.sshfl [vmem:[%s731_s1] sm:$0xff pattern:$0x75316420] }
   0xa   :  { %541 = vmatprep.subr.bf16.mxu1 %v569_v9  ;;  %v585_v25 = vld [vmem:[%s732_s2 + $0xf0] sm:$0xff]   ;;  %v589_v29 = vld [vmem:[%s732_s2 + $0xf8] sm:$0xff]   ;;  %v595_v37 = vld.sshfl [vmem:[%s731_s1 + $0x8] sm:$0xff pattern:$0x75316420] }
   0xb   :  { %v586_v26 = vld [vmem:[%s732_s2 + $0x30] sm:$0xff]   ;;  %v590_v30 = vld [vmem:[%s732_s2 + $0x38] sm:$0xff]   ;;  %v113_v40 = vcombine.high %v594_v36, %v595_v37  ;;  %v112_v41 = vcombine.low %v594_v36, %v595_v37  ;;  %v481_v47 = vld [vmem:[%s733_s3] ss:$0 sm:$0xff] }
   0xc   :  { %520 = vmatpush3.bf16.msra.mxu0 %v570_v10  ;;  %v587_v27 = vld [vmem:[%s732_s2 + $0xb0] sm:$0xff]   ;;  %v591_v32 = vld [vmem:[%s732_s2 + $0xb8] sm:$0xff]  }
   0xd   :  { %542 = vmatpush3.bf16.msra.mxu1 %v571_v11  ;;  %521 = vmatprep.subr.bf16.mxu0 %v572_v12  ;;  %v127_v42 = vrot.slane %v113_v40, %v103_v39  ;;  %v120_v43 = vrot.slane %v112_v41, %v103_v39 }
   0xe   :  { %543 = vmatprep.subr.bf16.mxu1 %v573_v13 }
   0xf   :  { %358 = vmatprep.mubr.bf16.mxu0 %v127_v42  ;;  %v129_v44 = vcombine.high %v127_v42, %v127_v42  ;;  %v128_v45 = vcombine.high %v120_v43, %v120_v43 }
  0x10   :  { %522 = vmatpush3.bf16.msra.mxu0 %v574_v14 }
  0x11   :  { %544 = vmatpush3.bf16.msra.mxu1 %v575_v15  ;;  %523 = vmatprep.subr.bf16.mxu0 %v576_v16 }
  0x12   :  { %545 = vmatprep.subr.bf16.mxu1 %v577_v17  ;;  %398 = vmatprep.mubr.bf16.mxu1 %v129_v44 }
  0x14   :  { %524 = vmatpush3.bf16.msra.mxu0 %v578_v18 }
  0x15   :  { %546 = vmatpush3.bf16.msra.mxu1 %v579_v19  ;;  %525 = vmatprep.subr.bf16.mxu0 %v580_v20 }
  0x16   :  { %547 = vmatprep.subr.bf16.mxu1 %v581_v21 }
  0x18   :  { %526 = vmatpush3.bf16.msra.mxu0 %v582_v22 }
  0x19   :  { %548 = vmatpush3.bf16.msra.mxu1 %v583_v23  ;;  %527 = vmatprep.subr.bf16.mxu0 %v584_v24 }
  0x1a   :  { %549 = vmatprep.subr.bf16.mxu1 %v585_v25 }
  0x1c   :  { %528 = vmatpush3.bf16.msra.mxu0 %v586_v26 }
  0x1d   :  { %550 = vmatpush3.bf16.msra.mxu1 %v587_v27  ;;  %529 = vmatprep.subr.bf16.mxu0 %v588_v28 }
  0x1e   :  { %551 = vmatprep.subr.bf16.mxu1 %v589_v29 }
  0x20   :  { %530 = vmatpush3.bf16.msra.mxu0 %v590_v30 }
  0x21   :  { %552 = vmatpush3.bf16.msra.mxu1 %v591_v32 }
  0x23   :  { %359 = vmatmul.mubr.bf16.vlgmr.msra.gmra.mrb[0].mxu0 %v120_v43 }
  0x24   :  { %399 = vmatmul.mubr.bf16.vlgmr.msra.gmra.mrb[0].mxu1 %v128_v45 }
  0xf6   :  { %v531_v46 = vpop.f32.mrb[0].mxu0 }
  0xf7   :  { %v532_v48 = vpop.f32.mrb[1].mxu0  ;;  %v553_v49 = vpop.f32.mrb[0].mxu1 }
  0xf8   :  { %v533_v50 = vadd.f32 %v532_v48, %v531_v46  ;;  %v534_v51 = vpop.f32.mrb[2].mxu0  ;;  %v554_v52 = vpop.f32.mrb[1].mxu1 }
  0xf9   :  { %v535_v53 = vpop.f32.mrb[3].mxu0  ;;  %v555_v55 = vadd.f32 %v554_v52, %v553_v49  ;;  %v556_v56 = vpop.f32.mrb[2].mxu1 }
  0xfa   :  { %v361_v54 = vadd.f32 %v533_v50, %v481_v47  ;;  %v557_v57 = vpop.f32.mrb[3].mxu1 }
  0xfc   :  { %v401_v58 = vadd.f32 %v555_v55, %v361_v54 }
  0xfe   :  { %v406_v59 = vmax.f32 %v401_v58, 0.0 }
 0x100   :  { %v407_v60 = vpack.c.bf16 %v406_v59, %v406_v59 }
 0x102   :  { %v415_v61 = vrot.slane %v407_v60, %v103_v39 }
 0x104   :  { %v423_v62 = vrot.slane %v415_v61, %v103_v39 }
 0x106   :  { %438 = vst.msk [vmem:[#allocation2] sm:$0x1] %vm437_vm0, %v423_v62 }
 0x10d   :  { %v459_v63 = vld [vmem:[#allocation2] sm:$0x1] }
 0x10e   :  { %514 = vst [vmem:[%s734_s4 + $0x4] sm:$0x1] %v459_v63 }

// kernel: squeezenet_forward.34
= control target key start
LH: loop header
LB: loop body
LE: loop exit
PB: predicated region body
PF: predicated region fallthrough
CT: control target
= control target key end

     0   :  { %s1564_s12 = smov 0   ;;  %s1566_s13 = smov 0   ;;  %s1843_s0 = inlined_call_operand.vmem [shape: bf16[2,576], index: 0, kind: input, shape index: {}]   ;;  %s1844_s1 = inlined_call_operand.vmem [shape: bf16[576,512], index: 1, kind: input, shape index: {}]   ;;  %s1845_s2 = inlined_call_operand.vmem [shape: f32[1,512], index: 2, kind: input, shape index: {}]   ;;  %s1846_s3 = inlined_call_operand.vmem [shape: bf16[2,512], index: 3, kind: output, shape index: {}]  }
   0x1   :  { %s1568_s14 = smov 0   ;;  %s1570_s15 = smov 0  }
   0x2   :  { %s1572_s16 = smov 0  }
   0x3 LB: > { %s22_s17 = sadd.s32 1, %s1531_s15  ;;  %s1249_s18 = sadd.s32 4294967295, %s1535_s16   ;;  %s1535_s16 = sphi %s1572_s16, %s13_s16   ;;  %s1531_s15 = sphi %s1570_s15, %s1851_s15   ;;  %s1527_s14 = sphi %s1568_s14, %s1850_s14   ;;  %s1523_s13 = sphi %s1566_s13, %s1849_s13   ;;  %s1519_s12 = sphi %s1564_s12, %s1848_s12  }
   0x4   : > { %p23_p0 = scmp.ge.s32.totalorder %s22_s17, 4  ;;  %p65_p1 = scmp.ne.s32.totalorder %s1523_s13, %s1519_s12 }
   0x5   : > { %p66_p2 = scmp.eq.s32.totalorder %s1535_s16, 0  ;;  %p123_p4 = scmp.eq.s32.totalorder %s1249_s18, 3 }
   0x6   : > { %s1853_s17 = smov (%p23_p0, %s22_s17), 0  ;;  %s58_s20 = sadd.s32 1, %s1523_s13 }
   0x7   : > { %p67_p3 = por %p66_p2, %p65_p1  ;;  %s55_s19 = ssub.s32 %s1531_s15, %s1853_s17 }
   0x8   : > { %p56_p5 = scmp.eq.s32.totalorder %s55_s19, 0  ;;  %p1599_p6 = por %p123_p4, %p65_p1 }
   0x9   : > { %p1253_p7 = scmp.ge.s32.totalorder %s1535_s16, 4 }
   0xa   : > { %s1604_s22 = scalar_select %p56_p5, %s1523_s13, %s58_s20  }
   0xb   : > { %160 = sbr.rel (%p1253_p7) target bundleno = 70 (0x46), region = 20 }
  0x12   : > { %163 = sbr.rel (!%p67_p3) target bundleno = 70 (0x46), region = 24  ;;  %s165_s23 = sand.u32 (%p67_p3), 1, %s1523_s13  }
  0x13   : > { %s1254_s24 = sshll.u32 (%p67_p3), %s1531_s15, 2  ;;  %s1362_s25 = smul.u32 (%p67_p3), 288, %s165_s23 }
  0x14   : > { %s1612_s28 = scalar_lea.vmem (%p67_p3), %s1844_s1, %s1254_s24 }
  0x15   : > { %v185_v0 = vld [vmem:[%s1612_s28] sm:$0xf] (%p67_p3)  ;;  %v187_v1 = vld [vmem:[%s1612_s28 + $0x10] sm:$0xf] (%p67_p3)  ;;  %s1619_s29 = scalar_lea.vmem (%p67_p3), [#allocation2], %s1362_s25 }
  0x16   : > { %v189_v2 = vld [vmem:[%s1612_s28 + $0x20] sm:$0xf] (%p67_p3)  ;;  %v191_v3 = vld [vmem:[%s1612_s28 + $0x30] sm:$0xf] (%p67_p3)  ;;  %186 = vst [vmem:[%s1619_s29] sm:$0xf] (%p67_p3), %v185_v0 }
  0x17   : > { %v193_v4 = vld [vmem:[%s1612_s28 + $0x40] sm:$0xf] (%p67_p3)  ;;  %188 = vst [vmem:[%s1619_s29 + $0x4] sm:$0xf] (%p67_p3), %v187_v1  ;;  %190 = vst [vmem:[%s1619_s29 + $0x8] sm:$0xf] (%p67_p3), %v189_v2 }
  0x18   : > { %192 = vst [vmem:[%s1619_s29 + $0xc] sm:$0xf] (%p67_p3), %v191_v3  ;;  %194 = vst [vmem:[%s1619_s29 + $0x10] sm:$0xf] (%p67_p3), %v193_v4  ;;  %v195_v5 = vld [vmem:[%s1612_s28 + $0x50] sm:$0xf] (%p67_p3) }
  0x19   : > { %v197_v6 = vld [vmem:[%s1612_s28 + $0x60] sm:$0xf]  ;;  %v199_v7 = vld [vmem:[%s1612_s28 + $0x70] sm:$0xf]  ;;  %196 = vst [vmem:[%s1619_s29 + $0x14] sm:$0xf] %v195_v5 }
  0x1a   : > { %198 = vst [vmem:[%s1619_s29 + $0x18] sm:$0xf] %v197_v6  ;;  %200 = vst [vmem:[%s1619_s29 + $0x1c] sm:$0xf] %v199_v7  ;;  %v201_v8 = vld [vmem:[%s1612_s28 + $0x80] sm:$0xf] }
  0x1b   : > { %v203_v9 = vld [vmem:[%s1612_s28 + $0x90] sm:$0xf]  ;;  %v205_v10 = vld [vmem:[%s1612_s28 + $0xa0] sm:$0xf]  ;;  %202 = vst [vmem:[%s1619_s29 + $0x20] sm:$0xf] %v201_v8 }
  0x1c   : > { %204 = vst [vmem:[%s1619_s29 + $0x24] sm:$0xf] %v203_v9  ;;  %206 = vst [vmem:[%s1619_s29 + $0x28] sm:$0xf] %v205_v10  ;;  %v207_v11 = vld [vmem:[%s1612_s28 + $0xb0] sm:$0xf] }
  0x1d   : > { %v209_v12 = vld [vmem:[%s1612_s28 + $0xc0] sm:$0xf]  ;;  %v211_v13 = vld [vmem:[%s1612_s28 + $0xd0] sm:$0xf]  ;;  %208 = vst [vmem:[%s1619_s29 + $0x2c] sm:$0xf] %v207_v11 }
  0x1e   : > { %210 = vst [vmem:[%s1619_s29 + $0x30] sm:$0xf] %v209_v12  ;;  %212 = vst [vmem:[%s1619_s29 + $0x34] sm:$0xf] %v211_v13  ;;  %v213_v14 = vld [vmem:[%s1612_s28 + $0xe0] sm:$0xf] }
  0x1f   : > { %v215_v15 = vld [vmem:[%s1612_s28 + $0xf0] sm:$0xf]  ;;  %v217_v16 = vld [vmem:[%s1612_s28 + $0x100] sm:$0xf]  ;;  %214 = vst [vmem:[%s1619_s29 + $0x38] sm:$0xf] %v213_v14 }
  0x20   : > { %216 = vst [vmem:[%s1619_s29 + $0x3c] sm:$0xf] %v215_v15  ;;  %218 = vst [vmem:[%s1619_s29 + $0x40] sm:$0xf] %v217_v16  ;;  %v219_v17 = vld [vmem:[%s1612_s28 + $0x110] sm:$0xf] }
  0x21   : > { %v221_v18 = vld [vmem:[%s1612_s28 + $0x120] sm:$0xf]  ;;  %v223_v19 = vld [vmem:[%s1612_s28 + $0x130] sm:$0xf]  ;;  %220 = vst [vmem:[%s1619_s29 + $0x44] sm:$0xf] %v219_v17 }
  0x22   : > { %222 = vst [vmem:[%s1619_s29 + $0x48] sm:$0xf] %v221_v18  ;;  %224 = vst [vmem:[%s1619_s29 + $0x4c] sm:$0xf] %v223_v19  ;;  %v225_v20 = vld [vmem:[%s1612_s28 + $0x140] sm:$0xf] }
  0x23   : > { %v227_v21 = vld [vmem:[%s1612_s28 + $0x150] sm:$0xf]  ;;  %v229_v22 = vld [vmem:[%s1612_s28 + $0x160] sm:$0xf]  ;;  %226 = vst [vmem:[%s1619_s29 + $0x50] sm:$0xf] %v225_v20 }
  0x24   : > { %228 = vst [vmem:[%s1619_s29 + $0x54] sm:$0xf] %v227_v21  ;;  %230 = vst [vmem:[%s1619_s29 + $0x58] sm:$0xf] %v229_v22  ;;  %v231_v23 = vld [vmem:[%s1612_s28 + $0x170] sm:$0xf] }
  0x25   : > { %v233_v24 = vld [vmem:[%s1612_s28 + $0x180] sm:$0xf]  ;;  %v235_v25 = vld [vmem:[%s1612_s28 + $0x190] sm:$0xf]  ;;  %232 = vst [vmem:[%s1619_s29 + $0x5c] sm:$0xf] %v231_v23 }
  0x26   : > { %234 = vst [vmem:[%s1619_s29 + $0x60] sm:$0xf] %v233_v24  ;;  %236 = vst [vmem:[%s1619_s29 + $0x64] sm:$0xf] %v235_v25  ;;  %v237_v26 = vld [vmem:[%s1612_s28 + $0x1a0] sm:$0xf] }
  0x27   : > { %v239_v27 = vld [vmem:[%s1612_s28 + $0x1b0] sm:$0xf]  ;;  %v241_v28 = vld [vmem:[%s1612_s28 + $0x1c0] sm:$0xf]  ;;  %238 = vst [vmem:[%s1619_s29 + $0x68] sm:$0xf] %v237_v26 }
  0x28   : > { %240 = vst [vmem:[%s1619_s29 + $0x6c] sm:$0xf] %v239_v27  ;;  %242 = vst [vmem:[%s1619_s29 + $0x70] sm:$0xf] %v241_v28  ;;  %v243_v29 = vld [vmem:[%s1612_s28 + $0x1d0] sm:$0xf] }
  0x29   : > { %v245_v30 = vld [vmem:[%s1612_s28 + $0x1e0] sm:$0xf]  ;;  %v247_v31 = vld [vmem:[%s1612_s28 + $0x1f0] sm:$0xf]  ;;  %244 = vst [vmem:[%s1619_s29 + $0x74] sm:$0xf] %v243_v29 }
  0x2a   : > { %246 = vst [vmem:[%s1619_s29 + $0x78] sm:$0xf] %v245_v30  ;;  %248 = vst [vmem:[%s1619_s29 + $0x7c] sm:$0xf] %v247_v31  ;;  %v249_v32 = vld [vmem:[%s1612_s28 + $0x200] sm:$0xf] }
  0x2b   : > { %v251_v33 = vld [vmem:[%s1612_s28 + $0x210] sm:$0xf]  ;;  %v253_v34 = vld [vmem:[%s1612_s28 + $0x220] sm:$0xf]  ;;  %250 = vst [vmem:[%s1619_s29 + $0x80] sm:$0xf] %v249_v32 }
  0x2c   : > { %252 = vst [vmem:[%s1619_s29 + $0x84] sm:$0xf] %v251_v33  ;;  %254 = vst [vmem:[%s1619_s29 + $0x88] sm:$0xf] %v253_v34  ;;  %v255_v35 = vld [vmem:[%s1612_s28 + $0x230] sm:$0xf] }
  0x2d   : > { %v257_v36 = vld [vmem:[%s1612_s28 + $0x240] sm:$0xf]  ;;  %v259_v37 = vld [vmem:[%s1612_s28 + $0x250] sm:$0xf]  ;;  %256 = vst [vmem:[%s1619_s29 + $0x8c] sm:$0xf] %v255_v35 }
  0x2e   : > { %258 = vst [vmem:[%s1619_s29 + $0x90] sm:$0xf] %v257_v36  ;;  %260 = vst [vmem:[%s1619_s29 + $0x94] sm:$0xf] %v259_v37  ;;  %v261_v38 = vld [vmem:[%s1612_s28 + $0x260] sm:$0xf] }
  0x2f   : > { %v263_v39 = vld [vmem:[%s1612_s28 + $0x270] sm:$0xf]  ;;  %v265_v40 = vld [vmem:[%s1612_s28 + $0x280] sm:$0xf]  ;;  %262 = vst [vmem:[%s1619_s29 + $0x98] sm:$0xf] %v261_v38 }
  0x30   : > { %264 = vst [vmem:[%s1619_s29 + $0x9c] sm:$0xf] %v263_v39  ;;  %266 = vst [vmem:[%s1619_s29 + $0xa0] sm:$0xf] %v265_v40  ;;  %v267_v41 = vld [vmem:[%s1612_s28 + $0x290] sm:$0xf] }
  0x31   : > { %v269_v42 = vld [vmem:[%s1612_s28 + $0x2a0] sm:$0xf]  ;;  %v271_v43 = vld [vmem:[%s1612_s28 + $0x2b0] sm:$0xf]  ;;  %268 = vst [vmem:[%s1619_s29 + $0xa4] sm:$0xf] %v267_v41 }
  0x32   : > { %270 = vst [vmem:[%s1619_s29 + $0xa8] sm:$0xf] %v269_v42  ;;  %272 = vst [vmem:[%s1619_s29 + $0xac] sm:$0xf] %v271_v43  ;;  %v273_v44 = vld [vmem:[%s1612_s28 + $0x2c0] sm:$0xf] }
  0x33   : > { %v275_v45 = vld [vmem:[%s1612_s28 + $0x2d0] sm:$0xf]  ;;  %v277_v46 = vld [vmem:[%s1612_s28 + $0x2e0] sm:$0xf]  ;;  %274 = vst [vmem:[%s1619_s29 + $0xb0] sm:$0xf] %v273_v44 }
  0x34   : > { %276 = vst [vmem:[%s1619_s29 + $0xb4] sm:$0xf] %v275_v45  ;;  %278 = vst [vmem:[%s1619_s29 + $0xb8] sm:$0xf] %v277_v46  ;;  %v279_v47 = vld [vmem:[%s1612_s28 + $0x2f0] sm:$0xf] }
  0x35   : > { %v281_v48 = vld [vmem:[%s1612_s28 + $0x300] sm:$0xf]  ;;  %v283_v49 = vld [vmem:[%s1612_s28 + $0x310] sm:$0xf]  ;;  %280 = vst [vmem:[%s1619_s29 + $0xbc] sm:$0xf] %v279_v47 }
  0x36   : > { %282 = vst [vmem:[%s1619_s29 + $0xc0] sm:$0xf] %v281_v48  ;;  %284 = vst [vmem:[%s1619_s29 + $0xc4] sm:$0xf] %v283_v49  ;;  %v285_v50 = vld [vmem:[%s1612_s28 + $0x320] sm:$0xf] }
  0x37   : > { %v287_v51 = vld [vmem:[%s1612_s28 + $0x330] sm:$0xf]  ;;  %v289_v52 = vld [vmem:[%s1612_s28 + $0x340] sm:$0xf]  ;;  %286 = vst [vmem:[%s1619_s29 + $0xc8] sm:$0xf] %v285_v50 }
  0x38   : > { %288 = vst [vmem:[%s1619_s29 + $0xcc] sm:$0xf] %v287_v51  ;;  %290 = vst [vmem:[%s1619_s29 + $0xd0] sm:$0xf] %v289_v52  ;;  %v291_v53 = vld [vmem:[%s1612_s28 + $0x350] sm:$0xf] }
  0x39   : > { %v293_v54 = vld [vmem:[%s1612_s28 + $0x360] sm:$0xf]  ;;  %v295_v55 = vld [vmem:[%s1612_s28 + $0x370] sm:$0xf]  ;;  %292 = vst [vmem:[%s1619_s29 + $0xd4] sm:$0xf] %v291_v53 }
  0x3a   : > { %294 = vst [vmem:[%s1619_s29 + $0xd8] sm:$0xf] %v293_v54  ;;  %296 = vst [vmem:[%s1619_s29 + $0xdc] sm:$0xf] %v295_v55  ;;  %v297_v56 = vld [vmem:[%s1612_s28 + $0x380] sm:$0xf] }
  0x3b   : > { %v299_v57 = vld [vmem:[%s1612_s28 + $0x390] sm:$0xf]  ;;  %v301_v58 = vld [vmem:[%s1612_s28 + $0x3a0] sm:$0xf]  ;;  %298 = vst [vmem:[%s1619_s29 + $0xe0] sm:$0xf] %v297_v56 }
  0x3c   : > { %300 = vst [vmem:[%s1619_s29 + $0xe4] sm:$0xf] %v299_v57  ;;  %302 = vst [vmem:[%s1619_s29 + $0xe8] sm:$0xf] %v301_v58  ;;  %v303_v59 = vld [vmem:[%s1612_s28 + $0x3b0] sm:$0xf] }
  0x3d   : > { %v305_v60 = vld [vmem:[%s1612_s28 + $0x3c0] sm:$0xf]  ;;  %v307_v61 = vld [vmem:[%s1612_s28 + $0x3d0] sm:$0xf]  ;;  %304 = vst [vmem:[%s1619_s29 + $0xec] sm:$0xf] %v303_v59 }
  0x3e   : > { %306 = vst [vmem:[%s1619_s29 + $0xf0] sm:$0xf] %v305_v60  ;;  %308 = vst [vmem:[%s1619_s29 + $0xf4] sm:$0xf] %v307_v61  ;;  %v309_v62 = vld [vmem:[%s1612_s28 + $0x3e0] sm:$0xf] }
  0x3f   : > { %v311_v63 = vld [vmem:[%s1612_s28 + $0x3f0] sm:$0xf]  ;;  %v313_v0 = vld [vmem:[%s1612_s28 + $0x400] sm:$0xf]  ;;  %310 = vst [vmem:[%s1619_s29 + $0xf8] sm:$0xf] %v309_v62 }
  0x40   : > { %312 = vst [vmem:[%s1619_s29 + $0xfc] sm:$0xf] %v311_v63  ;;  %314 = vst [vmem:[%s1619_s29 + $0x100] sm:$0xf] %v313_v0  ;;  %v315_v1 = vld [vmem:[%s1612_s28 + $0x410] sm:$0xf] }
  0x41   : > { %v317_v2 = vld [vmem:[%s1612_s28 + $0x420] sm:$0xf]  ;;  %v319_v3 = vld [vmem:[%s1612_s28 + $0x430] sm:$0xf]  ;;  %316 = vst [vmem:[%s1619_s29 + $0x104] sm:$0xf] %v315_v1 }
  0x42   : > { %318 = vst [vmem:[%s1619_s29 + $0x108] sm:$0xf] %v317_v2  ;;  %320 = vst [vmem:[%s1619_s29 + $0x10c] sm:$0xf] %v319_v3  ;;  %v321_v4 = vld [vmem:[%s1612_s28 + $0x440] sm:$0xf] }
  0x43   : > { %v323_v5 = vld [vmem:[%s1612_s28 + $0x450] sm:$0xf]  ;;  %v325_v6 = vld [vmem:[%s1612_s28 + $0x460] sm:$0xf]  ;;  %322 = vst [vmem:[%s1619_s29 + $0x110] sm:$0xf] %v321_v4 }
  0x44   : > { %324 = vst [vmem:[%s1619_s29 + $0x114] sm:$0xf] %v323_v5  ;;  %326 = vst [vmem:[%s1619_s29 + $0x118] sm:$0xf] %v325_v6  ;;  %v327_v7 = vld [vmem:[%s1612_s28 + $0x470] sm:$0xf] }
  0x45   : > { %328 = vst [vmem:[%s1619_s29 + $0x11c] sm:$0xf] %v327_v7 }
  0x46 PF: > { %p1255_p8 = scmp.ge.s32.totalorder %s1535_s16, 1  ;;  %p500_p9 = scmp.lt.s32.totalorder %s1535_s16, 5 }
  0x48   : > { %p501_p10 = pnand %p1255_p8, %p500_p9 }
  0x49   : > { %s507_s30 = sand.u32 (!%p501_p10), 1, %s1519_s12   ;;  %v653_v37 = vlaneseq (!%p501_p10)  ;;  %v1541_v40 = vmov (!%p501_p10), 1966171168   ;;  %v1542_v44 = vmov (!%p501_p10), 0.0   ;;  %v1470_v45 = vld [vmem:[%s1843_s0] ss:$5 sps:$4 sm:$0xff] (!%p501_p10)  }
  0x4a   : > { %504 = sbr.rel (%p501_p10) target bundleno = 358 (0x166), region = 69  ;;  %v651_v41 = vunpack.c.l.s4 (!%p501_p10), %v1541_v40  ;;  %v1473_v46 = vld [vmem:[%s1843_s0 + $0xa] ss:$5 sps:$4 sm:$0xff] (!%p501_p10)   ;;  %v1472_v58 = vld [vmem:[%s1843_s0 + $0x4] ss:$5 sps:$4 sm:$0x11] (!%p501_p10)  }
  0x4b   : > { %s1363_s4 = smul.u32 (!%p501_p10), 288, %s507_s30  ;;  %v654_v42 = vshrl.u32 (!%p501_p10), %v653_v37, 7  ;;  %v1475_v59 = vld [vmem:[%s1843_s0 + $0xe] ss:$5 sps:$4 sm:$0x11] (!%p501_p10)   ;;  %vm1543_vm0 = vmmov (!%p501_p10), 0  }
  0x4c   : > { %v652_v47 = vunpack.c.0.s8 (!%p501_p10), %v651_v41  ;;  %vm924_vm1 = vcmask (!%p501_p10), 523264   ;;  %p552_p11 = scmp.lt.s32.totalorder (!%p501_p10), %s1527_s14, 3  ;;  %s1256_s26 = sshll.u32 (!%p501_p10), %s507_s30, 2 }
  0x4d   : > { %s1765_s5 = scalar_lea.vmem (!%p501_p10), [#allocation2], %s1363_s4  ;;  %s539_s27 = scalar_lea.vmem (!%p501_p10), [#allocation3], %s1256_s26  }
  0x4e   : > { %v1439_v8 = vld [vmem:[%s1765_s5 + $0x40] sm:$0xff] (!%p501_p10)   ;;  %v1443_v12 = vld [vmem:[%s1765_s5 + $0x48] sm:$0xff] (!%p501_p10)   ;;  %v1447_v16 = vld [vmem:[%s1765_s5 + $0x50] sm:$0xff] (!%p501_p10)   ;;  %v655_v48 = vsub.s32 (!%p501_p10), %v652_v47, %v654_v42 }
  0x4f   : > { %v1440_v9 = vld [vmem:[%s1765_s5] sm:$0xff] (!%p501_p10)   ;;  %1301 = vmatprep.subr.bf16.mxu0 (!%p501_p10), %v1439_v8  ;;  %v1444_v13 = vld [vmem:[%s1765_s5 + $0x8] sm:$0xff] (!%p501_p10)   ;;  %v1448_v17 = vld [vmem:[%s1765_s5 + $0x10] sm:$0xff] (!%p501_p10)  }
  0x50   : > { %v1441_v10 = vld [vmem:[%s1765_s5 + $0xc0] sm:$0xff] (!%p501_p10)   ;;  %1302 = vmatpush3.bf16.msra.mxu0 (!%p501_p10), %v1440_v9  ;;  %v1445_v14 = vld [vmem:[%s1765_s5 + $0xc8] sm:$0xff] (!%p501_p10)   ;;  %v1449_v18 = vld [vmem:[%s1765_s5 + $0xd0] sm:$0xff] (!%p501_p10)   ;;  %v656_v49 = vrot.slane (!%p501_p10), %v1470_v45, %v655_v48  ;;  %v670_v50 = vrot.slane (!%p501_p10), %v1473_v46, %v655_v48  ;;  %v663_v61 = vrot.slane (!%p501_p10), %v1472_v58, %v655_v48  ;;  %v677_v62 = vrot.slane (!%p501_p10), %v1475_v59, %v655_v48 }
  0x51   : > { %v1442_v11 = vld [vmem:[%s1765_s5 + $0x80] sm:$0xff]   ;;  %1323 = vmatprep.subr.bf16.mxu1 %v1441_v10  ;;  %1303 = vmatprep.subr.bf16.mxu0 %v1443_v12  ;;  %v1446_v15 = vld [vmem:[%s1765_s5 + $0x88] sm:$0xff]   ;;  %v1450_v19 = vld [vmem:[%s1765_s5 + $0x90] sm:$0xff]   ;;  %s553_s20 = scalar_select %p552_p11, %s1527_s14, 3 }
  0x52   : > { %1324 = vmatpush3.bf16.msra.mxu1 %v1442_v11  ;;  %v1451_v20 = vld [vmem:[%s1765_s5 + $0x58] sm:$0xff]   ;;  %v1455_v24 = vld [vmem:[%s1765_s5 + $0x60] sm:$0xff]   ;;  %v1459_v28 = vld [vmem:[%s1765_s5 + $0x68] sm:$0xff]   ;;  %v679_v51 = vcombine.high %v656_v49, %v670_v50  ;;  %v678_v52 = vcombine.low %v656_v49, %v670_v50  ;;  %v680_v0 = vcombine.low %v663_v61, %v677_v62  ;;  %s1096_s4 = scalar_lea.vmem (%p1599_p6), %s1846_s3, %s1527_s14  }
  0x53   : > { %1325 = vmatprep.subr.bf16.mxu1 %v1445_v14  ;;  %v1452_v21 = vld [vmem:[%s1765_s5 + $0x18] sm:$0xff]   ;;  %v1456_v25 = vld [vmem:[%s1765_s5 + $0x20] sm:$0xff]   ;;  %v1460_v29 = vld [vmem:[%s1765_s5 + $0x28] sm:$0xff]   ;;  %s554_s25 = scalar_lea.vmem %s1845_s2, %s553_s20 }
  0x54   : > { %1304 = vmatpush3.bf16.msra.mxu0 %v1444_v13  ;;  %v1453_v22 = vld [vmem:[%s1765_s5 + $0xd8] sm:$0xff]   ;;  %v1457_v26 = vld [vmem:[%s1765_s5 + $0xe0] sm:$0xff]   ;;  %v1461_v30 = vld [vmem:[%s1765_s5 + $0xe8] sm:$0xff]   ;;  %v701_v53 = vrot.slane %v679_v51, %v655_v48  ;;  %v687_v54 = vrot.slane %v678_v52, %v655_v48  ;;  %v694_v2 = vrot.slane %v680_v0, %v655_v48 }
  0x55   : > { %1305 = vmatprep.subr.bf16.mxu0 %v1447_v16  ;;  %v1454_v23 = vld [vmem:[%s1765_s5 + $0x98] sm:$0xff]   ;;  %v1458_v27 = vld [vmem:[%s1765_s5 + $0xa0] sm:$0xff]   ;;  %v1462_v31 = vld [vmem:[%s1765_s5 + $0xa8] sm:$0xff]  }
  0x56   : > { %1326 = vmatpush3.bf16.msra.mxu1 %v1446_v15  ;;  %v1463_v32 = vld [vmem:[%s1765_s5 + $0x70] sm:$0xff]   ;;  %v1467_v36 = vld [vmem:[%s1765_s5 + $0x78] sm:$0xff]   ;;  %v1477_v55 = vld [vmem:[%s1765_s5 + $0x100] sm:$0xff]   ;;  %960 = vmatprep.mubr.bf16.mxu0 %v701_v53  ;;  %v703_v56 = vcombine.high %v701_v53, %v701_v53  ;;  %v702_v57 = vcombine.high %v687_v54, %v687_v54 }
  0x57   : > { %1327 = vmatprep.subr.bf16.mxu1 %v1449_v18  ;;  %v1464_v33 = vld [vmem:[%s1765_s5 + $0x30] sm:$0xff]   ;;  %v1468_v38 = vld [vmem:[%s1765_s5 + $0x38] sm:$0xff]   ;;  %v1478_v60 = vld [vmem:[%s1765_s5 + $0x108] sm:$0xff]  }
  0x58   : > { %1306 = vmatpush3.bf16.msra.mxu0 %v1448_v17  ;;  %v1465_v34 = vld [vmem:[%s1765_s5 + $0xf0] sm:$0xff]   ;;  %v1469_v39 = vld [vmem:[%s1765_s5 + $0xf8] sm:$0xff]   ;;  %1000 = vmatprep.mubr.bf16.mxu1 %v703_v56  ;;  %v1257_v4 = vld [vmem:[%s554_s25] ss:$0 sm:$0xff] }
  0x59   : > { %1307 = vmatprep.subr.bf16.mxu0 %v1451_v20  ;;  %v1466_v35 = vld [vmem:[%s1765_s5 + $0xb0] sm:$0xff]   ;;  %v1476_v43 = vld [vmem:[%s1765_s5 + $0xb8] sm:$0xff]  }
  0x5a   : > { %1328 = vmatpush3.bf16.msra.mxu1 %v1450_v19  ;;  %v1479_v63 = vld [vmem:[%s1765_s5 + $0x110] sm:$0xff]   ;;  %v1480_v1 = vld [vmem:[%s1765_s5 + $0x118] sm:$0xff]   ;;  %s1537_s5 = smov (%p1599_p6), 0  }
  0x5b   : > { %1329 = vmatprep.subr.bf16.mxu1 %v1453_v22 }
  0x5c   : > { %1308 = vmatpush3.bf16.msra.mxu0 %v1452_v21 }
  0x5d   : > { %1309 = vmatprep.subr.bf16.mxu0 %v1455_v24 }
  0x5e   : > { %1330 = vmatpush3.bf16.msra.mxu1 %v1454_v23 }
  0x5f   : > { %1331 = vmatprep.subr.bf16.mxu1 %v1457_v26 }
  0x60   : > { %1310 = vmatpush3.bf16.msra.mxu0 %v1456_v25 }
  0x61   : > { %1311 = vmatprep.subr.bf16.mxu0 %v1459_v28 }
  0x62   : > { %1332 = vmatpush3.bf16.msra.mxu1 %v1458_v27 }
  0x63   : > { %1333 = vmatprep.subr.bf16.mxu1 %v1461_v30 }
  0x64   : > { %1312 = vmatpush3.bf16.msra.mxu0 %v1460_v29 }
  0x65   : > { %1313 = vmatprep.subr.bf16.mxu0 %v1463_v32 }
  0x66   : > { %1334 = vmatpush3.bf16.msra.mxu1 %v1462_v31 }
  0x67   : > { %1335 = vmatprep.subr.bf16.mxu1 %v1465_v34 }
  0x68   : > { %1314 = vmatpush3.bf16.msra.mxu0 %v1464_v33 }
  0x69   : > { %1315 = vmatprep.subr.bf16.mxu0 %v1467_v36 }
  0x6a   : > { %1336 = vmatpush3.bf16.msra.mxu1 %v1466_v35 }
  0x6b   : > { %1337 = vmatprep.subr.bf16.mxu1 %v1469_v39 }
  0x6c   : > { %1316 = vmatpush3.bf16.msra.mxu0 %v1468_v38 }
  0x6d   : > { %1350 = vmatprep.subr.bf16.mxu0 %v1542_v44 }
  0x6e   : > { %1338 = vmatpush3.bf16.msra.mxu1 %v1476_v43 }
  0x6f   : > { %961 = vmatmul.mubr.bf16.vlgmr.msra.gmra.mrb[0].mxu0 %v687_v54 }
  0x70   : > { %1351 = vmatpush3.bf16.msra.mxu0 %v1477_v55  ;;  %1358 = vmatprep.mubr.msk.bf16.mxu0 %vm1543_vm0, %v1542_v44 }
  0x71   : > { %1001 = vmatmul.mubr.bf16.vlgmr.msra.gmra.mrb[0].mxu1 %v702_v57  ;;  %1352 = vmatprep.subr.bf16.mxu0 %v1542_v44 }
  0x74   : > { %1353 = vmatpush3.bf16.msra.mxu0 %v1478_v60 }
  0x75   : > { %1354 = vmatprep.subr.bf16.mxu0 %v1542_v44 }
  0x78   : > { %1355 = vmatpush3.bf16.msra.mxu0 %v1479_v63 }
  0x79   : > { %1356 = vmatprep.subr.bf16.mxu0 %v1542_v44 }
  0x7c   : > { %1357 = vmatpush3.bf16.msra.mxu0 %v1480_v1 }
  0x7f   : > { %1359 = vmatmul.mubr.msk.bf16.vlgmr.msra.gmra.mrb[4].mxu0 %vm924_vm1, %v694_v2 }
 0x142   : > { %v1317_v3 = vpop.f32.mrb[0].mxu0 }
 0x143   : > { %v1318_v5 = vpop.f32.mrb[1].mxu0 }
 0x144   : > { %v1319_v6 = vadd.f32 %v1318_v5, %v1317_v3  ;;  %v1320_v7 = vpop.f32.mrb[2].mxu0  ;;  %v1339_v8 = vpop.f32.mrb[0].mxu1 }
 0x145   : > { %v1321_v9 = vpop.f32.mrb[3].mxu0  ;;  %v1340_v10 = vpop.f32.mrb[1].mxu1 }
 0x146   : > { %v963_v11 = vadd.f32 %v1319_v6, %v1257_v4  ;;  %v1341_v12 = vadd.f32 %v1340_v10, %v1339_v8  ;;  %v1342_v13 = vpop.f32.mrb[2].mxu1 }
 0x147   : > { %v1343_v14 = vpop.f32.mrb[3].mxu1 }
 0x148   : > { %v1003_v15 = vadd.f32 %v1341_v12, %v963_v11 }
 0x152   : > { %v1042_v16 = vpop.f32.mrb[4].mxu0 }
 0x153   : > { %v1043_v17 = vadd.f32 %v1042_v16, %v1003_v15  ;;  %v1360_v18 = vpop.f32.mrb[5].mxu0 }
 0x154   : > { %v1045_v19 = vpop.f32.mrb[6].mxu0 }
 0x155   : > { %v1048_v20 = vmax.f32 %v1043_v17, 0.0  ;;  %v1361_v21 = vpop.f32.mrb[7].mxu0  ;;  %1089 = sbr.rel (!%p1599_p6) target bundleno = 358 (0x166), region = 77 }
 0x157   : > { %v1049_v22 = vpack.c.bf16 %v1048_v20, %v1048_v20 }
 0x159   : > { %v1057_v23 = vrot.slane %v1049_v22, %v655_v48 }
 0x15b   : > { %1295 = vst.sshfl [vmem:[%s539_s27] sm:$0x1 pattern:$0x73625140] %v1057_v23 }
 0x15c LB: >> { %s1108_s5 = sadd.s32 1, %s1539_s5   ;;  %s1539_s5 = sphi %s1537_s5, %s1108_s5  }
 0x15d   : >> { %p1107_p12 = scmp.ge.s32.totalorder %s1108_s5, 1 }
 0x15f   : > { %1110 = sbr.rel (!%p1107_p12) target bundleno = 348 (0x15c), region = 148 }
 0x162   : >> { %v1114_v24 = vld [vmem:[%s539_s27] sm:$0x1] }
 0x163   : >> { %1115 = vst [vmem:[%s1096_s4] sm:$0x1] %v1114_v24 }
 0x166 PF: > { %s13_s16 = sadd.s32 1, %s1535_s16   ;;  %s1848_s12 = smov %s1523_s13 }
 0x167   : > { %p10_p13 = scmp.ge.s32.totalorder %s13_s16, 6   ;;  %s1849_s13 = smov %s1604_s22 }
 0x168   : > { %s1850_s14 = smov %s1531_s15  ;;  %s1851_s15 = smov %s1853_s17 }
 0x169   :  { %12 = sbr.rel (!%p10_p13) target bundleno = 3 (0x3), region = 159 }

// kernel: squeezenet_forward.35
= control target key start
LH: loop header
LB: loop body
LE: loop exit
PB: predicated region body
PF: predicated region fallthrough
CT: control target
= control target key end

     0   :  { %v94_v51 = vlaneseq  ;;  %s696_s0 = inlined_call_operand.vmem [shape: bf16[2,1,512], index: 0, kind: input, shape index: {}]   ;;  %s697_s1 = inlined_call_operand.vmem [shape: f32[512,128], index: 1, kind: input, shape index: {}]   ;;  %s698_s2 = inlined_call_operand.vmem [shape: f32[1,128], index: 2, kind: input, shape index: {}]   ;;  %s699_s3 = inlined_call_operand.hbm [shape: f32[2,128], index: 3, kind: output, shape index: {}]  }
   0x1   :  { %v37_v0 = vld [vmem:[%s697_s1 + $0x80] sm:$0xff]  ;;  %v38_v1 = vld [vmem:[%s697_s1 + $0x88] sm:$0xff]  ;;  %v39_v11 = vld [vmem:[%s697_s1 + $0x90] sm:$0xff] }
   0x2   :  { %v21_v2 = vld [vmem:[%s697_s1] sm:$0xff]  ;;  %v366_v3 = vpack.c.bf16 %v38_v1, %v37_v0  ;;  %v22_v4 = vld [vmem:[%s697_s1 + $0x8] sm:$0xff]  ;;  %v40_v13 = vld [vmem:[%s697_s1 + $0x98] sm:$0xff]  ;;  %v608_v0 = vshrl.u32 %v94_v51, 7 }
   0x3   :  { %v69_v5 = vld [vmem:[%s697_s1 + $0x180] sm:$0xff]  ;;  %v70_v6 = vld [vmem:[%s697_s1 + $0x188] sm:$0xff]  ;;  %v368_v7 = vpack.c.bf16 %v22_v4, %v21_v2  ;;  %v23_v14 = vld [vmem:[%s697_s1 + $0x10] sm:$0xff]  ;;  %v370_v16 = vpack.c.bf16 %v40_v13, %v39_v11 }
   0x4   :  { %v398_v8 = vpack.c.bf16 %v70_v6, %v69_v5  ;;  %v53_v9 = vld [vmem:[%s697_s1 + $0x100] sm:$0xff]  ;;  %v54_v10 = vld [vmem:[%s697_s1 + $0x108] sm:$0xff]  ;;  %367 = vmatprep.subr.bf16.mxu0 %v366_v3  ;;  %v24_v15 = vld [vmem:[%s697_s1 + $0x18] sm:$0xff] }
   0x5   :  { %v400_v12 = vpack.c.bf16 %v54_v10, %v53_v9  ;;  %369 = vmatpush3.bf16.msra.mxu0 %v368_v7  ;;  %v372_v17 = vpack.c.bf16 %v24_v15, %v23_v14  ;;  %v71_v18 = vld [vmem:[%s697_s1 + $0x190] sm:$0xff]  ;;  %v72_v19 = vld [vmem:[%s697_s1 + $0x198] sm:$0xff]  ;;  %v41_v23 = vld [vmem:[%s697_s1 + $0xa0] sm:$0xff] }
   0x6   :  { %399 = vmatprep.subr.bf16.mxu1 %v398_v8  ;;  %v55_v20 = vld [vmem:[%s697_s1 + $0x110] sm:$0xff]  ;;  %v402_v21 = vpack.c.bf16 %v72_v19, %v71_v18  ;;  %v56_v22 = vld [vmem:[%s697_s1 + $0x118] sm:$0xff]  ;;  %v42_v24 = vld [vmem:[%s697_s1 + $0xa8] sm:$0xff]  ;;  %371 = vmatprep.subr.bf16.mxu0 %v370_v16  ;;  %v100_v16 = vsub.s32 2, %v608_v0 }
   0x7   :  { %401 = vmatpush3.bf16.msra.mxu1 %v400_v12  ;;  %v404_v25 = vpack.c.bf16 %v56_v22, %v55_v20  ;;  %v374_v26 = vpack.c.bf16 %v42_v24, %v41_v23  ;;  %v25_v27 = vld [vmem:[%s697_s1 + $0x20] sm:$0xff]  ;;  %v26_v28 = vld [vmem:[%s697_s1 + $0x28] sm:$0xff]  ;;  %v43_v35 = vld [vmem:[%s697_s1 + $0xb0] sm:$0xff] }
   0x8   :  { %v73_v29 = vld [vmem:[%s697_s1 + $0x1a0] sm:$0xff]  ;;  %403 = vmatprep.subr.bf16.mxu1 %v402_v21  ;;  %v74_v30 = vld [vmem:[%s697_s1 + $0x1a8] sm:$0xff]  ;;  %v376_v33 = vpack.c.bf16 %v26_v28, %v25_v27  ;;  %v44_v36 = vld [vmem:[%s697_s1 + $0xb8] sm:$0xff]  ;;  %v108_v21 = vsub.s32 6, %v608_v0 }
   0x9   :  { %v57_v31 = vld [vmem:[%s697_s1 + $0x120] sm:$0xff]  ;;  %v58_v32 = vld [vmem:[%s697_s1 + $0x128] sm:$0xff]  ;;  %373 = vmatpush3.bf16.msra.mxu0 %v372_v17  ;;  %v406_v34 = vpack.c.bf16 %v74_v30, %v73_v29  ;;  %v27_v37 = vld [vmem:[%s697_s1 + $0x30] sm:$0xff]  ;;  %v378_v39 = vpack.c.bf16 %v44_v36, %v43_v35 }
   0xa   :  { %375 = vmatprep.subr.bf16.mxu0 %v374_v26  ;;  %v408_v38 = vpack.c.bf16 %v58_v32, %v57_v31  ;;  %v28_v40 = vld [vmem:[%s697_s1 + $0x38] sm:$0xff]  ;;  %v75_v41 = vld [vmem:[%s697_s1 + $0x1b0] sm:$0xff]  ;;  %v45_v46 = vld [vmem:[%s697_s1 + $0xc0] sm:$0xff] }
   0xb   :  { %405 = vmatpush3.bf16.msra.mxu1 %v404_v25  ;;  %v76_v42 = vld [vmem:[%s697_s1 + $0x1b8] sm:$0xff]  ;;  %v59_v44 = vld [vmem:[%s697_s1 + $0x130] sm:$0xff]  ;;  %v46_v47 = vld [vmem:[%s697_s1 + $0xc8] sm:$0xff]  ;;  %v380_v48 = vpack.c.bf16 %v28_v40, %v27_v37 }
   0xc   :  { %407 = vmatprep.subr.bf16.mxu1 %v406_v34  ;;  %v410_v43 = vpack.c.bf16 %v76_v42, %v75_v41  ;;  %v60_v45 = vld [vmem:[%s697_s1 + $0x138] sm:$0xff]  ;;  %v77_v49 = vld [vmem:[%s697_s1 + $0x1c0] sm:$0xff]  ;;  %v78_v50 = vld [vmem:[%s697_s1 + $0x1c8] sm:$0xff]  ;;  %v382_v53 = vpack.c.bf16 %v46_v47, %v45_v46 }
   0xd   :  { %377 = vmatpush3.bf16.msra.mxu0 %v376_v33  ;;  %v412_v52 = vpack.c.bf16 %v60_v45, %v59_v44  ;;  %v29_v54 = vld [vmem:[%s697_s1 + $0x40] sm:$0xff]  ;;  %v30_v55 = vld [vmem:[%s697_s1 + $0x48] sm:$0xff]  ;;  %v414_v57 = vpack.c.bf16 %v78_v50, %v77_v49  ;;  %v47_v59 = vld [vmem:[%s697_s1 + $0xd0] sm:$0xff] }
   0xe   :  { %379 = vmatprep.subr.bf16.mxu0 %v378_v39  ;;  %v61_v56 = vld [vmem:[%s697_s1 + $0x140] sm:$0xff]  ;;  %v62_v58 = vld [vmem:[%s697_s1 + $0x148] sm:$0xff]  ;;  %v48_v60 = vld [vmem:[%s697_s1 + $0xd8] sm:$0xff]  ;;  %v384_v63 = vpack.c.bf16 %v30_v55, %v29_v54 }
   0xf   :  { %409 = vmatpush3.bf16.msra.mxu1 %v408_v38  ;;  %v79_v61 = vld [vmem:[%s697_s1 + $0x1d0] sm:$0xff]  ;;  %v80_v62 = vld [vmem:[%s697_s1 + $0x1d8] sm:$0xff]  ;;  %v416_v1 = vpack.c.bf16 %v62_v58, %v61_v56  ;;  %v386_v2 = vpack.c.bf16 %v48_v60, %v47_v59  ;;  %v49_v8 = vld [vmem:[%s697_s1 + $0xe0] sm:$0xff] }
  0x10   :  { %411 = vmatprep.subr.bf16.mxu1 %v410_v43  ;;  %v31_v3 = vld [vmem:[%s697_s1 + $0x50] sm:$0xff]  ;;  %v32_v4 = vld [vmem:[%s697_s1 + $0x58] sm:$0xff]  ;;  %v418_v6 = vpack.c.bf16 %v80_v62, %v79_v61  ;;  %v50_v9 = vld [vmem:[%s697_s1 + $0xe8] sm:$0xff] }
  0x11   :  { %381 = vmatpush3.bf16.msra.mxu0 %v380_v48  ;;  %v63_v5 = vld [vmem:[%s697_s1 + $0x150] sm:$0xff]  ;;  %v64_v7 = vld [vmem:[%s697_s1 + $0x158] sm:$0xff]  ;;  %v81_v10 = vld [vmem:[%s697_s1 + $0x1e0] sm:$0xff]  ;;  %v388_v12 = vpack.c.bf16 %v32_v4, %v31_v3  ;;  %v390_v18 = vpack.c.bf16 %v50_v9, %v49_v8 }
  0x12   :  { %383 = vmatprep.subr.bf16.mxu0 %v382_v53  ;;  %v82_v11 = vld [vmem:[%s697_s1 + $0x1e8] sm:$0xff]  ;;  %v33_v13 = vld [vmem:[%s697_s1 + $0x60] sm:$0xff]  ;;  %v420_v17 = vpack.c.bf16 %v64_v7, %v63_v5 }
  0x13   :  { %413 = vmatpush3.bf16.msra.mxu1 %v412_v52  ;;  %v34_v14 = vld [vmem:[%s697_s1 + $0x68] sm:$0xff]  ;;  %v65_v15 = vld [vmem:[%s697_s1 + $0x160] sm:$0xff] }
  0x14   :  { %415 = vmatprep.subr.bf16.mxu1 %v414_v57  ;;  %v66_v19 = vld [vmem:[%s697_s1 + $0x168] sm:$0xff]  ;;  %v293_v20 = vld [vmem:[%s696_s0] sm:$0xff]  }
  0x15   :  { %385 = vmatpush3.bf16.msra.mxu0 %v384_v63 }
  0x16   :  { %387 = vmatprep.subr.bf16.mxu0 %v386_v2 }
  0x17   :  { %417 = vmatpush3.bf16.msra.mxu1 %v416_v1 }
  0x18   :  { %8 = vsyncpa [#allocation3], 0  ;;  %419 = vmatprep.subr.bf16.mxu1 %v418_v6  ;;  %v422_v22 = vpack.c.bf16 %v82_v11, %v81_v10  ;;  %v51_v23 = vld [vmem:[%s697_s1 + $0xf0] sm:$0xff]  ;;  %v52_v24 = vld [vmem:[%s697_s1 + $0xf8] sm:$0xff]  ;;  %v294_v25 = vunpack.c.l.bf16 %v293_v20  ;;  %v295_v26 = vunpack.c.h.bf16 %v293_v20  ;;  %vm126_vm0 = vcmask 1041409   ;;  %s455_s7 = smov [#allocation2]  }
  0x19   :  { %v83_v27 = vld [vmem:[%s697_s1 + $0x1f0] sm:$0xff]  ;;  %v84_v28 = vld [vmem:[%s697_s1 + $0x1f8] sm:$0xff]  ;;  %v96_v29 = vsub.s32 0, %v608_v0  ;;  %389 = vmatpush3.bf16.msra.mxu0 %v388_v12  ;;  %v392_v30 = vpack.c.bf16 %v34_v14, %v33_v13  ;;  %v424_v31 = vpack.c.bf16 %v66_v19, %v65_v15  ;;  %v394_v34 = vpack.c.bf16 %v52_v24, %v51_v23  ;;  %v291_v54 = vld [vmem:[%s698_s2] ss:$0 sm:$0xff]  ;;  %s283_s8 = sshll.u32 %s455_s7, 4  ;;  %s284_s8 = int_to_ptr.vmem [resolvable:$true] %s283_s8 }
  0x1a   :  { %v101_v32 = vrot.slane %v294_v25, %v100_v16  ;;  %v117_v33 = vrot.slane %v295_v26, %v100_v16  ;;  %391 = vmatprep.subr.bf16.mxu0 %v390_v18  ;;  %v35_v35 = vld [vmem:[%s697_s1 + $0x70] sm:$0xff]  ;;  %v36_v36 = vld [vmem:[%s697_s1 + $0x78] sm:$0xff]  ;;  %v109_v37 = vrot.slane %v294_v25, %v108_v21  ;;  %v125_v38 = vrot.slane %v295_v26, %v108_v21  ;;  %s431_s9 = scalar_lea.vmem %s284_s8, 32  ;;  %p436_p1 = scmp.lt.s32.totalorder %s284_s8, %s284_s8 }
  0x1b   :  { %421 = vmatpush3.bf16.msra.mxu1 %v420_v17  ;;  %v104_v39 = vsub.s32 4, %v608_v0  ;;  %v426_v40 = vpack.c.bf16 %v84_v28, %v83_v27  ;;  %v67_v41 = vld [vmem:[%s697_s1 + $0x170] sm:$0xff]  ;;  %v68_v42 = vld [vmem:[%s697_s1 + $0x178] sm:$0xff]  ;;  %v396_v45 = vpack.c.bf16 %v36_v36, %v35_v35  ;;  %v97_v46 = vrot.slane %v294_v25, %v96_v29  ;;  %p432_p0 = scmp.ne.s32.totalorder %s284_s8, %s431_s9  ;;  %p437_p2 = scmp.lt.s32.totalorder %s431_s9, %s431_s9 }
  0x1c   :  { %423 = vmatprep.subr.bf16.mxu1 %v422_v22  ;;  %v128_v43 = vsel %vm126_vm0, %v117_v33, %v101_v32  ;;  %v130_v44 = vsel %vm126_vm0, %v125_v38, %v109_v37  ;;  %v113_v47 = vrot.slane %v295_v26, %v96_v29  ;;  %v428_v48 = vpack.c.bf16 %v68_v42, %v67_v41 }
  0x1d   :  { %199 = vmatprep.mubr.f32.mxu0 %v128_v43  ;;  %393 = vmatpush3.bf16.msra.mxu0 %v392_v30  ;;  %v105_v49 = vrot.slane %v294_v25, %v104_v39  ;;  %v121_v50 = vrot.slane %v295_v26, %v104_v39  ;;  %p438_p3 = por %p437_p2, %p436_p1 }
  0x1e   :  { %269 = vmatprep.mubr.f32.mxu1 %v130_v44  ;;  %395 = vmatprep.subr.bf16.mxu0 %v394_v34  ;;  %v127_v51 = vsel %vm126_vm0, %v113_v47, %v97_v46 }
  0x1f   :  { %425 = vmatpush3.bf16.msra.mxu1 %v424_v31  ;;  %v129_v52 = vsel %vm126_vm0, %v121_v50, %v105_v49  ;;  %p439_p4 = pnand %p438_p3, %p432_p0 }
  0x20   :  { %427 = vmatprep.subr.bf16.mxu1 %v426_v40 }
  0x21   :  { %397 = vmatpush3.bf16.msra.mxu0 %v396_v45 }
  0x23   :  { %429 = vmatpush3.bf16.msra.mxu1 %v428_v48 }
  0x24   :  { %200 = vmatmul.mubr.f32.vlgmr.msra.gmra.mrb[0].mxu0 %v127_v51 }
  0x26   :  { %270 = vmatmul.mubr.f32.vlgmr.msra.gmra.mrb[0].mxu1 %v129_v52 }
  0xf7   :  { %v328_v53 = vpop.f32.mrb[0].mxu0 }
  0xf8   :  { %v329_v55 = vpop.f32.mrb[1].mxu0 }
  0xf9   :  { %v363_v56 = vpop.f32.mrb[0].mxu1  ;;  %v330_v57 = vadd.f32 %v329_v55, %v328_v53 }
  0xfa   :  { %v364_v58 = vpop.f32.mrb[1].mxu1 }
  0xfb   :  { %v365_v59 = vadd.f32 %v364_v58, %v363_v56  ;;  %v202_v60 = vadd.f32 %v330_v57, %v291_v54 }
  0xfd   :  { %v272_v61 = vadd.f32 %v365_v59, %v202_v60 }
  0xff   :  { %v275_v62 = vmax.f32 %v272_v61, 0.0 }
 0x101   :  { %276 = vst [vmem:[#allocation2] sm:$0x3] %v275_v62 }
 0x102   :  { %442 = shalt.err (!%p439_p4)
}
 0x103   :  { %s443_s11 = scalar_lea.hbm %s699_s3, 32 }
 0x104   :  { %p444_p5 = scmp.ne.s32.totalorder %s699_s3, %s443_s11  ;;  %p447_p6 = scmp.lt.u32.totalorder %s443_s11, %s699_s3 }
 0x106   :  { %p449_p7 = pnand %p447_p6, %p444_p5 }
 0x108   :  { %452 = shalt.err (!%p449_p7)
}
 0x109   :  { %286 = dma.vmem_to_hbm [thread:$0]  %s284_s8, 32, %s699_s3, [#allocation3]  }
 0x10a   :  { %453 = dma.done.wait [#allocation3], 32  }
 0x10b   :  { %454 = vsyncadd [#allocation3], 4294967264 }
 0x10c   :  { %290 = vsyncpa [#allocation3], 1 }

</bundles_post_ra>
